<compile_context>
chip_gen: v5e
topology: v5e:2x2
jax: 0.10.0
libtpu: 0.0.40
codegen_flags: <defaults>
</compile_context>

<pallas_src>
import functools

import jax
import jax.numpy as jnp
from jax.experimental import pallas as pl
from jax.experimental.pallas import tpu as pltpu


def _round_up(v, m):
    return ((v + m - 1) // m) * m


# ----------------------------------------------------------------------------
# Fused CrossAttention kernel: one row-block of the (padded) batch per step.
# Stacked row layout (leading axis): [x, y, inial_y2x, inial_x2y].
# ----------------------------------------------------------------------------
def _cross_attention_kernel(x_ref, qkv_w_ref, pb_w_ref, proj_w_ref, const_ref,
                            o_ref, *, scale, dim, num_heads, eps, approx_recip):
    hd = dim // num_heads
    tb = x_ref.shape[1]

    consts = const_ref[...].astype(jnp.float32)            # (4, dim)
    ln_g, ln_b = consts[0:1, :], consts[1:2, :]
    pb_bias, proj_bias = consts[2:3, :], consts[3:4, :]

    def layer_norm(t):
        mu = jnp.mean(t, axis=-1, keepdims=True)
        d = t - mu
        var = jnp.mean(d * d, axis=-1, keepdims=True)
        return d * jax.lax.rsqrt(var + eps) * ln_g + ln_b

    def mm(a, w_ref):
        # MXU matmul: operands in the weight dtype (bf16 by default), f32 acc.
        w = w_ref[...]
        return jnp.dot(a.astype(w.dtype), w, preferred_element_type=jnp.float32)

    # One LayerNorm pass over the whole 4-branch row stack.
    xs = jnp.concatenate([x_ref[i].astype(jnp.float32) for i in range(4)],
                         axis=0)                            # (4*tb, dim)
    ln = layer_norm(xs)                                     # [xn; yn; r1n; r2n]

    # Shared qkv projection only for the x / y rows (first 2*tb rows).
    qkv = mm(ln[:2 * tb, :], qkv_w_ref)                     # (2*tb, 3*dim) f32
    q2 = qkv[:, :dim]                                       # [q_x ; q_y]
    k2 = qkv[:, dim:2 * dim]                                # [k_x ; k_y]
    v2 = qkv[:, 2 * dim:]                                   # [v_x ; v_y]
    q2_swap = jnp.concatenate([q2[tb:, :], q2[:tb, :]], axis=0)   # [q_y ; q_x]

    def ew_attention(q, k, v):
        # Element-wise attention with an exact per-head softmax over head_dim:
        # per-head max + per-head sum via small lane-segment reductions
        # (XLU/VPU, f32) instead of a dense (C, C) seg matmul on the MXU.
        s = q * k * scale
        pieces = []
        for h in range(num_heads):
            lo, hi = h * hd, (h + 1) * hd
            sh = s[:, lo:hi]
            m = jnp.max(sh, axis=-1, keepdims=True)         # per-head max
            e = jnp.exp(sh - m)
            dsum = jnp.sum(e, axis=-1, keepdims=True)       # per-head denom (f32)
            inv = (pl.reciprocal(dsum, approx=True) if approx_recip
                   else 1.0 / dsum)
            pieces.append(e * inv * v[:, lo:hi])
        return jnp.concatenate(pieces, axis=-1)

    f_self = ew_attention(q2, k2, v2)          # rows: [x-branch ; y-branch]
    f_cross = ew_attention(q2_swap, k2, v2)    # rows: [y2x-branch ; x2y-branch]
    f = jnp.concatenate([f_self, f_cross], axis=0)          # (4*tb, dim)

    # proj_before as one block-diagonal (dim, dim) matmul, then residual,
    # second LayerNorm, final proj + residual.
    f = mm(f, pb_w_ref) + pb_bias
    f = f + ln
    f = layer_norm(f)
    out = mm(f, proj_w_ref) + proj_bias + f                 # (4*tb, dim)

    for i in range(4):
        o_ref[i] = out[i * tb:(i + 1) * tb, :].astype(o_ref.dtype)


# ----------------------------------------------------------------------------
# Wrapper: stacking, padding, weight prep, BlockSpecs, grid.
# ----------------------------------------------------------------------------
def cross_attention_forward(params, x, y, inial_y2x, inial_x2y, *,
                            num_heads=8, qk_scale=None,
                            matmul_dtype=jnp.bfloat16):
    B, dim = x.shape
    hd = dim // num_heads
    scale = float(qk_scale) if qk_scale is not None else hd ** (-0.5)

    # Row tiling: pad the batch axis to a sublane multiple of 8.  Always give
    # the single "parallel" grid axis >= 2 steps so both v7x TensorCores run,
    # allow blocks up to 256 rows for large B, and clamp by a crude VMEM model.
    bp = _round_up(max(B, 1), 8)
    tb = min(256, _round_up(pl.cdiv(bp, 2), 8))
    while tb > 8 and 14 * (4 * tb) * dim * 4 > 24 * 1024 * 1024:
        tb = max(8, _round_up(tb // 2, 8))
    Bp = _round_up(bp, tb)
    if Bp // tb < 2:
        Bp += tb

    def pad_rows(t):
        # Keep the caller's dtype (bf16 activations halve HBM traffic);
        # the kernel upcasts to f32 internally.
        return jnp.pad(t, ((0, Bp - B), (0, 0)))

    xs = jnp.stack([pad_rows(x), pad_rows(y),
                    pad_rows(inial_y2x), pad_rows(inial_x2y)], axis=0)

    # Weights cast to the MXU dtype on the host (halves DMA/VMEM in bf16 mode).
    eye_h = jnp.eye(num_heads, dtype=jnp.float32)
    pb_block = jnp.kron(eye_h, params["pb_w"].astype(jnp.float32)).astype(matmul_dtype)
    qkv_w = params["qkv_w"].astype(matmul_dtype)              # (dim, 3*dim)
    proj_w = params["proj_w"].astype(matmul_dtype)            # (dim, dim)
    consts = jnp.stack([params["ln_g"], params["ln_b"],
                        jnp.tile(params["pb_b"], num_heads),
                        params["proj_b"]], axis=0).astype(jnp.float32)  # (4, dim)

    row_spec = pl.BlockSpec((4, tb, dim), lambda i: (0, i, 0))

    def full(shape):
        return pl.BlockSpec(shape, lambda i, _s=len(shape): (0,) * _s)

    w_item = jnp.dtype(matmul_dtype).itemsize
    cost = pl.CostEstimate(
        flops=int(28 * Bp * dim * dim),
        transcendentals=int(5 * Bp * dim),
        bytes_accessed=int(8 * Bp * dim * jnp.dtype(x.dtype).itemsize
                           + 5 * dim * dim * w_item + 16 * dim),
    )

    kernel = functools.partial(
        _cross_attention_kernel,
        scale=scale, dim=dim, num_heads=num_heads, eps=1e-6,
        approx_recip=(jnp.dtype(matmul_dtype) != jnp.dtype(jnp.float32)))

    out = pl.pallas_call(
        kernel,
        out_shape=jax.ShapeDtypeStruct((4, Bp, dim), x.dtype),
        grid_spec=pltpu.PrefetchScalarGridSpec(
            num_scalar_prefetch=0,
            grid=(Bp // tb,),
            in_specs=[row_spec,                     # stacked [x; y; r1; r2]
                      full((dim, 3 * dim)),         # qkv_w
                      full((dim, dim)),             # block-diag proj_before
                      full((dim, dim)),             # proj_w
                      full((4, dim))],              # ln_g / ln_b / pb_b / proj_b
            out_specs=row_spec,
        ),
        compiler_params=pltpu.CompilerParams(
            dimension_semantics=("parallel",),
            vmem_limit_bytes=64 * 1024 * 1024),
        cost_estimate=cost,
    )(xs, qkv_w, pb_block, proj_w, consts)

    return tuple(out[i, :B] for i in range(4))


# ----------------------------------------------------------------------------
# Pure-JAX reference (mirrors the PyTorch forward, eval mode) for self-check.
# ----------------------------------------------------------------------------
def _reference(params, x, y, inial_y2x, inial_x2y, num_heads):
    dim = x.shape[-1]
    hd = dim // num_heads
    scale = hd ** (-0.5)

    def ln(t):
        mu = t.mean(-1, keepdims=True)
        var = ((t - mu) ** 2).mean(-1, keepdims=True)
        return (t - mu) / jnp.sqrt(var + 1e-6) * params["ln_g"] + params["ln_b"]

    xn, yn, r1, r2 = ln(x), ln(y), ln(inial_y2x), ln(inial_x2y)

    def qkv(t):
        o = (t @ params["qkv_w"]).reshape(t.shape[0], 3, num_heads, hd)
        return o[:, 0], o[:, 1], o[:, 2]

    qx, kx, vx = qkv(xn)
    qy, ky, vy = qkv(yn)

    def branch(q, k, v, res):
        a = jax.nn.softmax(q * k * scale, axis=-1)
        f = a * v                                              # (B, H, hd)
        f = f @ params["pb_w"] + params["pb_b"]                # Linear(hd, hd)
        f = f.reshape(res.shape[0], dim) + res
        f = ln(f)
        fin = f @ params["proj_w"] + params["proj_b"]
        return fin + f

    return (branch(qx, kx, vx, xn), branch(qy, ky, vy, yn),
            branch(qy, kx, vx, r1), branch(qx, ky, vy, r2))


def init_params(key, dim, num_heads):
    hd = dim // num_heads
    ks = jax.random.split(key, 6)
    return {
        "qkv_w": 0.05 * jax.random.normal(ks[0], (dim, 3 * dim), jnp.float32),
        "pb_w": 0.05 * jax.random.normal(ks[1], (hd, hd), jnp.float32),
        "pb_b": 0.01 * jax.random.normal(ks[2], (hd,), jnp.float32),
        "proj_w": 0.05 * jax.random.normal(ks[3], (dim, dim), jnp.float32),
        "proj_b": 0.01 * jax.random.normal(ks[4], (dim,), jnp.float32),
        "ln_g": jnp.ones((dim,), jnp.float32),
        "ln_b": jnp.zeros((dim,), jnp.float32),
    }


if __name__ == "__main__":
    key = jax.random.PRNGKey(0)
    kp, kx, ky, k1, k2 = jax.random.split(key, 5)

    batch, dim, heads = 8, 256, 8          # head_dim = 32
    params = init_params(kp, dim, heads)

    x = jax.random.normal(kx, (batch, dim), jnp.float32)
    y = jax.random.normal(ky, (batch, dim), jnp.float32)
    inial_y2x = jax.random.normal(k1, (batch, dim), jnp.float32)
    inial_x2y = jax.random.normal(k2, (batch, dim), jnp.float32)

    # Fast path (default): bf16 MXU matmuls, approx reciprocal.
    fwd_bf16 = jax.jit(functools.partial(cross_attention_forward, num_heads=heads))
    outs = jax.block_until_ready(fwd_bf16(params, x, y, inial_y2x, inial_x2y))

    assert len(outs) == 4
    assert all(o.shape == (batch, dim) for o in outs)
    assert all(bool(jnp.all(jnp.isfinite(o))) for o in outs)

    # High-precision reference (PyTorch eval-mode semantics).
    with jax.default_matmul_precision("highest"):
        refs = jax.block_until_ready(
            _reference(params, x, y, inial_y2x, inial_x2y, heads))

    for o, r in zip(outs, refs):
        err = float(jnp.max(jnp.abs(o - r)))
        assert bool(jnp.allclose(o, r, rtol=5e-2, atol=5e-2)), err   # bf16 tolerance

    # Exact-parity path: f32 MXU matmuls, exact reciprocal.
    fwd_f32 = jax.jit(functools.partial(cross_attention_forward, num_heads=heads,
                                        matmul_dtype=jnp.float32))
    outs32 = jax.block_until_ready(fwd_f32(params, x, y, inial_y2x, inial_x2y))
    for o, r in zip(outs32, refs):
        err = float(jnp.max(jnp.abs(o - r)))
        assert bool(jnp.allclose(o, r, rtol=1e-3, atol=1e-3)), err

    print("KERNEL_OK")
</pallas_src>

<mosaic_0001>
module attributes {stable_mosaic.version = 11 : i64} {
  func.func @_cross_attention_kernel(%arg0: i32, %arg1: memref<4x8x256xf32, #tpu.memory_space<vmem>>, %arg2: memref<256x768xbf16, #tpu.memory_space<vmem>>, %arg3: memref<256x256xbf16, #tpu.memory_space<vmem>>, %arg4: memref<256x256xbf16, #tpu.memory_space<vmem>>, %arg5: memref<4x256xf32, #tpu.memory_space<vmem>>, %arg6: memref<4x8x256xf32, #tpu.memory_space<vmem>>) attributes {dimension_semantics = [#tpu.dimension_semantics<parallel>], iteration_bounds = array<i64: 2>, scalar_prefetch = 0 : i64, scratch_operands = 0 : i64, tpu.core_type = #tpu.core_type<tc>, window_params = [{transform_indices = @transform_0, window_bounds = array<i64: 4, 8, 256>}, {pipeline_mode = #tpu.pipeline_mode<synchronous>, transform_indices = @transform_1, window_bounds = array<i64: 256, 768>}, {pipeline_mode = #tpu.pipeline_mode<synchronous>, transform_indices = @transform_2, window_bounds = array<i64: 256, 256>}, {pipeline_mode = #tpu.pipeline_mode<synchronous>, transform_indices = @transform_3, window_bounds = array<i64: 256, 256>}, {pipeline_mode = #tpu.pipeline_mode<synchronous>, transform_indices = @transform_4, window_bounds = array<i64: 4, 256>}, {transform_indices = @transform_5, window_bounds = array<i64: 4, 8, 256>}]} {
    %c0 = arith.constant 0 : index
    %c0_0 = arith.constant 0 : index
    %0 = vector.load %arg5[%c0, %c0_0] : memref<4x256xf32, #tpu.memory_space<vmem>>, vector<4x256xf32>
    %1 = vector.extract_strided_slice %0 {offsets = [0, 0], sizes = [1, 256], strides = [1, 1]} : vector<4x256xf32> to vector<1x256xf32>
    %2 = vector.extract_strided_slice %0 {offsets = [1, 0], sizes = [1, 256], strides = [1, 1]} : vector<4x256xf32> to vector<1x256xf32>
    %3 = vector.extract_strided_slice %0 {offsets = [2, 0], sizes = [1, 256], strides = [1, 1]} : vector<4x256xf32> to vector<1x256xf32>
    %4 = vector.extract_strided_slice %0 {offsets = [3, 0], sizes = [1, 256], strides = [1, 1]} : vector<4x256xf32> to vector<1x256xf32>
    %c0_1 = arith.constant 0 : index
    %c0_2 = arith.constant 0 : index
    %c0_3 = arith.constant 0 : index
    %5 = vector.load %arg1[%c0_1, %c0_2, %c0_3] : memref<4x8x256xf32, #tpu.memory_space<vmem>>, vector<1x8x256xf32>
    %6 = vector.shape_cast %5 : vector<1x8x256xf32> to vector<8x256xf32>
    %c1 = arith.constant 1 : index
    %c0_4 = arith.constant 0 : index
    %c0_5 = arith.constant 0 : index
    %7 = vector.load %arg1[%c1, %c0_4, %c0_5] : memref<4x8x256xf32, #tpu.memory_space<vmem>>, vector<1x8x256xf32>
    %8 = vector.shape_cast %7 : vector<1x8x256xf32> to vector<8x256xf32>
    %c2 = arith.constant 2 : index
    %c0_6 = arith.constant 0 : index
    %c0_7 = arith.constant 0 : index
    %9 = vector.load %arg1[%c2, %c0_6, %c0_7] : memref<4x8x256xf32, #tpu.memory_space<vmem>>, vector<1x8x256xf32>
    %10 = vector.shape_cast %9 : vector<1x8x256xf32> to vector<8x256xf32>
    %c3 = arith.constant 3 : index
    %c0_8 = arith.constant 0 : index
    %c0_9 = arith.constant 0 : index
    %11 = vector.load %arg1[%c3, %c0_8, %c0_9] : memref<4x8x256xf32, #tpu.memory_space<vmem>>, vector<1x8x256xf32>
    %12 = vector.shape_cast %11 : vector<1x8x256xf32> to vector<8x256xf32>
    %13 = tpu.concatenate %6, %8, %10, %12 in 0 : vector<8x256xf32>, vector<8x256xf32>, vector<8x256xf32>, vector<8x256xf32> -> vector<32x256xf32>
    %cst = arith.constant dense<0.000000e+00> : vector<32xf32>
    %14 = vector.multi_reduction <add>, %13, %cst [1] : vector<32x256xf32> to vector<32xf32>
    %15 = vector.shape_cast %14 : vector<32xf32> to vector<32x1xf32>
    %cst_10 = arith.constant 2.560000e+02 : f32
    %16 = vector.broadcast %cst_10 : f32 to vector<32x1xf32>
    %17 = arith.divf %15, %16 : vector<32x1xf32>
    %18 = vector.broadcast %17 : vector<32x1xf32> to vector<32x256xf32>
    %19 = arith.subf %13, %18 : vector<32x256xf32>
    %20 = arith.mulf %19, %19 : vector<32x256xf32>
    %cst_11 = arith.constant dense<0.000000e+00> : vector<32xf32>
    %21 = vector.multi_reduction <add>, %20, %cst_11 [1] : vector<32x256xf32> to vector<32xf32>
    %22 = vector.shape_cast %21 : vector<32xf32> to vector<32x1xf32>
    %cst_12 = arith.constant 2.560000e+02 : f32
    %23 = vector.broadcast %cst_12 : f32 to vector<32x1xf32>
    %24 = arith.divf %22, %23 : vector<32x1xf32>
    %cst_13 = arith.constant 9.99999997E-7 : f32
    %25 = vector.broadcast %cst_13 : f32 to vector<32x1xf32>
    %26 = arith.addf %24, %25 : vector<32x1xf32>
    %27 = math.rsqrt %26 : vector<32x1xf32>
    %28 = vector.broadcast %27 : vector<32x1xf32> to vector<32x256xf32>
    %29 = arith.mulf %19, %28 : vector<32x256xf32>
    %30 = vector.broadcast %1 : vector<1x256xf32> to vector<32x256xf32>
    %31 = arith.mulf %29, %30 : vector<32x256xf32>
    %32 = vector.broadcast %2 : vector<1x256xf32> to vector<32x256xf32>
    %33 = arith.addf %31, %32 : vector<32x256xf32>
    %34 = vector.extract_strided_slice %33 {offsets = [0, 0], sizes = [16, 256], strides = [1, 1]} : vector<32x256xf32> to vector<16x256xf32>
    %c0_14 = arith.constant 0 : index
    %c0_15 = arith.constant 0 : index
    %35 = vector.load %arg2[%c0_14, %c0_15] : memref<256x768xbf16, #tpu.memory_space<vmem>>, vector<256x768xbf16>
    %36 = arith.truncf %34 : vector<16x256xf32> to vector<16x256xbf16>
    %cst_16 = arith.constant dense<0.000000e+00> : vector<16x768xf32>
    %37 = tpu.matmul %36, %35, %cst_16 {dimension_numbers = #tpu.dot_dimension_numbers<[1], [0], [0], [1], [0, 0, 1, 1], [], []>} : vector<16x256xbf16>, vector<256x768xbf16>, vector<16x768xf32> -> vector<16x768xf32>
    %38 = vector.extract_strided_slice %37 {offsets = [0, 0], sizes = [16, 256], strides = [1, 1]} : vector<16x768xf32> to vector<16x256xf32>
    %39 = vector.extract_strided_slice %37 {offsets = [0, 256], sizes = [16, 256], strides = [1, 1]} : vector<16x768xf32> to vector<16x256xf32>
    %40 = vector.extract_strided_slice %37 {offsets = [0, 512], sizes = [16, 256], strides = [1, 1]} : vector<16x768xf32> to vector<16x256xf32>
    %41 = vector.extract_strided_slice %38 {offsets = [8, 0], sizes = [8, 256], strides = [1, 1]} : vector<16x256xf32> to vector<8x256xf32>
    %42 = vector.extract_strided_slice %38 {offsets = [0, 0], sizes = [8, 256], strides = [1, 1]} : vector<16x256xf32> to vector<8x256xf32>
    %43 = tpu.concatenate %41, %42 in 0 : vector<8x256xf32>, vector<8x256xf32> -> vector<16x256xf32>
    %44 = arith.mulf %38, %39 : vector<16x256xf32>
    %cst_17 = arith.constant 0.176776692 : f32
    %45 = vector.broadcast %cst_17 : f32 to vector<16x256xf32>
    %46 = arith.mulf %44, %45 : vector<16x256xf32>
    %47 = vector.extract_strided_slice %46 {offsets = [0, 0], sizes = [16, 32], strides = [1, 1]} : vector<16x256xf32> to vector<16x32xf32>
    %cst_18 = arith.constant dense<0xFF800000> : vector<16xf32>
    %48 = vector.multi_reduction <maximumf>, %47, %cst_18 [1] : vector<16x32xf32> to vector<16xf32>
    %49 = vector.shape_cast %48 : vector<16xf32> to vector<16x1xf32>
    %50 = vector.broadcast %49 : vector<16x1xf32> to vector<16x32xf32>
    %51 = arith.subf %47, %50 : vector<16x32xf32>
    %52 = math.exp %51 : vector<16x32xf32>
    %cst_19 = arith.constant dense<0.000000e+00> : vector<16xf32>
    %53 = vector.multi_reduction <add>, %52, %cst_19 [1] : vector<16x32xf32> to vector<16xf32>
    %54 = vector.shape_cast %53 : vector<16xf32> to vector<16x1xf32>
    %55 = tpu.reciprocal %54 {approx = true} : vector<16x1xf32> -> vector<16x1xf32>
    %56 = vector.broadcast %55 : vector<16x1xf32> to vector<16x32xf32>
    %57 = arith.mulf %52, %56 : vector<16x32xf32>
    %58 = vector.extract_strided_slice %40 {offsets = [0, 0], sizes = [16, 32], strides = [1, 1]} : vector<16x256xf32> to vector<16x32xf32>
    %59 = arith.mulf %57, %58 : vector<16x32xf32>
    %60 = vector.extract_strided_slice %46 {offsets = [0, 32], sizes = [16, 32], strides = [1, 1]} : vector<16x256xf32> to vector<16x32xf32>
    %cst_20 = arith.constant dense<0xFF800000> : vector<16xf32>
    %61 = vector.multi_reduction <maximumf>, %60, %cst_20 [1] : vector<16x32xf32> to vector<16xf32>
    %62 = vector.shape_cast %61 : vector<16xf32> to vector<16x1xf32>
    %63 = vector.broadcast %62 : vector<16x1xf32> to vector<16x32xf32>
    %64 = arith.subf %60, %63 : vector<16x32xf32>
    %65 = math.exp %64 : vector<16x32xf32>
    %cst_21 = arith.constant dense<0.000000e+00> : vector<16xf32>
    %66 = vector.multi_reduction <add>, %65, %cst_21 [1] : vector<16x32xf32> to vector<16xf32>
    %67 = vector.shape_cast %66 : vector<16xf32> to vector<16x1xf32>
    %68 = tpu.reciprocal %67 {approx = true} : vector<16x1xf32> -> vector<16x1xf32>
    %69 = vector.broadcast %68 : vector<16x1xf32> to vector<16x32xf32>
    %70 = arith.mulf %65, %69 : vector<16x32xf32>
    %71 = vector.extract_strided_slice %40 {offsets = [0, 32], sizes = [16, 32], strides = [1, 1]} : vector<16x256xf32> to vector<16x32xf32>
    %72 = arith.mulf %70, %71 : vector<16x32xf32>
    %73 = vector.extract_strided_slice %46 {offsets = [0, 64], sizes = [16, 32], strides = [1, 1]} : vector<16x256xf32> to vector<16x32xf32>
    %cst_22 = arith.constant dense<0xFF800000> : vector<16xf32>
    %74 = vector.multi_reduction <maximumf>, %73, %cst_22 [1] : vector<16x32xf32> to vector<16xf32>
    %75 = vector.shape_cast %74 : vector<16xf32> to vector<16x1xf32>
    %76 = vector.broadcast %75 : vector<16x1xf32> to vector<16x32xf32>
    %77 = arith.subf %73, %76 : vector<16x32xf32>
    %78 = math.exp %77 : vector<16x32xf32>
    %cst_23 = arith.constant dense<0.000000e+00> : vector<16xf32>
    %79 = vector.multi_reduction <add>, %78, %cst_23 [1] : vector<16x32xf32> to vector<16xf32>
    %80 = vector.shape_cast %79 : vector<16xf32> to vector<16x1xf32>
    %81 = tpu.reciprocal %80 {approx = true} : vector<16x1xf32> -> vector<16x1xf32>
    %82 = vector.broadcast %81 : vector<16x1xf32> to vector<16x32xf32>
    %83 = arith.mulf %78, %82 : vector<16x32xf32>
    %84 = vector.extract_strided_slice %40 {offsets = [0, 64], sizes = [16, 32], strides = [1, 1]} : vector<16x256xf32> to vector<16x32xf32>
    %85 = arith.mulf %83, %84 : vector<16x32xf32>
    %86 = vector.extract_strided_slice %46 {offsets = [0, 96], sizes = [16, 32], strides = [1, 1]} : vector<16x256xf32> to vector<16x32xf32>
    %cst_24 = arith.constant dense<0xFF800000> : vector<16xf32>
    %87 = vector.multi_reduction <maximumf>, %86, %cst_24 [1] : vector<16x32xf32> to vector<16xf32>
    %88 = vector.shape_cast %87 : vector<16xf32> to vector<16x1xf32>
    %89 = vector.broadcast %88 : vector<16x1xf32> to vector<16x32xf32>
    %90 = arith.subf %86, %89 : vector<16x32xf32>
    %91 = math.exp %90 : vector<16x32xf32>
    %cst_25 = arith.constant dense<0.000000e+00> : vector<16xf32>
    %92 = vector.multi_reduction <add>, %91, %cst_25 [1] : vector<16x32xf32> to vector<16xf32>
    %93 = vector.shape_cast %92 : vector<16xf32> to vector<16x1xf32>
    %94 = tpu.reciprocal %93 {approx = true} : vector<16x1xf32> -> vector<16x1xf32>
    %95 = vector.broadcast %94 : vector<16x1xf32> to vector<16x32xf32>
    %96 = arith.mulf %91, %95 : vector<16x32xf32>
    %97 = vector.extract_strided_slice %40 {offsets = [0, 96], sizes = [16, 32], strides = [1, 1]} : vector<16x256xf32> to vector<16x32xf32>
    %98 = arith.mulf %96, %97 : vector<16x32xf32>
    %99 = vector.extract_strided_slice %46 {offsets = [0, 128], sizes = [16, 32], strides = [1, 1]} : vector<16x256xf32> to vector<16x32xf32>
    %cst_26 = arith.constant dense<0xFF800000> : vector<16xf32>
    %100 = vector.multi_reduction <maximumf>, %99, %cst_26 [1] : vector<16x32xf32> to vector<16xf32>
    %101 = vector.shape_cast %100 : vector<16xf32> to vector<16x1xf32>
    %102 = vector.broadcast %101 : vector<16x1xf32> to vector<16x32xf32>
    %103 = arith.subf %99, %102 : vector<16x32xf32>
    %104 = math.exp %103 : vector<16x32xf32>
    %cst_27 = arith.constant dense<0.000000e+00> : vector<16xf32>
    %105 = vector.multi_reduction <add>, %104, %cst_27 [1] : vector<16x32xf32> to vector<16xf32>
    %106 = vector.shape_cast %105 : vector<16xf32> to vector<16x1xf32>
    %107 = tpu.reciprocal %106 {approx = true} : vector<16x1xf32> -> vector<16x1xf32>
    %108 = vector.broadcast %107 : vector<16x1xf32> to vector<16x32xf32>
    %109 = arith.mulf %104, %108 : vector<16x32xf32>
    %110 = vector.extract_strided_slice %40 {offsets = [0, 128], sizes = [16, 32], strides = [1, 1]} : vector<16x256xf32> to vector<16x32xf32>
    %111 = arith.mulf %109, %110 : vector<16x32xf32>
    %112 = vector.extract_strided_slice %46 {offsets = [0, 160], sizes = [16, 32], strides = [1, 1]} : vector<16x256xf32> to vector<16x32xf32>
    %cst_28 = arith.constant dense<0xFF800000> : vector<16xf32>
    %113 = vector.multi_reduction <maximumf>, %112, %cst_28 [1] : vector<16x32xf32> to vector<16xf32>
    %114 = vector.shape_cast %113 : vector<16xf32> to vector<16x1xf32>
    %115 = vector.broadcast %114 : vector<16x1xf32> to vector<16x32xf32>
    %116 = arith.subf %112, %115 : vector<16x32xf32>
    %117 = math.exp %116 : vector<16x32xf32>
    %cst_29 = arith.constant dense<0.000000e+00> : vector<16xf32>
    %118 = vector.multi_reduction <add>, %117, %cst_29 [1] : vector<16x32xf32> to vector<16xf32>
    %119 = vector.shape_cast %118 : vector<16xf32> to vector<16x1xf32>
    %120 = tpu.reciprocal %119 {approx = true} : vector<16x1xf32> -> vector<16x1xf32>
    %121 = vector.broadcast %120 : vector<16x1xf32> to vector<16x32xf32>
    %122 = arith.mulf %117, %121 : vector<16x32xf32>
    %123 = vector.extract_strided_slice %40 {offsets = [0, 160], sizes = [16, 32], strides = [1, 1]} : vector<16x256xf32> to vector<16x32xf32>
    %124 = arith.mulf %122, %123 : vector<16x32xf32>
    %125 = vector.extract_strided_slice %46 {offsets = [0, 192], sizes = [16, 32], strides = [1, 1]} : vector<16x256xf32> to vector<16x32xf32>
    %cst_30 = arith.constant dense<0xFF800000> : vector<16xf32>
    %126 = vector.multi_reduction <maximumf>, %125, %cst_30 [1] : vector<16x32xf32> to vector<16xf32>
    %127 = vector.shape_cast %126 : vector<16xf32> to vector<16x1xf32>
    %128 = vector.broadcast %127 : vector<16x1xf32> to vector<16x32xf32>
    %129 = arith.subf %125, %128 : vector<16x32xf32>
    %130 = math.exp %129 : vector<16x32xf32>
    %cst_31 = arith.constant dense<0.000000e+00> : vector<16xf32>
    %131 = vector.multi_reduction <add>, %130, %cst_31 [1] : vector<16x32xf32> to vector<16xf32>
    %132 = vector.shape_cast %131 : vector<16xf32> to vector<16x1xf32>
    %133 = tpu.reciprocal %132 {approx = true} : vector<16x1xf32> -> vector<16x1xf32>
    %134 = vector.broadcast %133 : vector<16x1xf32> to vector<16x32xf32>
    %135 = arith.mulf %130, %134 : vector<16x32xf32>
    %136 = vector.extract_strided_slice %40 {offsets = [0, 192], sizes = [16, 32], strides = [1, 1]} : vector<16x256xf32> to vector<16x32xf32>
    %137 = arith.mulf %135, %136 : vector<16x32xf32>
    %138 = vector.extract_strided_slice %46 {offsets = [0, 224], sizes = [16, 32], strides = [1, 1]} : vector<16x256xf32> to vector<16x32xf32>
    %cst_32 = arith.constant dense<0xFF800000> : vector<16xf32>
    %139 = vector.multi_reduction <maximumf>, %138, %cst_32 [1] : vector<16x32xf32> to vector<16xf32>
    %140 = vector.shape_cast %139 : vector<16xf32> to vector<16x1xf32>
    %141 = vector.broadcast %140 : vector<16x1xf32> to vector<16x32xf32>
    %142 = arith.subf %138, %141 : vector<16x32xf32>
    %143 = math.exp %142 : vector<16x32xf32>
    %cst_33 = arith.constant dense<0.000000e+00> : vector<16xf32>
    %144 = vector.multi_reduction <add>, %143, %cst_33 [1] : vector<16x32xf32> to vector<16xf32>
    %145 = vector.shape_cast %144 : vector<16xf32> to vector<16x1xf32>
    %146 = tpu.reciprocal %145 {approx = true} : vector<16x1xf32> -> vector<16x1xf32>
    %147 = vector.broadcast %146 : vector<16x1xf32> to vector<16x32xf32>
    %148 = arith.mulf %143, %147 : vector<16x32xf32>
    %149 = vector.extract_strided_slice %40 {offsets = [0, 224], sizes = [16, 32], strides = [1, 1]} : vector<16x256xf32> to vector<16x32xf32>
    %150 = arith.mulf %148, %149 : vector<16x32xf32>
    %151 = tpu.concatenate %59, %72, %85, %98, %111, %124, %137, %150 in 1 : vector<16x32xf32>, vector<16x32xf32>, vector<16x32xf32>, vector<16x32xf32>, vector<16x32xf32>, vector<16x32xf32>, vector<16x32xf32>, vector<16x32xf32> -> vector<16x256xf32>
    %152 = arith.mulf %43, %39 : vector<16x256xf32>
    %cst_34 = arith.constant 0.176776692 : f32
    %153 = vector.broadcast %cst_34 : f32 to vector<16x256xf32>
    %154 = arith.mulf %152, %153 : vector<16x256xf32>
    %155 = vector.extract_strided_slice %154 {offsets = [0, 0], sizes = [16, 32], strides = [1, 1]} : vector<16x256xf32> to vector<16x32xf32>
    %cst_35 = arith.constant dense<0xFF800000> : vector<16xf32>
    %156 = vector.multi_reduction <maximumf>, %155, %cst_35 [1] : vector<16x32xf32> to vector<16xf32>
    %157 = vector.shape_cast %156 : vector<16xf32> to vector<16x1xf32>
    %158 = vector.broadcast %157 : vector<16x1xf32> to vector<16x32xf32>
    %159 = arith.subf %155, %158 : vector<16x32xf32>
    %160 = math.exp %159 : vector<16x32xf32>
    %cst_36 = arith.constant dense<0.000000e+00> : vector<16xf32>
    %161 = vector.multi_reduction <add>, %160, %cst_36 [1] : vector<16x32xf32> to vector<16xf32>
    %162 = vector.shape_cast %161 : vector<16xf32> to vector<16x1xf32>
    %163 = tpu.reciprocal %162 {approx = true} : vector<16x1xf32> -> vector<16x1xf32>
    %164 = vector.broadcast %163 : vector<16x1xf32> to vector<16x32xf32>
    %165 = arith.mulf %160, %164 : vector<16x32xf32>
    %166 = vector.extract_strided_slice %40 {offsets = [0, 0], sizes = [16, 32], strides = [1, 1]} : vector<16x256xf32> to vector<16x32xf32>
    %167 = arith.mulf %165, %166 : vector<16x32xf32>
    %168 = vector.extract_strided_slice %154 {offsets = [0, 32], sizes = [16, 32], strides = [1, 1]} : vector<16x256xf32> to vector<16x32xf32>
    %cst_37 = arith.constant dense<0xFF800000> : vector<16xf32>
    %169 = vector.multi_reduction <maximumf>, %168, %cst_37 [1] : vector<16x32xf32> to vector<16xf32>
    %170 = vector.shape_cast %169 : vector<16xf32> to vector<16x1xf32>
    %171 = vector.broadcast %170 : vector<16x1xf32> to vector<16x32xf32>
    %172 = arith.subf %168, %171 : vector<16x32xf32>
    %173 = math.exp %172 : vector<16x32xf32>
    %cst_38 = arith.constant dense<0.000000e+00> : vector<16xf32>
    %174 = vector.multi_reduction <add>, %173, %cst_38 [1] : vector<16x32xf32> to vector<16xf32>
    %175 = vector.shape_cast %174 : vector<16xf32> to vector<16x1xf32>
    %176 = tpu.reciprocal %175 {approx = true} : vector<16x1xf32> -> vector<16x1xf32>
    %177 = vector.broadcast %176 : vector<16x1xf32> to vector<16x32xf32>
    %178 = arith.mulf %173, %177 : vector<16x32xf32>
    %179 = vector.extract_strided_slice %40 {offsets = [0, 32], sizes = [16, 32], strides = [1, 1]} : vector<16x256xf32> to vector<16x32xf32>
    %180 = arith.mulf %178, %179 : vector<16x32xf32>
    %181 = vector.extract_strided_slice %154 {offsets = [0, 64], sizes = [16, 32], strides = [1, 1]} : vector<16x256xf32> to vector<16x32xf32>
    %cst_39 = arith.constant dense<0xFF800000> : vector<16xf32>
    %182 = vector.multi_reduction <maximumf>, %181, %cst_39 [1] : vector<16x32xf32> to vector<16xf32>
    %183 = vector.shape_cast %182 : vector<16xf32> to vector<16x1xf32>
    %184 = vector.broadcast %183 : vector<16x1xf32> to vector<16x32xf32>
    %185 = arith.subf %181, %184 : vector<16x32xf32>
    %186 = math.exp %185 : vector<16x32xf32>
    %cst_40 = arith.constant dense<0.000000e+00> : vector<16xf32>
    %187 = vector.multi_reduction <add>, %186, %cst_40 [1] : vector<16x32xf32> to vector<16xf32>
    %188 = vector.shape_cast %187 : vector<16xf32> to vector<16x1xf32>
    %189 = tpu.reciprocal %188 {approx = true} : vector<16x1xf32> -> vector<16x1xf32>
    %190 = vector.broadcast %189 : vector<16x1xf32> to vector<16x32xf32>
    %191 = arith.mulf %186, %190 : vector<16x32xf32>
    %192 = vector.extract_strided_slice %40 {offsets = [0, 64], sizes = [16, 32], strides = [1, 1]} : vector<16x256xf32> to vector<16x32xf32>
    %193 = arith.mulf %191, %192 : vector<16x32xf32>
    %194 = vector.extract_strided_slice %154 {offsets = [0, 96], sizes = [16, 32], strides = [1, 1]} : vector<16x256xf32> to vector<16x32xf32>
    %cst_41 = arith.constant dense<0xFF800000> : vector<16xf32>
    %195 = vector.multi_reduction <maximumf>, %194, %cst_41 [1] : vector<16x32xf32> to vector<16xf32>
    %196 = vector.shape_cast %195 : vector<16xf32> to vector<16x1xf32>
    %197 = vector.broadcast %196 : vector<16x1xf32> to vector<16x32xf32>
    %198 = arith.subf %194, %197 : vector<16x32xf32>
    %199 = math.exp %198 : vector<16x32xf32>
    %cst_42 = arith.constant dense<0.000000e+00> : vector<16xf32>
    %200 = vector.multi_reduction <add>, %199, %cst_42 [1] : vector<16x32xf32> to vector<16xf32>
    %201 = vector.shape_cast %200 : vector<16xf32> to vector<16x1xf32>
    %202 = tpu.reciprocal %201 {approx = true} : vector<16x1xf32> -> vector<16x1xf32>
    %203 = vector.broadcast %202 : vector<16x1xf32> to vector<16x32xf32>
    %204 = arith.mulf %199, %203 : vector<16x32xf32>
    %205 = vector.extract_strided_slice %40 {offsets = [0, 96], sizes = [16, 32], strides = [1, 1]} : vector<16x256xf32> to vector<16x32xf32>
    %206 = arith.mulf %204, %205 : vector<16x32xf32>
    %207 = vector.extract_strided_slice %154 {offsets = [0, 128], sizes = [16, 32], strides = [1, 1]} : vector<16x256xf32> to vector<16x32xf32>
    %cst_43 = arith.constant dense<0xFF800000> : vector<16xf32>
    %208 = vector.multi_reduction <maximumf>, %207, %cst_43 [1] : vector<16x32xf32> to vector<16xf32>
    %209 = vector.shape_cast %208 : vector<16xf32> to vector<16x1xf32>
    %210 = vector.broadcast %209 : vector<16x1xf32> to vector<16x32xf32>
    %211 = arith.subf %207, %210 : vector<16x32xf32>
    %212 = math.exp %211 : vector<16x32xf32>
    %cst_44 = arith.constant dense<0.000000e+00> : vector<16xf32>
    %213 = vector.multi_reduction <add>, %212, %cst_44 [1] : vector<16x32xf32> to vector<16xf32>
    %214 = vector.shape_cast %213 : vector<16xf32> to vector<16x1xf32>
    %215 = tpu.reciprocal %214 {approx = true} : vector<16x1xf32> -> vector<16x1xf32>
    %216 = vector.broadcast %215 : vector<16x1xf32> to vector<16x32xf32>
    %217 = arith.mulf %212, %216 : vector<16x32xf32>
    %218 = vector.extract_strided_slice %40 {offsets = [0, 128], sizes = [16, 32], strides = [1, 1]} : vector<16x256xf32> to vector<16x32xf32>
    %219 = arith.mulf %217, %218 : vector<16x32xf32>
    %220 = vector.extract_strided_slice %154 {offsets = [0, 160], sizes = [16, 32], strides = [1, 1]} : vector<16x256xf32> to vector<16x32xf32>
    %cst_45 = arith.constant dense<0xFF800000> : vector<16xf32>
    %221 = vector.multi_reduction <maximumf>, %220, %cst_45 [1] : vector<16x32xf32> to vector<16xf32>
    %222 = vector.shape_cast %221 : vector<16xf32> to vector<16x1xf32>
    %223 = vector.broadcast %222 : vector<16x1xf32> to vector<16x32xf32>
    %224 = arith.subf %220, %223 : vector<16x32xf32>
    %225 = math.exp %224 : vector<16x32xf32>
    %cst_46 = arith.constant dense<0.000000e+00> : vector<16xf32>
    %226 = vector.multi_reduction <add>, %225, %cst_46 [1] : vector<16x32xf32> to vector<16xf32>
    %227 = vector.shape_cast %226 : vector<16xf32> to vector<16x1xf32>
    %228 = tpu.reciprocal %227 {approx = true} : vector<16x1xf32> -> vector<16x1xf32>
    %229 = vector.broadcast %228 : vector<16x1xf32> to vector<16x32xf32>
    %230 = arith.mulf %225, %229 : vector<16x32xf32>
    %231 = vector.extract_strided_slice %40 {offsets = [0, 160], sizes = [16, 32], strides = [1, 1]} : vector<16x256xf32> to vector<16x32xf32>
    %232 = arith.mulf %230, %231 : vector<16x32xf32>
    %233 = vector.extract_strided_slice %154 {offsets = [0, 192], sizes = [16, 32], strides = [1, 1]} : vector<16x256xf32> to vector<16x32xf32>
    %cst_47 = arith.constant dense<0xFF800000> : vector<16xf32>
    %234 = vector.multi_reduction <maximumf>, %233, %cst_47 [1] : vector<16x32xf32> to vector<16xf32>
    %235 = vector.shape_cast %234 : vector<16xf32> to vector<16x1xf32>
    %236 = vector.broadcast %235 : vector<16x1xf32> to vector<16x32xf32>
    %237 = arith.subf %233, %236 : vector<16x32xf32>
    %238 = math.exp %237 : vector<16x32xf32>
    %cst_48 = arith.constant dense<0.000000e+00> : vector<16xf32>
    %239 = vector.multi_reduction <add>, %238, %cst_48 [1] : vector<16x32xf32> to vector<16xf32>
    %240 = vector.shape_cast %239 : vector<16xf32> to vector<16x1xf32>
    %241 = tpu.reciprocal %240 {approx = true} : vector<16x1xf32> -> vector<16x1xf32>
    %242 = vector.broadcast %241 : vector<16x1xf32> to vector<16x32xf32>
    %243 = arith.mulf %238, %242 : vector<16x32xf32>
    %244 = vector.extract_strided_slice %40 {offsets = [0, 192], sizes = [16, 32], strides = [1, 1]} : vector<16x256xf32> to vector<16x32xf32>
    %245 = arith.mulf %243, %244 : vector<16x32xf32>
    %246 = vector.extract_strided_slice %154 {offsets = [0, 224], sizes = [16, 32], strides = [1, 1]} : vector<16x256xf32> to vector<16x32xf32>
    %cst_49 = arith.constant dense<0xFF800000> : vector<16xf32>
    %247 = vector.multi_reduction <maximumf>, %246, %cst_49 [1] : vector<16x32xf32> to vector<16xf32>
    %248 = vector.shape_cast %247 : vector<16xf32> to vector<16x1xf32>
    %249 = vector.broadcast %248 : vector<16x1xf32> to vector<16x32xf32>
    %250 = arith.subf %246, %249 : vector<16x32xf32>
    %251 = math.exp %250 : vector<16x32xf32>
    %cst_50 = arith.constant dense<0.000000e+00> : vector<16xf32>
    %252 = vector.multi_reduction <add>, %251, %cst_50 [1] : vector<16x32xf32> to vector<16xf32>
    %253 = vector.shape_cast %252 : vector<16xf32> to vector<16x1xf32>
    %254 = tpu.reciprocal %253 {approx = true} : vector<16x1xf32> -> vector<16x1xf32>
    %255 = vector.broadcast %254 : vector<16x1xf32> to vector<16x32xf32>
    %256 = arith.mulf %251, %255 : vector<16x32xf32>
    %257 = vector.extract_strided_slice %40 {offsets = [0, 224], sizes = [16, 32], strides = [1, 1]} : vector<16x256xf32> to vector<16x32xf32>
    %258 = arith.mulf %256, %257 : vector<16x32xf32>
    %259 = tpu.concatenate %167, %180, %193, %206, %219, %232, %245, %258 in 1 : vector<16x32xf32>, vector<16x32xf32>, vector<16x32xf32>, vector<16x32xf32>, vector<16x32xf32>, vector<16x32xf32>, vector<16x32xf32>, vector<16x32xf32> -> vector<16x256xf32>
    %260 = tpu.concatenate %151, %259 in 0 : vector<16x256xf32>, vector<16x256xf32> -> vector<32x256xf32>
    %c0_51 = arith.constant 0 : index
    %c0_52 = arith.constant 0 : index
    %261 = vector.load %arg3[%c0_51, %c0_52] : memref<256x256xbf16, #tpu.memory_space<vmem>>, vector<256x256xbf16>
    %262 = arith.truncf %260 : vector<32x256xf32> to vector<32x256xbf16>
    %cst_53 = arith.constant dense<0.000000e+00> : vector<32x256xf32>
    %263 = tpu.matmul %262, %261, %cst_53 {dimension_numbers = #tpu.dot_dimension_numbers<[1], [0], [0], [1], [0, 0, 1, 1], [], []>} : vector<32x256xbf16>, vector<256x256xbf16>, vector<32x256xf32> -> vector<32x256xf32>
    %264 = vector.broadcast %3 : vector<1x256xf32> to vector<32x256xf32>
    %265 = arith.addf %263, %264 : vector<32x256xf32>
    %266 = arith.addf %265, %33 : vector<32x256xf32>
    %cst_54 = arith.constant dense<0.000000e+00> : vector<32xf32>
    %267 = vector.multi_reduction <add>, %266, %cst_54 [1] : vector<32x256xf32> to vector<32xf32>
    %268 = vector.shape_cast %267 : vector<32xf32> to vector<32x1xf32>
    %cst_55 = arith.constant 2.560000e+02 : f32
    %269 = vector.broadcast %cst_55 : f32 to vector<32x1xf32>
    %270 = arith.divf %268, %269 : vector<32x1xf32>
    %271 = vector.broadcast %270 : vector<32x1xf32> to vector<32x256xf32>
    %272 = arith.subf %266, %271 : vector<32x256xf32>
    %273 = arith.mulf %272, %272 : vector<32x256xf32>
    %cst_56 = arith.constant dense<0.000000e+00> : vector<32xf32>
    %274 = vector.multi_reduction <add>, %273, %cst_56 [1] : vector<32x256xf32> to vector<32xf32>
    %275 = vector.shape_cast %274 : vector<32xf32> to vector<32x1xf32>
    %cst_57 = arith.constant 2.560000e+02 : f32
    %276 = vector.broadcast %cst_57 : f32 to vector<32x1xf32>
    %277 = arith.divf %275, %276 : vector<32x1xf32>
    %cst_58 = arith.constant 9.99999997E-7 : f32
    %278 = vector.broadcast %cst_58 : f32 to vector<32x1xf32>
    %279 = arith.addf %277, %278 : vector<32x1xf32>
    %280 = math.rsqrt %279 : vector<32x1xf32>
    %281 = vector.broadcast %280 : vector<32x1xf32> to vector<32x256xf32>
    %282 = arith.mulf %272, %281 : vector<32x256xf32>
    %283 = vector.broadcast %1 : vector<1x256xf32> to vector<32x256xf32>
    %284 = arith.mulf %282, %283 : vector<32x256xf32>
    %285 = vector.broadcast %2 : vector<1x256xf32> to vector<32x256xf32>
    %286 = arith.addf %284, %285 : vector<32x256xf32>
    %c0_59 = arith.constant 0 : index
    %c0_60 = arith.constant 0 : index
    %287 = vector.load %arg4[%c0_59, %c0_60] : memref<256x256xbf16, #tpu.memory_space<vmem>>, vector<256x256xbf16>
    %288 = arith.truncf %286 : vector<32x256xf32> to vector<32x256xbf16>
    %cst_61 = arith.constant dense<0.000000e+00> : vector<32x256xf32>
    %289 = tpu.matmul %288, %287, %cst_61 {dimension_numbers = #tpu.dot_dimension_numbers<[1], [0], [0], [1], [0, 0, 1, 1], [], []>} : vector<32x256xbf16>, vector<256x256xbf16>, vector<32x256xf32> -> vector<32x256xf32>
    %290 = vector.broadcast %4 : vector<1x256xf32> to vector<32x256xf32>
    %291 = arith.addf %289, %290 : vector<32x256xf32>
    %292 = arith.addf %291, %286 : vector<32x256xf32>
    %293 = vector.extract_strided_slice %292 {offsets = [0, 0], sizes = [8, 256], strides = [1, 1]} : vector<32x256xf32> to vector<8x256xf32>
    %c0_62 = arith.constant 0 : index
    %c0_63 = arith.constant 0 : index
    %c0_64 = arith.constant 0 : index
    %294 = vector.load %arg6[%c0_62, %c0_63, %c0_64] : memref<4x8x256xf32, #tpu.memory_space<vmem>>, vector<1x8x256xf32>
    %295 = vector.shape_cast %294 : vector<1x8x256xf32> to vector<8x256xf32>
    %296 = vector.shape_cast %293 : vector<8x256xf32> to vector<1x8x256xf32>
    tpu.vector_store %arg6[%c0_62, %c0_63, %c0_64], %296 {strides = array<i32>} : memref<4x8x256xf32, #tpu.memory_space<vmem>>, vector<1x8x256xf32>,
    %297 = vector.extract_strided_slice %292 {offsets = [8, 0], sizes = [8, 256], strides = [1, 1]} : vector<32x256xf32> to vector<8x256xf32>
    %c1_65 = arith.constant 1 : index
    %c0_66 = arith.constant 0 : index
    %c0_67 = arith.constant 0 : index
    %298 = vector.load %arg6[%c1_65, %c0_66, %c0_67] : memref<4x8x256xf32, #tpu.memory_space<vmem>>, vector<1x8x256xf32>
    %299 = vector.shape_cast %298 : vector<1x8x256xf32> to vector<8x256xf32>
    %300 = vector.shape_cast %297 : vector<8x256xf32> to vector<1x8x256xf32>
    tpu.vector_store %arg6[%c1_65, %c0_66, %c0_67], %300 {strides = array<i32>} : memref<4x8x256xf32, #tpu.memory_space<vmem>>, vector<1x8x256xf32>,
    %301 = vector.extract_strided_slice %292 {offsets = [16, 0], sizes = [8, 256], strides = [1, 1]} : vector<32x256xf32> to vector<8x256xf32>
    %c2_68 = arith.constant 2 : index
    %c0_69 = arith.constant 0 : index
    %c0_70 = arith.constant 0 : index
    %302 = vector.load %arg6[%c2_68, %c0_69, %c0_70] : memref<4x8x256xf32, #tpu.memory_space<vmem>>, vector<1x8x256xf32>
    %303 = vector.shape_cast %302 : vector<1x8x256xf32> to vector<8x256xf32>
    %304 = vector.shape_cast %301 : vector<8x256xf32> to vector<1x8x256xf32>
    tpu.vector_store %arg6[%c2_68, %c0_69, %c0_70], %304 {strides = array<i32>} : memref<4x8x256xf32, #tpu.memory_space<vmem>>, vector<1x8x256xf32>,
    %305 = vector.extract_strided_slice %292 {offsets = [24, 0], sizes = [8, 256], strides = [1, 1]} : vector<32x256xf32> to vector<8x256xf32>
    %c3_71 = arith.constant 3 : index
    %c0_72 = arith.constant 0 : index
    %c0_73 = arith.constant 0 : index
    %306 = vector.load %arg6[%c3_71, %c0_72, %c0_73] : memref<4x8x256xf32, #tpu.memory_space<vmem>>, vector<1x8x256xf32>
    %307 = vector.shape_cast %306 : vector<1x8x256xf32> to vector<8x256xf32>
    %308 = vector.shape_cast %305 : vector<8x256xf32> to vector<1x8x256xf32>
    tpu.vector_store %arg6[%c3_71, %c0_72, %c0_73], %308 {strides = array<i32>} : memref<4x8x256xf32, #tpu.memory_space<vmem>>, vector<1x8x256xf32>,
    return
  }
  func.func @transform_0(%arg0: i32) -> (i32, i32, i32) {
    %c0_i32 = arith.constant 0 : i32
    %c0_i32_0 = arith.constant 0 : i32
    %c0_i32_1 = arith.constant 0 : i32
    return %c0_i32, %arg0, %c0_i32_0 : i32, i32, i32
  }
  func.func @transform_1(%arg0: i32) -> (i32, i32) {
    %c0_i32 = arith.constant 0 : i32
    %c0_i32_0 = arith.constant 0 : i32
    %c0_i32_1 = arith.constant 0 : i32
    return %c0_i32, %c0_i32_0 : i32, i32
  }
  func.func @transform_2(%arg0: i32) -> (i32, i32) {
    %c0_i32 = arith.constant 0 : i32
    %c0_i32_0 = arith.constant 0 : i32
    %c0_i32_1 = arith.constant 0 : i32
    return %c0_i32, %c0_i32_0 : i32, i32
  }
  func.func @transform_3(%arg0: i32) -> (i32, i32) {
    %c0_i32 = arith.constant 0 : i32
    %c0_i32_0 = arith.constant 0 : i32
    %c0_i32_1 = arith.constant 0 : i32
    return %c0_i32, %c0_i32_0 : i32, i32
  }
  func.func @transform_4(%arg0: i32) -> (i32, i32) {
    %c0_i32 = arith.constant 0 : i32
    %c0_i32_0 = arith.constant 0 : i32
    %c0_i32_1 = arith.constant 0 : i32
    return %c0_i32, %c0_i32_0 : i32, i32
  }
  func.func @transform_5(%arg0: i32) -> (i32, i32, i32) {
    %c0_i32 = arith.constant 0 : i32
    %c0_i32_0 = arith.constant 0 : i32
    %c0_i32_1 = arith.constant 0 : i32
    return %c0_i32, %arg0, %c0_i32_0 : i32, i32, i32
  }
}

</mosaic_0001>

<bundles_post_ra>
// kernel: tile.8
= control target key start
LH: loop header
LB: loop body
LE: loop exit
PB: predicated region body
PF: predicated region fallthrough
CT: control target
= control target key end

     0   :  { %s22_s0 = inlined_call_operand.vmem [shape: f32[32], index: 0, kind: input, shape index: {}]   ;;  %s23_s1 = inlined_call_operand.vmem [shape: f32[8,32], index: 1, kind: output, shape index: {}]  }
   0x1   :  { %v4_v0 = vld [vmem:[%s22_s0] ss:$0 sm:$0xff] }
   0x2   :  { %5 = vst [vmem:[%s23_s1] sm:$0xff] %v4_v0 }

// kernel: tile.9
= control target key start
LH: loop header
LB: loop body
LE: loop exit
PB: predicated region body
PF: predicated region fallthrough
CT: control target
= control target key end

     0   :  { %s7_s6 = smov 3  ;;  %s46_s9 = smov 96   ;;  %vm4_vm0 = vcmask 261120   ;;  %vm11_vm1 = vcmask 1048320   ;;  %vm18_vm2 = vcmask 785920   ;;  %vm25_vm3 = vcmask 523520   ;;  %s77_s0 = inlined_call_operand.vmem [shape: f32[8,32], index: 0, kind: input, shape index: {}]   ;;  %s78_s1 = inlined_call_operand.vmem [shape: f32[1,256], index: 1, kind: output, shape index: {}]  }
   0x1   :  { %v39_v0 = vld [vmem:[%s77_s0 + $0x3] ss:$4 sm:%s7_s6]   ;;  %s21_s10 = smov 3  ;;  %s14_s13 = smov 3 }
   0x2   :  { %9 = vrot.lane.b32.xlu0 %v39_v0, %s46_s9  ;;  %v41_v1 = vld [vmem:[%s77_s0 + $0x1] ss:$4 sm:%s21_s10]   ;;  %s47_s14 = smov 32   ;;  %s48_s17 = smov 64  }
   0x3   :  { %23 = vrot.lane.b32.xlu1 %v41_v1, %s47_s14  ;;  %v40_v2 = vld [vmem:[%s77_s0 + $0x2] ss:$4 sm:%s14_s13]   ;;  %s2_s18 = smov 3 }
   0x4   :  { %v3_v3 = vld [vmem:[%s77_s0] ss:$4 sm:%s2_s18]  }
   0x5   :  { %5 = vst.msk [vmem:[#allocation0] ss:$8 sm:$0x3] %vm4_vm0, %v3_v3  }
   0xa   :  { %16 = vrot.lane.b32.xlu0 %v40_v2, %s48_s17 }
  0x74   :  { %v10_v4 = vpop.permute.xlu0 %9  }
  0x75   :  { %12 = vst.msk [vmem:[#allocation0] ss:$8 sm:$0x3] %vm11_vm1, %v10_v4   ;;  %v24_v5 = vpop.permute.xlu1 %23  }
  0x7c   :  { %v17_v6 = vpop.permute.xlu0 %16  }
  0x7d   :  { %19 = vst.msk [vmem:[#allocation0] ss:$8 sm:$0x3] %vm18_vm2, %v17_v6  }
  0x7e   :  { %26 = vst.msk [vmem:[#allocation0] ss:$8 sm:$0x3] %vm25_vm3, %v24_v5  }
  0x85   :  { %v29_v7 = vld [vmem:[#allocation0] sm:$0x1]  ;;  %v34_v8 = vld [vmem:[#allocation0 + $0x8] sm:$0x1] }
  0x86   :  { %32 = vst [vmem:[%s78_s1] sm:$0x1] %v29_v7 }
  0x87   :  { %42 = vst [vmem:[%s78_s1 + $0x1] sm:$0x1] %v34_v8 }

// kernel: cross_attention_forward.1
= control target key start
LH: loop header
LB: loop body
LE: loop exit
PB: predicated region body
PF: predicated region fallthrough
CT: control target
= control target key end

     0   :  { %s3531_s18 = smov 0   ;;  %s3533_s19 = smov 0   ;;  %s5258_s0 = inlined_call_operand.vmem [shape: f32[4,16,256], index: 0, kind: input, shape index: {}]   ;;  %s5259_s1 = inlined_call_operand.vmem [shape: bf16[256,768], index: 1, kind: input, shape index: {}]   ;;  %s5260_s2 = inlined_call_operand.vmem [shape: bf16[256,256], index: 2, kind: input, shape index: {}]   ;;  %s5261_s3 = inlined_call_operand.vmem [shape: bf16[256,256], index: 3, kind: input, shape index: {}]   ;;  %s5262_s4 = inlined_call_operand.vmem [shape: f32[4,256], index: 4, kind: input, shape index: {}]   ;;  %s5263_s5 = inlined_call_operand.vmem [shape: f32[4,16,256], index: 5, kind: output, shape index: {}]  }
   0x1   :  { %s3535_s20 = smov 0  }
   0x2 LB: > { %s2469_s21 = sadd.s32 4294967295, %s3495_s20   ;;  %s3548_s22 = sadd.s32 1, %s3495_s20   ;;  %s3495_s20 = sphi %s3535_s20, %s5307_s20   ;;  %s3491_s19 = sphi %s3533_s19, %s5306_s19   ;;  %s3487_s18 = sphi %s3531_s18, %s5305_s18  }
   0x3   : > { %s19_s23 = ssub.s32 %s3495_s20, %s3548_s22  ;;  %s22_s24 = sadd.s32 1, %s3491_s19 }
   0x4   : > { %p20_p0 = scmp.eq.s32.totalorder %s19_s23, 0  ;;  %p29_p1 = scmp.ne.s32.totalorder %s3491_s19, %s3487_s18 }
   0x5   : > { %p30_p2 = scmp.eq.s32.totalorder %s3495_s20, 0  ;;  %p143_p3 = scmp.eq.s32.totalorder %s2469_s21, 1 }
   0x6   : > { %s3559_s25 = scalar_select %p20_p0, %s3491_s19, %s22_s24  }
   0x7   : > { %p31_p4 = por %p30_p2, %p29_p1  ;;  %p3561_p5 = por %p143_p3, %p29_p1 }
   0x8   : > { %p2472_p6 = scmp.ge.s32.totalorder %s3495_s20, 2 }
   0xa   : > { %177 = sbr.rel (%p2472_p6) target bundleno = 27 (0x1b), region = 32 }
   0xf   : > { %180 = sbr.rel (!%p31_p4) target bundleno = 27 (0x1b), region = 36  ;;  %s182_s27 = sand.u32 (%p31_p4), 1, %s3491_s19  }
  0x10   : > { %s3136_s28 = sshll.u32 (%p31_p4), %s3495_s20, 4  ;;  %s2473_s29 = sshll.u32 (%p31_p4), %s182_s27, 6 }
  0x11   : > { %s187_s7 = scalar_lea.vmem (%p31_p4), %s5258_s0, %s3136_s28  ;;  %s184_s8 = scalar_lea.vmem (%p31_p4), [#allocation2], %s2473_s29 }
  0x12   : > { %v200_v0 = vld [vmem:[%s187_s7] sm:$0xff] (%p31_p4)  ;;  %v202_v1 = vld [vmem:[%s187_s7 + $0x8] sm:$0xff] (%p31_p4) }
  0x13   : > { %v204_v2 = vld [vmem:[%s187_s7 + $0x20] sm:$0xff] (%p31_p4)  ;;  %201 = vst [vmem:[%s184_s8] sm:$0xff] (%p31_p4), %v200_v0  ;;  %v206_v3 = vld [vmem:[%s187_s7 + $0x28] sm:$0xff] (%p31_p4) }
  0x14   : > { %203 = vst [vmem:[%s184_s8 + $0x8] sm:$0xff] %v202_v1  ;;  %v208_v4 = vld [vmem:[%s187_s7 + $0x40] sm:$0xff]  ;;  %v210_v5 = vld [vmem:[%s187_s7 + $0x48] sm:$0xff] }
  0x15   : > { %205 = vst [vmem:[%s184_s8 + $0x10] sm:$0xff] %v204_v2  ;;  %v212_v6 = vld [vmem:[%s187_s7 + $0x60] sm:$0xff]  ;;  %v214_v7 = vld [vmem:[%s187_s7 + $0x68] sm:$0xff] }
  0x16   : > { %207 = vst [vmem:[%s184_s8 + $0x18] sm:$0xff] %v206_v3 }
  0x17   : > { %209 = vst [vmem:[%s184_s8 + $0x20] sm:$0xff] %v208_v4 }
  0x18   : > { %211 = vst [vmem:[%s184_s8 + $0x28] sm:$0xff] %v210_v5 }
  0x19   : > { %213 = vst [vmem:[%s184_s8 + $0x30] sm:$0xff] %v212_v6 }
  0x1a   : > { %215 = vst [vmem:[%s184_s8 + $0x38] sm:$0xff] %v214_v7 }
  0x1b PF: > { %p2476_p7 = scmp.ge.s32.totalorder %s3495_s20, 1  ;;  %p220_p8 = scmp.lt.s32.totalorder %s3495_s20, 3 }
  0x1d   : > { %p221_p9 = pnand %p2476_p7, %p220_p8 }
  0x1f   : > { %224 = sbr.rel (%p221_p9) target bundleno = 1614 (0x64e), region = 59 }
  0x24   : > { %s227_s9 = sand.u32 1, %s3487_s18   ;;  %v3497_v14 = vmov 256.0   ;;  %v2655_v18 = vld [vmem:[%s5259_s1 + $0x150] sm:$0xf]  ;;  %v3182_v19 = vld [vmem:[%s5259_s1 + $0x164] sm:$0xf0] }
  0x25   : > { %s3574_s10 = sshll.u32 %s227_s9, 6  ;;  %3326 = vrcp.f32 %v3497_v14  ;;  %v2847_v20 = vld [vmem:[%s5259_s1 + $0x2d0] sm:$0xf]  ;;  %v2656_v21 = vor.u32 %v3182_v19, %v2655_v18  ;;  %v3230_v22 = vld [vmem:[%s5259_s1 + $0x2e4] sm:$0xf0]  ;;  %vm1213_vm7 = vcmask 785920  }
  0x26   : > { %s3577_s11 = scalar_lea.vmem [#allocation2], %s3574_s10  ;;  %v3179_v23 = vld [vmem:[%s5259_s1 + $0x154] sm:$0xf]  ;;  %v2657_v24 = vld [vmem:[%s5259_s1 + $0x168] sm:$0xf0]  ;;  %v2848_v25 = vor.u32 %v3230_v22, %v2847_v20  ;;  %vm1180_vm8 = vcmask 523520  }
  0x27   : > { %v3580_v8 = vld [vmem:[%s3577_s11] sm:$0xff]  ;;  %v3583_v9 = vld [vmem:[%s3577_s11 + $0x8] sm:$0xff]  ;;  %v3588_v11 = vld [vmem:[%s3577_s11 + $0x10] sm:$0xff]  ;;  %v2660_v26 = vor.u32 %v3179_v23, %v2657_v24  ;;  %979 = vmatpush.bf16.msra.mxu0 %v2656_v21  ;;  %vm1246_vm9 = vcmask 1048320   ;;  %vm1155_vm10 = vcmask 261120   ;;  %s3498_s30 = smov 64  }
  0x28   : > { %v265_v10 = vadd.f32 %v3583_v9, %v3580_v8  ;;  %v3591_v12 = vld [vmem:[%s3577_s11 + $0x18] sm:$0xff]  ;;  %v3227_v27 = vld [vmem:[%s5259_s1 + $0x2d4] sm:$0xf]  ;;  %v2849_v28 = vld [vmem:[%s5259_s1 + $0x2e8] sm:$0xf0]  ;;  %993 = vmatpush.bf16.msra.mxu1 %v2848_v25  ;;  %s3499_s6 = smov 96  }
  0x29   : > { %v268_v13 = vadd.f32 %v3591_v12, %v3588_v11  ;;  %v2631_v29 = vld [vmem:[%s5259_s1 + $0x120] sm:$0xf]  ;;  %v2852_v30 = vor.u32 %v3227_v27, %v2849_v28  ;;  %v3176_v31 = vld [vmem:[%s5259_s1 + $0x134] sm:$0xf0]  ;;  %1007 = vmatpush.bf16.msra.mxu2 %v2660_v26  ;;  %v3173_v36 = vld [vmem:[%s5259_s1 + $0x124] sm:$0xf] }
  0x2a   : > { %266 = vadd.xlane.f32.xlu0 %v265_v10  ;;  %v2823_v32 = vld [vmem:[%s5259_s1 + $0x2a0] sm:$0xf]  ;;  %v3224_v33 = vld [vmem:[%s5259_s1 + $0x2b4] sm:$0xf0]  ;;  %v2632_v34 = vor.u32 %v3176_v31, %v2631_v29  ;;  %v2633_v37 = vld [vmem:[%s5259_s1 + $0x138] sm:$0xf0] }
  0x2b   : > { %v3595_v15 = vpop.eup %3326  ;;  %v2824_v35 = vor.u32 %v3224_v33, %v2823_v32  ;;  %v3221_v38 = vld [vmem:[%s5259_s1 + $0x2a4] sm:$0xf]  ;;  %1021 = vmatpush.bf16.msra.mxu3 %v2852_v30  ;;  %v2636_v40 = vor.u32 %v3173_v36, %v2633_v37  ;;  %v2825_v41 = vld [vmem:[%s5259_s1 + $0x2b8] sm:$0xf0]  ;;  %v2607_v42 = vld [vmem:[%s5259_s1 + $0xf0] sm:$0xf] }
  0x2c   : > { %v278_v16 = vmul.f32 256.0, %v3595_v15  ;;  %v3170_v43 = vld [vmem:[%s5259_s1 + $0x104] sm:$0xf0]  ;;  %v2828_v44 = vor.u32 %v3221_v38, %v2825_v41  ;;  %v2799_v45 = vld [vmem:[%s5259_s1 + $0x270] sm:$0xf]  ;;  %980 = vmatpush.bf16.msra.mxu0 %v2632_v34  ;;  %vm282_vm0 = vweird.f32 %v3595_v15  ;;  %s3500_s7 = smov 32  }
  0x2d   : > { %v3218_v46 = vld [vmem:[%s5259_s1 + $0x284] sm:$0xf0]  ;;  %v3167_v47 = vld [vmem:[%s5259_s1 + $0xf4] sm:$0xf]  ;;  %v2608_v48 = vor.u32 %v3170_v43, %v2607_v42  ;;  %v2609_v49 = vld [vmem:[%s5259_s1 + $0x108] sm:$0xf0]  ;;  %994 = vmatpush.bf16.msra.mxu1 %v2824_v35  ;;  %1008 = vmatpush.bf16.msra.mxu2 %v2636_v40 }
  0x2e   : > { %v279_v17 = vsub.f32 1.0, %v278_v16  ;;  %v3215_v50 = vld [vmem:[%s5259_s1 + $0x274] sm:$0xf]  ;;  %v2801_v51 = vld [vmem:[%s5259_s1 + $0x288] sm:$0xf0]  ;;  %v2800_v52 = vor.u32 %v3218_v46, %v2799_v45  ;;  %v2612_v53 = vor.u32 %v3167_v47, %v2609_v49  ;;  %vm1401_vm11 = vcmask 523264  }
  0x2f   : > { %v2583_v54 = vld [vmem:[%s5259_s1 + $0xc0] sm:$0xf]  ;;  %v3164_v55 = vld [vmem:[%s5259_s1 + $0xd4] sm:$0xf0]  ;;  %1022 = vmatpush.bf16.msra.mxu3 %v2828_v44  ;;  %v2804_v58 = vor.u32 %v3215_v50, %v2801_v51  ;;  %v3161_v60 = vld [vmem:[%s5259_s1 + $0xc4] sm:$0xf] }
  0x30   : > { %v280_v39 = vmul.f32 %v3595_v15, %v279_v17  ;;  %v2775_v56 = vld [vmem:[%s5259_s1 + $0x240] sm:$0xf]  ;;  %v3212_v59 = vld [vmem:[%s5259_s1 + $0x254] sm:$0xf0]  ;;  %v2585_v61 = vld [vmem:[%s5259_s1 + $0xd8] sm:$0xf0]  ;;  %981 = vmatpush.bf16.msra.mxu0 %v2608_v48  ;;  %v2584_v0 = vor.u32 %v3164_v55, %v2583_v54 }
  0x31   : > { %v3209_v62 = vld [vmem:[%s5259_s1 + $0x244] sm:$0xf]  ;;  %v2777_v63 = vld [vmem:[%s5259_s1 + $0x258] sm:$0xf0]  ;;  %995 = vmatpush.bf16.msra.mxu1 %v2800_v52  ;;  %1009 = vmatpush.bf16.msra.mxu2 %v2612_v53  ;;  %v2776_v1 = vor.u32 %v3212_v59, %v2775_v56  ;;  %v2588_v2 = vor.u32 %v3161_v60, %v2585_v61  ;;  %v2559_v3 = vld [vmem:[%s5259_s1 + $0x90] sm:$0xf] }
  0x32   : > { %269 = vadd.xlane.f32.xlu0 %v268_v13  ;;  %v281_v57 = vadd.f32 %v3595_v15, %v280_v39  ;;  %v3158_v4 = vld [vmem:[%s5259_s1 + $0xa4] sm:$0xf0]  ;;  %v2751_v5 = vld [vmem:[%s5259_s1 + $0x210] sm:$0xf]  ;;  %v2780_v7 = vor.u32 %v3209_v62, %v2777_v63  ;;  %v3155_v13 = vld [vmem:[%s5259_s1 + $0x94] sm:$0xf] }
  0x33   : > { %1023 = vmatpush.bf16.msra.mxu3 %v2804_v58  ;;  %v3206_v10 = vld [vmem:[%s5259_s1 + $0x224] sm:$0xf0]  ;;  %v2561_v14 = vld [vmem:[%s5259_s1 + $0xa8] sm:$0xf0]  ;;  %v3203_v16 = vld [vmem:[%s5259_s1 + $0x214] sm:$0xf]  ;;  %v2560_v18 = vor.u32 %v3158_v4, %v2559_v3 }
  0x34   : > { %v3707_v6 = vsel %vm282_vm0, %v3595_v15, %v281_v57  ;;  %v2753_v15 = vld [vmem:[%s5259_s1 + $0x228] sm:$0xf0]  ;;  %982 = vmatpush.bf16.msra.mxu0 %v2584_v0  ;;  %v2752_v20 = vor.u32 %v3206_v10, %v2751_v5  ;;  %v2564_v21 = vor.u32 %v3155_v13, %v2561_v14  ;;  %v2535_v33 = vld [vmem:[%s5259_s1 + $0x60] sm:$0xf]  ;;  %v3200_v35 = vld [vmem:[%s5259_s1 + $0x1f4] sm:$0xf0] }
  0x35   : > { %996 = vmatpush.bf16.msra.mxu1 %v2776_v1  ;;  %1010 = vmatpush.bf16.msra.mxu2 %v2588_v2  ;;  %v2756_v22 = vor.u32 %v3203_v16, %v2753_v15  ;;  %v3149_v36 = vld [vmem:[%s5259_s1 + $0x64] sm:$0xf]  ;;  %v2537_v37 = vld [vmem:[%s5259_s1 + $0x78] sm:$0xf0]  ;;  %v2511_v43 = vld [vmem:[%s5259_s1 + $0x30] sm:$0xf] }
  0x36   : > { %v2540_v39 = vor.u32 %v3149_v36, %v2537_v37  ;;  %v3197_v40 = vld [vmem:[%s5259_s1 + $0x1e4] sm:$0xf]  ;;  %v2729_v41 = vld [vmem:[%s5259_s1 + $0x1f8] sm:$0xf0]  ;;  %v3146_v44 = vld [vmem:[%s5259_s1 + $0x44] sm:$0xf0] }
  0x37   : > { %1024 = vmatpush.bf16.msra.mxu3 %v2780_v7  ;;  %v2732_v42 = vor.u32 %v3197_v40, %v2729_v41  ;;  %v2703_v45 = vld [vmem:[%s5259_s1 + $0x1b0] sm:$0xf]  ;;  %v2512_v46 = vor.u32 %v3146_v44, %v2511_v43  ;;  %v3194_v47 = vld [vmem:[%s5259_s1 + $0x1c4] sm:$0xf0]  ;;  %v3143_v48 = vld [vmem:[%s5259_s1 + $0x34] sm:$0xf] }
  0x38   : > { %983 = vmatpush.bf16.msra.mxu0 %v2560_v18  ;;  %v2513_v49 = vld [vmem:[%s5259_s1 + $0x48] sm:$0xf0]  ;;  %v2704_v50 = vor.u32 %v3194_v47, %v2703_v45  ;;  %v3191_v52 = vld [vmem:[%s5259_s1 + $0x1b4] sm:$0xf]  ;;  %v2487_v55 = vld [vmem:[%s5259_s1] sm:$0xf] }
  0x39   : > { %997 = vmatpush.bf16.msra.mxu1 %v2752_v20  ;;  %1011 = vmatpush.bf16.msra.mxu2 %v2564_v21  ;;  %v2516_v51 = vor.u32 %v3143_v48, %v2513_v49  ;;  %v2705_v53 = vld [vmem:[%s5259_s1 + $0x1c8] sm:$0xf0]  ;;  %v3140_v56 = vld [vmem:[%s5259_s1 + $0x14] sm:$0xf0]  ;;  %v2679_v57 = vld [vmem:[%s5259_s1 + $0x180] sm:$0xf] }
  0x3a   : > { %v2708_v54 = vor.u32 %v3191_v52, %v2705_v53  ;;  %v2488_v58 = vor.u32 %v3140_v56, %v2487_v55  ;;  %v3188_v59 = vld [vmem:[%s5259_s1 + $0x194] sm:$0xf0]  ;;  %v3137_v60 = vld [vmem:[%s5259_s1 + $0x4] sm:$0xf]  ;;  %v2489_v61 = vld [vmem:[%s5259_s1 + $0x18] sm:$0xf0] }
  0x3b   : > { %1025 = vmatpush.bf16.msra.mxu3 %v2756_v22  ;;  %v2680_v62 = vor.u32 %v3188_v59, %v2679_v57  ;;  %v2492_v63 = vor.u32 %v3137_v60, %v2489_v61  ;;  %v3185_v0 = vld [vmem:[%s5259_s1 + $0x184] sm:$0xf]  ;;  %v2681_v1 = vld [vmem:[%s5259_s1 + $0x198] sm:$0xf0]  ;;  %v2663_v2 = vld [vmem:[%s5259_s1 + $0x158] sm:$0xf] }
  0x3c   : > { %v2684_v3 = vor.u32 %v3185_v0, %v2681_v1  ;;  %v3183_v4 = vld [vmem:[%s5259_s1 + $0x16c] sm:$0xf0]  ;;  %v2855_v5 = vld [vmem:[%s5259_s1 + $0x2d8] sm:$0xf]  ;;  %v3180_v14 = vld [vmem:[%s5259_s1 + $0x15c] sm:$0xf] }
  0x3d   : > { %1012 = vmatpush.bf16.msra.mxu2 %v2540_v39  ;;  %v3231_v7 = vld [vmem:[%s5259_s1 + $0x2ec] sm:$0xf0]  ;;  %v2664_v10 = vor.u32 %v3183_v4, %v2663_v2  ;;  %v2665_v16 = vld [vmem:[%s5259_s1 + $0x170] sm:$0xf0]  ;;  %v3228_v15 = vld [vmem:[%s5259_s1 + $0x2dc] sm:$0xf] }
  0x3e   : > { %v2856_v13 = vor.u32 %v3231_v7, %v2855_v5  ;;  %v2857_v18 = vld [vmem:[%s5259_s1 + $0x2f0] sm:$0xf0]  ;;  %v3177_v20 = vld [vmem:[%s5259_s1 + $0x13c] sm:$0xf0]  ;;  %v3219_v36 = vld [vmem:[%s5259_s1 + $0x28c] sm:$0xf0] }
  0x3f   : > { %1026 = vmatpush.bf16.msra.mxu3 %v2732_v42  ;;  %v2860_v21 = vor.u32 %v3228_v15, %v2857_v18  ;;  %v3168_v37 = vld [vmem:[%s5259_s1 + $0xfc] sm:$0xf]  ;;  %v2809_v42 = vld [vmem:[%s5259_s1 + $0x290] sm:$0xf0]  ;;  %v2591_v44 = vld [vmem:[%s5259_s1 + $0xc8] sm:$0xf] }
  0x40   : > { %v3216_v41 = vld [vmem:[%s5259_s1 + $0x27c] sm:$0xf]  ;;  %v3165_v45 = vld [vmem:[%s5259_s1 + $0xdc] sm:$0xf0]  ;;  %v3162_v49 = vld [vmem:[%s5259_s1 + $0xcc] sm:$0xf] }
  0x41   : > { %1013 = vmatpush.bf16.msra.mxu2 %v2516_v51  ;;  %v2812_v43 = vor.u32 %v3216_v41, %v2809_v42  ;;  %v2592_v47 = vor.u32 %v3165_v45, %v2591_v44  ;;  %v3213_v48 = vld [vmem:[%s5259_s1 + $0x25c] sm:$0xf0]  ;;  %v3210_v53 = vld [vmem:[%s5259_s1 + $0x24c] sm:$0xf]  ;;  %v2567_v56 = vld [vmem:[%s5259_s1 + $0x98] sm:$0xf] }
  0x42   : > { %v3159_v57 = vld [vmem:[%s5259_s1 + $0xac] sm:$0xf0]  ;;  %v3156_v61 = vld [vmem:[%s5259_s1 + $0x9c] sm:$0xf]  ;;  %v2761_v2 = vld [vmem:[%s5259_s1 + $0x230] sm:$0xf0] }
  0x43   : > { %1027 = vmatpush.bf16.msra.mxu3 %v2708_v54  ;;  %v2785_v54 = vld [vmem:[%s5259_s1 + $0x260] sm:$0xf0]  ;;  %v2568_v59 = vor.u32 %v3159_v57, %v2567_v56  ;;  %v3207_v60 = vld [vmem:[%s5259_s1 + $0x22c] sm:$0xf0]  ;;  %v3204_v1 = vld [vmem:[%s5259_s1 + $0x21c] sm:$0xf] }
  0x44   : > { %v2788_v55 = vor.u32 %v3210_v53, %v2785_v54  ;;  %v2543_v4 = vld [vmem:[%s5259_s1 + $0x68] sm:$0xf]  ;;  %v3153_v5 = vld [vmem:[%s5259_s1 + $0x7c] sm:$0xf0]  ;;  %v3198_v18 = vld [vmem:[%s5259_s1 + $0x1ec] sm:$0xf] }
  0x45   : > { %1014 = vmatpush.bf16.msra.mxu2 %v2492_v63  ;;  %v2735_v7 = vld [vmem:[%s5259_s1 + $0x1e8] sm:$0xf]  ;;  %v3138_v41 = vld [vmem:[%s5259_s1 + $0xc] sm:$0xf]  ;;  %v2497_v42 = vld [vmem:[%s5259_s1 + $0x20] sm:$0xf0] }
  0x46   : > { %v2500_v44 = vor.u32 %v3138_v41, %v2497_v42  ;;  %v3186_v45 = vld [vmem:[%s5259_s1 + $0x18c] sm:$0xf]  ;;  %v253_v57 = vld [vmem:[%s5262_s4] sm:$0xff]  ;;  %v3175_v41 = vld [vmem:[%s5259_s1 + $0x134] sm:$0xf]  ;;  %vm1404_vm12 = vcmask 785408  }
  0x47   : > { %1028 = vmatpush.bf16.msra.mxu3 %v2684_v3  ;;  %v2764_v3 = vor.u32 %v3204_v1, %v2761_v2  ;;  %v387_v1 = vperm.slane %v253_v57, 1  ;;  %v388_v2 = vperm.slane %v253_v57, 5  ;;  %v2649_v42 = vld [vmem:[%s5259_s1 + $0x148] sm:$0xf0]  ;;  %s5220_s16 = scalar_lea.vmem [#allocation3], %s3574_s10  ;;  %s3297_s10 = sshll.u32 (%p3561_p5), %s2469_s21, 4 }
  0x48   : > { %s2381_s18 = scalar_lea.vmem (%p3561_p5), %s5263_s5, %s3297_s10 }
  0x4b   : > { %1077 = vmatpush.bf16.msrb.mxu3 %v2860_v21 }
  0x9d   : > { %v267_v17 = vpop.xlane.xlu0 %266 }
  0x9e   : > { %v284_v19 = vmul.f32 %v3707_v6, %v267_v17  ;;  %v2668_v17 = vor.u32 %v3180_v14, %v2665_v16  ;;  %v3150_v14 = vld [vmem:[%s5259_s1 + $0x6c] sm:$0xf]  ;;  %v2545_v16 = vld [vmem:[%s5259_s1 + $0x80] sm:$0xf0] }
  0xa0   : > { %v3726_v23 = vsub.f32 %v3580_v8, %v284_v19  ;;  %v3729_v24 = vsub.f32 %v3583_v9, %v284_v19  ;;  %v2639_v19 = vld [vmem:[%s5259_s1 + $0x128] sm:$0xf]  ;;  %1063 = vmatpush.bf16.msrb.mxu2 %v2668_v17  ;;  %v2548_v17 = vor.u32 %v3150_v14, %v2545_v16  ;;  %v4021_v14 = vperm.slane %v387_v1, 1  ;;  %v3163_v1 = vld [vmem:[%s5259_s1 + $0xd4] sm:$0xf] }
  0xa1   : > { %v2640_v22 = vor.u32 %v3177_v20, %v2639_v19  ;;  %v2737_v19 = vld [vmem:[%s5259_s1 + $0x200] sm:$0xf0]  ;;  %v4023_v16 = vperm.slane %v388_v2, 1  ;;  %v2601_v2 = vld [vmem:[%s5259_s1 + $0xe8] sm:$0xf0] }
  0xa2   : > { %v296_v25 = vmul.f32 %v3726_v23, %v3726_v23  ;;  %v297_v26 = vmul.f32 %v3729_v24, %v3729_v24  ;;  %v2740_v20 = vor.u32 %v3198_v18, %v2737_v19  ;;  %5283 = vst [vmem:[#allocation6_spill] sm:$0xff] %v4021_v14 }
  0xa3   : > { %5284 = vst [vmem:[#allocation7_spill] sm:$0xff] %v4023_v16 }
  0xa4   : > { %v304_v27 = vadd.f32 %v297_v26, %v296_v25  ;;  %v2831_v25 = vld [vmem:[%s5259_s1 + $0x2a8] sm:$0xf]  ;;  %v3225_v26 = vld [vmem:[%s5259_s1 + $0x2bc] sm:$0xf0] }
  0xa5   : > { %v270_v28 = vpop.xlane.xlu0 %269 }
  0xa6   : > { %v285_v29 = vmul.f32 %v3707_v6, %v270_v28  ;;  %305 = vadd.xlane.f32.xlu1 %v304_v27  ;;  %v3174_v27 = vld [vmem:[%s5259_s1 + $0x12c] sm:$0xf]  ;;  %v2832_v28 = vor.u32 %v3225_v26, %v2831_v25  ;;  %v3147_v25 = vld [vmem:[%s5259_s1 + $0x4c] sm:$0xf0]  ;;  %v2711_v26 = vld [vmem:[%s5259_s1 + $0x1b8] sm:$0xf] }
  0xa8   : > { %v3737_v8 = vsub.f32 %v3588_v11, %v285_v29  ;;  %v3740_v9 = vsub.f32 %v3591_v12, %v285_v29  ;;  %v3152_v11 = vld [vmem:[%s5259_s1 + $0x74] sm:$0xf0]  ;;  %v2727_v12 = vld [vmem:[%s5259_s1 + $0x1e0] sm:$0xf]  ;;  %v2641_v29 = vld [vmem:[%s5259_s1 + $0x140] sm:$0xf0] }
  0xa9   : > { %v2536_v34 = vor.u32 %v3152_v11, %v2535_v33  ;;  %v2728_v38 = vor.u32 %v3200_v35, %v2727_v12  ;;  %v2615_v11 = vld [vmem:[%s5259_s1 + $0xf8] sm:$0xf]  ;;  %v3171_v12 = vld [vmem:[%s5259_s1 + $0x10c] sm:$0xf0] }
  0xaa   : > { %v298_v30 = vmul.f32 %v3737_v8, %v3737_v8  ;;  %v299_v31 = vmul.f32 %v3740_v9, %v3740_v9  ;;  %v2616_v35 = vor.u32 %v3171_v12, %v2615_v11  ;;  %v3192_v11 = vld [vmem:[%s5259_s1 + $0x1bc] sm:$0xf]  ;;  %v2713_v12 = vld [vmem:[%s5259_s1 + $0x1d0] sm:$0xf0] }
  0xab   : > { %984 = vmatpush.bf16.msra.mxu0 %v2536_v34  ;;  %998 = vmatpush.bf16.msra.mxu1 %v2728_v38  ;;  %v2807_v34 = vld [vmem:[%s5259_s1 + $0x278] sm:$0xf]  ;;  %v2617_v38 = vld [vmem:[%s5259_s1 + $0x110] sm:$0xf0] }
  0xac   : > { %v307_v32 = vadd.f32 %v299_v31, %v298_v30  ;;  %v3222_v30 = vld [vmem:[%s5259_s1 + $0x2ac] sm:$0xf]  ;;  %v2833_v31 = vld [vmem:[%s5259_s1 + $0x2c0] sm:$0xf0]  ;;  %v2808_v39 = vor.u32 %v3219_v36, %v2807_v34  ;;  %v2620_v40 = vor.u32 %v3168_v37, %v2617_v38  ;;  %v2495_v36 = vld [vmem:[%s5259_s1 + $0x8] sm:$0xf] }
  0xad   : > { %v2836_v33 = vor.u32 %v3222_v30, %v2833_v31  ;;  %v3144_v30 = vld [vmem:[%s5259_s1 + $0x3c] sm:$0xf]  ;;  %v2521_v31 = vld [vmem:[%s5259_s1 + $0x50] sm:$0xf0]  ;;  %v3141_v37 = vld [vmem:[%s5259_s1 + $0x1c] sm:$0xf0] }
  0xae   : > { %308 = vadd.xlane.f32.xlu1 %v307_v32  ;;  %v2644_v32 = vor.u32 %v3174_v27, %v2641_v29  ;;  %v3195_v29 = vld [vmem:[%s5259_s1 + $0x1cc] sm:$0xf0]  ;;  %v2687_v38 = vld [vmem:[%s5259_s1 + $0x188] sm:$0xf] }
  0xaf   : > { %985 = vmatpush.bf16.msra.mxu0 %v2512_v46  ;;  %999 = vmatpush.bf16.msra.mxu1 %v2704_v50  ;;  %v2783_v46 = vld [vmem:[%s5259_s1 + $0x248] sm:$0xf]  ;;  %v2593_v50 = vld [vmem:[%s5259_s1 + $0xe0] sm:$0xf0] }
  0xb0   : > { %1064 = vmatpush.bf16.msrb.mxu2 %v2644_v32  ;;  %1078 = vmatpush.bf16.msrb.mxu3 %v2836_v33  ;;  %v2784_v51 = vor.u32 %v3213_v48, %v2783_v46  ;;  %v2596_v52 = vor.u32 %v3162_v49, %v2593_v50  ;;  %v2712_v32 = vor.u32 %v3195_v29, %v2711_v26  ;;  %v2689_v46 = vld [vmem:[%s5259_s1 + $0x1a0] sm:$0xf0] }
  0xb1   : > { %v2524_v33 = vor.u32 %v3144_v30, %v2521_v31  ;;  %v2692_v48 = vor.u32 %v3186_v45, %v2689_v46  ;;  %v2673_v30 = vld [vmem:[%s5259_s1 + $0x178] sm:$0xf0]  ;;  %v3229_v31 = vld [vmem:[%s5259_s1 + $0x2e4] sm:$0xf] }
  0xb3   : > { %986 = vmatpush.bf16.msra.mxu0 %v2488_v58  ;;  %1000 = vmatpush.bf16.msra.mxu1 %v2680_v62  ;;  %v2759_v58 = vld [vmem:[%s5259_s1 + $0x218] sm:$0xf]  ;;  %v2569_v62 = vld [vmem:[%s5259_s1 + $0xb0] sm:$0xf0] }
  0xb4   : > { %1065 = vmatpush.bf16.msrb.mxu2 %v2620_v40  ;;  %1079 = vmatpush.bf16.msrb.mxu3 %v2812_v43  ;;  %v2760_v63 = vor.u32 %v3207_v60, %v2759_v58  ;;  %v2572_v0 = vor.u32 %v3156_v61, %v2569_v62  ;;  %v3189_v40 = vld [vmem:[%s5259_s1 + $0x19c] sm:$0xf0]  ;;  %v373_v61 = vperm.slane %v253_v57, 0  ;;  %v374_v62 = vperm.slane %v253_v57, 4 }
  0xb5   : > { %v2688_v43 = vor.u32 %v3189_v40, %v2687_v38  ;;  %v3226_v40 = vld [vmem:[%s5259_s1 + $0x2c4] sm:$0xf0] }
  0xb7   : > { %1035 = vmatpush.bf16.msrb.mxu0 %v2664_v10  ;;  %1049 = vmatpush.bf16.msrb.mxu1 %v2856_v13  ;;  %v2544_v10 = vor.u32 %v3153_v5, %v2543_v4  ;;  %v3201_v13 = vld [vmem:[%s5259_s1 + $0x1fc] sm:$0xf0]  ;;  %v4015_v4 = vperm.slane %v373_v61, 0  ;;  %v4017_v5 = vperm.slane %v374_v62, 0 }
  0xb8   : > { %1066 = vmatpush.bf16.msrb.mxu2 %v2596_v52  ;;  %1080 = vmatpush.bf16.msrb.mxu3 %v2788_v55  ;;  %v2736_v15 = vor.u32 %v3201_v13, %v2735_v7 }
  0xb9   : > { %5281 = vst [vmem:[#allocation4_spill] sm:$0xff] %v4015_v4 }
  0xba   : > { %5282 = vst [vmem:[#allocation5_spill] sm:$0xff] %v4017_v5 }
  0xbb   : > { %1036 = vmatpush.bf16.msrb.mxu0 %v2640_v22  ;;  %1050 = vmatpush.bf16.msrb.mxu1 %v2832_v28  ;;  %v2519_v22 = vld [vmem:[%s5259_s1 + $0x38] sm:$0xf] }
  0xbc   : > { %1067 = vmatpush.bf16.msrb.mxu2 %v2572_v0  ;;  %1081 = vmatpush.bf16.msrb.mxu3 %v2764_v3  ;;  %v2520_v28 = vor.u32 %v3147_v25, %v2519_v22  ;;  %v3184_v22 = vld [vmem:[%s5259_s1 + $0x174] sm:$0xf0]  ;;  %v2863_v25 = vld [vmem:[%s5259_s1 + $0x2e0] sm:$0xf] }
  0xbf   : > { %1037 = vmatpush.bf16.msrb.mxu0 %v2616_v35  ;;  %1051 = vmatpush.bf16.msrb.mxu1 %v2808_v39  ;;  %v2716_v35 = vor.u32 %v3192_v11, %v2713_v12  ;;  %v2496_v39 = vor.u32 %v3141_v37, %v2495_v36  ;;  %v3178_v36 = vld [vmem:[%s5259_s1 + $0x144] sm:$0xf0] }
  0xc0   : > { %1068 = vmatpush.bf16.msrb.mxu2 %v2548_v17  ;;  %1082 = vmatpush.bf16.msrb.mxu3 %v2740_v20 }
  0xc3   : > { %1038 = vmatpush.bf16.msrb.mxu0 %v2592_v47  ;;  %1052 = vmatpush.bf16.msrb.mxu1 %v2784_v51 }
  0xc4   : > { %1069 = vmatpush.bf16.msrb.mxu2 %v2524_v33  ;;  %1083 = vmatpush.bf16.msrb.mxu3 %v2716_v35  ;;  %v2647_v35 = vld [vmem:[%s5259_s1 + $0x130] sm:$0xf] }
  0xc5   : > { %v2648_v45 = vor.u32 %v3178_v36, %v2647_v35  ;;  %v3202_v35 = vld [vmem:[%s5259_s1 + $0x204] sm:$0xf0]  ;;  %v3151_v36 = vld [vmem:[%s5259_s1 + $0x74] sm:$0xf] }
  0xc7   : > { %1039 = vmatpush.bf16.msrb.mxu0 %v2568_v59  ;;  %1053 = vmatpush.bf16.msrb.mxu1 %v2760_v63 }
  0xc8   : > { %1070 = vmatpush.bf16.msrb.mxu2 %v2500_v44  ;;  %1084 = vmatpush.bf16.msrb.mxu3 %v2692_v48  ;;  %v2841_v44 = vld [vmem:[%s5259_s1 + $0x2c8] sm:$0xf0]  ;;  %v3172_v48 = vld [vmem:[%s5259_s1 + $0x114] sm:$0xf0] }
  0xcb   : > { %1040 = vmatpush.bf16.msrb.mxu0 %v2544_v10  ;;  %1054 = vmatpush.bf16.msrb.mxu1 %v2736_v15 }
  0xcf   : > { %1041 = vmatpush.bf16.msrb.mxu0 %v2520_v28  ;;  %1055 = vmatpush.bf16.msrb.mxu1 %v2712_v32  ;;  %v2865_v32 = vld [vmem:[%s5259_s1 + $0x2f8] sm:$0xf0] }
  0xd0   : > { %v2868_v38 = vor.u32 %v3229_v31, %v2865_v32  ;;  %v3154_v31 = vld [vmem:[%s5259_s1 + $0x84] sm:$0xf0] }
  0xd3   : > { %1042 = vmatpush.bf16.msrb.mxu0 %v2496_v39  ;;  %1056 = vmatpush.bf16.msrb.mxu1 %v2688_v43  ;;  %v2839_v39 = vld [vmem:[%s5259_s1 + $0x2b0] sm:$0xf]  ;;  %v3223_v43 = vld [vmem:[%s5259_s1 + $0x2b4] sm:$0xf] }
  0xd4   : > { %v2840_v46 = vor.u32 %v3226_v40, %v2839_v39  ;;  %v2745_v39 = vld [vmem:[%s5259_s1 + $0x208] sm:$0xf0] }
 0x119   : > { %v306_v21 = vpop.xlane.xlu1 %305 }
 0x11a   : > { %v316_v27 = vmul.f32 %v306_v21, %v3707_v6  ;;  %v2671_v21 = vld [vmem:[%s5259_s1 + $0x160] sm:$0xf] }
 0x11b   : > { %v2672_v12 = vor.u32 %v3184_v22, %v2671_v21  ;;  %v2577_v21 = vld [vmem:[%s5259_s1 + $0xb8] sm:$0xf0]  ;;  %v3205_v22 = vld [vmem:[%s5259_s1 + $0x224] sm:$0xf] }
 0x11c   : > { %v320_v34 = vadd.f32 1e-06, %v316_v27 }
 0x11e   : > { %3328 = vrsqrt.f32 %v320_v34  ;;  %vm330_vm2 = vweird.f32 %v320_v34 }
 0x121   : > { %v309_v47 = vpop.xlane.xlu1 %308 }
 0x122   : > { %v317_v49 = vmul.f32 %v309_v47, %v3707_v6  ;;  %v2623_v47 = vld [vmem:[%s5259_s1 + $0x100] sm:$0xf] }
 0x123   : > { %v2624_v57 = vor.u32 %v3172_v48, %v2623_v47  ;;  %v3196_v47 = vld [vmem:[%s5259_s1 + $0x1d4] sm:$0xf0]  ;;  %v3145_v48 = vld [vmem:[%s5259_s1 + $0x44] sm:$0xf] }
 0x124   : > { %v3329_v50 = vpop.eup %3328  ;;  %v321_v51 = vadd.f32 1e-06, %v317_v49  ;;  %v2652_v49 = vor.u32 %v3175_v41, %v2649_v42  ;;  %v2527_v42 = vld [vmem:[%s5259_s1 + $0x40] sm:$0xf] }
 0x125   : > { %v325_v52 = vmul.f32 %v3329_v50, %v320_v34  ;;  %vm331_vm1 = vweird.f32 %v3329_v50 }
 0x126   : > { %3330 = vrsqrt.f32 %v321_v51  ;;  %vm332_vm3 = vmor %vm330_vm2, %vm331_vm1  ;;  %vm340_vm5 = vweird.f32 %v321_v51 }
 0x127   : > { %v326_v53 = vmul.f32 %v3329_v50, %v325_v52  ;;  %v3220_v52 = vld [vmem:[%s5259_s1 + $0x294] sm:$0xf0] }
 0x129   : > { %v327_v54 = vmul.f32 0.5, %v326_v53  ;;  %v3169_v53 = vld [vmem:[%s5259_s1 + $0x104] sm:$0xf] }
 0x12b   : > { %v328_v55 = vsub.f32 1.5, %v327_v54  ;;  %v2625_v54 = vld [vmem:[%s5259_s1 + $0x118] sm:$0xf0] }
 0x12c   : > { %v3331_v56 = vpop.eup %3330  ;;  %v2628_v61 = vor.u32 %v3169_v53, %v2625_v54  ;;  %v2503_v54 = vld [vmem:[%s5259_s1 + $0x10] sm:$0xf] }
 0x12d   : > { %v329_v58 = vmul.f32 %v3329_v50, %v328_v55  ;;  %v335_v59 = vmul.f32 %v3331_v56, %v321_v51  ;;  %vm341_vm4 = vweird.f32 %v3331_v56  ;;  %v2815_v51 = vld [vmem:[%s5259_s1 + $0x280] sm:$0xf]  ;;  %v3217_v55 = vld [vmem:[%s5259_s1 + $0x284] sm:$0xf] }
 0x12e   : > { %vm342_vm6 = vmor %vm340_vm5, %vm341_vm4 }
 0x12f   : > { %v336_v60 = vmul.f32 %v3331_v56, %v335_v59  ;;  %v333_v63 = vsel %vm332_vm3, %v3329_v50, %v329_v58  ;;  %v2844_v50 = vor.u32 %v3223_v43, %v2841_v44  ;;  %v2816_v58 = vor.u32 %v3220_v52, %v2815_v51  ;;  %v2599_v59 = vld [vmem:[%s5259_s1 + $0xd0] sm:$0xf]  ;;  %v3148_v43 = vld [vmem:[%s5259_s1 + $0x54] sm:$0xf0]  ;;  %v2721_v51 = vld [vmem:[%s5259_s1 + $0x1d8] sm:$0xf0] }
 0x130   : > { %v364_v7 = vmul.f32 %v333_v63, %v3726_v23  ;;  %v365_v10 = vmul.f32 %v333_v63, %v3729_v24  ;;  %v2791_v63 = vld [vmem:[%s5259_s1 + $0x250] sm:$0xf]  ;;  %v2528_v52 = vor.u32 %v3148_v43, %v2527_v42 }
 0x131   : > { %v337_v0 = vmul.f32 0.5, %v336_v60  ;;  %v3166_v60 = vld [vmem:[%s5259_s1 + $0xe4] sm:$0xf0] }
 0x132   : > { %v379_v17 = vmul.f32 %v4015_v4, %v364_v7  ;;  %v380_v18 = vmul.f32 %v4017_v5, %v365_v10  ;;  %v2793_v7 = vld [vmem:[%s5259_s1 + $0x268] sm:$0xf0]  ;;  %v2600_v10 = vor.u32 %v3166_v60, %v2599_v59  ;;  %v3190_v59 = vld [vmem:[%s5259_s1 + $0x1a4] sm:$0xf0]  ;;  %v3139_v60 = vld [vmem:[%s5259_s1 + $0x14] sm:$0xf] }
 0x133   : > { %v338_v3 = vsub.f32 1.5, %v337_v0  ;;  %v3214_v0 = vld [vmem:[%s5259_s1 + $0x264] sm:$0xf0] }
 0x134   : > { %v4047_v26 = vadd.f32 %v4021_v14, %v379_v17  ;;  %v4050_v27 = vadd.f32 %v4023_v16, %v380_v18  ;;  %v3160_v17 = vld [vmem:[%s5259_s1 + $0xb4] sm:$0xf0]  ;;  %v2604_v18 = vor.u32 %v3163_v1, %v2601_v2 }
 0x135   : > { %v339_v13 = vmul.f32 %v3331_v56, %v338_v3  ;;  %v3211_v3 = vld [vmem:[%s5259_s1 + $0x254] sm:$0xf] }
 0x136   : > { %5285 = vst [vmem:[#allocation8_spill] sm:$0xff] %v4047_v26 }
 0x137   : > { %v343_v15 = vsel %vm342_vm6, %v3331_v56, %v339_v13  ;;  %5286 = vst [vmem:[#allocation9_spill] sm:$0xff] %v4050_v27  ;;  %v2817_v56 = vld [vmem:[%s5259_s1 + $0x298] sm:$0xf0]  ;;  %v2792_v13 = vor.u32 %v3214_v0, %v2791_v63  ;;  %v2697_v63 = vld [vmem:[%s5259_s1 + $0x1a8] sm:$0xf0] }
 0x138   : > { %v366_v19 = vmul.f32 %v343_v15, %v3737_v8  ;;  %v367_v20 = vmul.f32 %v343_v15, %v3740_v9  ;;  %v3232_v8 = vld [vmem:[%s5259_s1 + $0x2f4] sm:$0xf0]  ;;  %v3181_v9 = vld [vmem:[%s5259_s1 + $0x164] sm:$0xf]  ;;  %v2820_v62 = vor.u32 %v3217_v55, %v2817_v56  ;;  %v2575_v15 = vld [vmem:[%s5259_s1 + $0xa0] sm:$0xf] }
 0x139   : > { %v2864_v34 = vor.u32 %v3232_v8, %v2863_v25  ;;  %v2676_v37 = vor.u32 %v3181_v9, %v2673_v30  ;;  %v2769_v25 = vld [vmem:[%s5259_s1 + $0x238] sm:$0xf0]  ;;  %v2576_v8 = vor.u32 %v3160_v17, %v2575_v15  ;;  %v2551_v30 = vld [vmem:[%s5259_s1 + $0x70] sm:$0xf]  ;;  %v3142_v55 = vld [vmem:[%s5259_s1 + $0x24] sm:$0xf0] }
 0x13a   : > { %v381_v23 = vmul.f32 %v4015_v4, %v366_v19  ;;  %v382_v24 = vmul.f32 %v4017_v5, %v367_v20  ;;  %v2796_v19 = vor.u32 %v3211_v3, %v2793_v7  ;;  %v2767_v20 = vld [vmem:[%s5259_s1 + $0x220] sm:$0xf]  ;;  %v2552_v40 = vor.u32 %v3154_v31, %v2551_v30 }
 0x13b   : > { %v2504_v0 = vor.u32 %v3142_v55, %v2503_v54 }
 0x13c   : > { %v4053_v28 = vadd.f32 %v4021_v14, %v381_v23  ;;  %v4056_v29 = vadd.f32 %v4023_v16, %v382_v24  ;;  %v3208_v23 = vld [vmem:[%s5259_s1 + $0x234] sm:$0xf0]  ;;  %v3157_v24 = vld [vmem:[%s5259_s1 + $0xa4] sm:$0xf] }
 0x13d   : > { %v2768_v9 = vor.u32 %v3208_v23, %v2767_v20  ;;  %v2580_v32 = vor.u32 %v3157_v24, %v2577_v21 }
 0x13e   : > { %5287 = vst [vmem:[#allocation10_spill] sm:$0xff] %v4053_v28  ;;  %v4069_v33 = vpack.c.bf16 %v4053_v28, %v4047_v26  ;;  %v4073_v11 = vpack.c.bf16 %v4056_v29, %v4050_v27  ;;  %v2975_v28 = vld [vmem:[%s5260_s2 + $0xd0] sm:$0xf] }
 0x13f   : > { %5288 = vst [vmem:[#allocation11_spill] sm:$0xff] %v4056_v29  ;;  %v2983_v29 = vld [vmem:[%s5260_s2 + $0xe0] sm:$0xf] }
 0x140   : > { %987 = vmatmul.bf16.vlgmr.msra.gmra.mxu0 %v4069_v33  ;;  %1001 = vmatmul.bf16.vlgmr.msra.gmra.mxu1 %v4073_v11 }
 0x141   : > { %1015 = vmatmul.bf16.vlgmr.msra.gmra.mxu2 %v4069_v33  ;;  %1029 = vmatmul.bf16.vlgmr.msra.gmra.mxu3 %v4073_v11 }
 0x142   : > { %1091 = vmatpush.bf16.msra.mxu0 %v2672_v12  ;;  %1105 = vmatpush.bf16.msra.mxu1 %v2864_v34  ;;  %v2772_v12 = vor.u32 %v3205_v22, %v2769_v25  ;;  %v2743_v34 = vld [vmem:[%s5259_s1 + $0x1f0] sm:$0xf] }
 0x143   : > { %1119 = vmatpush.bf16.msra.mxu2 %v2676_v37  ;;  %1133 = vmatpush.bf16.msra.mxu3 %v2868_v38  ;;  %v2553_v37 = vld [vmem:[%s5259_s1 + $0x88] sm:$0xf0]  ;;  %v3199_v38 = vld [vmem:[%s5259_s1 + $0x1f4] sm:$0xf]  ;;  %v2744_v41 = vor.u32 %v3202_v35, %v2743_v34 }
 0x144   : > { %v2556_v44 = vor.u32 %v3151_v36, %v2553_v37 }
 0x146   : > { %1092 = vmatpush.bf16.msra.mxu0 %v2648_v45  ;;  %1106 = vmatpush.bf16.msra.mxu1 %v2840_v46  ;;  %v2748_v45 = vor.u32 %v3199_v38, %v2745_v39  ;;  %v2719_v46 = vld [vmem:[%s5259_s1 + $0x1c0] sm:$0xf] }
 0x147   : > { %1120 = vmatpush.bf16.msra.mxu2 %v2652_v49  ;;  %1134 = vmatpush.bf16.msra.mxu3 %v2844_v50  ;;  %v2529_v49 = vld [vmem:[%s5259_s1 + $0x58] sm:$0xf0]  ;;  %v3193_v50 = vld [vmem:[%s5259_s1 + $0x1c4] sm:$0xf]  ;;  %v2720_v53 = vor.u32 %v3196_v47, %v2719_v46 }
 0x148   : > { %v2532_v56 = vor.u32 %v3145_v48, %v2529_v49 }
 0x14a   : > { %1093 = vmatpush.bf16.msra.mxu0 %v2624_v57  ;;  %1107 = vmatpush.bf16.msra.mxu1 %v2816_v58  ;;  %v2724_v57 = vor.u32 %v3193_v50, %v2721_v51  ;;  %v2695_v58 = vld [vmem:[%s5259_s1 + $0x190] sm:$0xf] }
 0x14b   : > { %1121 = vmatpush.bf16.msra.mxu2 %v2628_v61  ;;  %1135 = vmatpush.bf16.msra.mxu3 %v2820_v62  ;;  %v2505_v61 = vld [vmem:[%s5259_s1 + $0x28] sm:$0xf0]  ;;  %v3187_v62 = vld [vmem:[%s5259_s1 + $0x194] sm:$0xf]  ;;  %v2696_v1 = vor.u32 %v3190_v59, %v2695_v58 }
 0x14c   : > { %v2508_v2 = vor.u32 %v3139_v60, %v2505_v61  ;;  %v2700_v3 = vor.u32 %v3187_v62, %v2697_v63 }
 0x14e   : > { %1094 = vmatpush.bf16.msra.mxu0 %v2600_v10  ;;  %1108 = vmatpush.bf16.msra.mxu1 %v2792_v13 }
 0x14f   : > { %1122 = vmatpush.bf16.msra.mxu2 %v2604_v18  ;;  %1136 = vmatpush.bf16.msra.mxu3 %v2796_v19 }
 0x150   : > { %1043 = vmatmul.bf16.vlgmr.msrb.gmra.mxu0 %v4069_v33  ;;  %1057 = vmatmul.bf16.vlgmr.msrb.gmra.mxu1 %v4073_v11 }
 0x151   : > { %1071 = vmatmul.bf16.vlgmr.msrb.gmra.mxu2 %v4069_v33  ;;  %1085 = vmatmul.bf16.vlgmr.msrb.gmra.mxu3 %v4073_v11 }
 0x152   : > { %1095 = vmatpush.bf16.msra.mxu0 %v2576_v8  ;;  %1109 = vmatpush.bf16.msra.mxu1 %v2768_v9 }
 0x153   : > { %1123 = vmatpush.bf16.msra.mxu2 %v2580_v32  ;;  %1137 = vmatpush.bf16.msra.mxu3 %v2772_v12 }
 0x156   : > { %1096 = vmatpush.bf16.msra.mxu0 %v2552_v40  ;;  %1110 = vmatpush.bf16.msra.mxu1 %v2744_v41 }
 0x157   : > { %1124 = vmatpush.bf16.msra.mxu2 %v2556_v44  ;;  %1138 = vmatpush.bf16.msra.mxu3 %v2748_v45 }
 0x15a   : > { %1097 = vmatpush.bf16.msra.mxu0 %v2528_v52  ;;  %1111 = vmatpush.bf16.msra.mxu1 %v2720_v53 }
 0x15b   : > { %1125 = vmatpush.bf16.msra.mxu2 %v2532_v56  ;;  %1139 = vmatpush.bf16.msra.mxu3 %v2724_v57 }
 0x15e   : > { %1098 = vmatpush.bf16.msra.mxu0 %v2504_v0  ;;  %1112 = vmatpush.bf16.msra.mxu1 %v2696_v1 }
 0x15f   : > { %1126 = vmatpush.bf16.msra.mxu2 %v2508_v2  ;;  %1140 = vmatpush.bf16.msra.mxu3 %v2700_v3 }
 0x161   : > { %1099 = vmatmul.bf16.vlgmr.msra.gmra.mxu0 %v4069_v33  ;;  %1113 = vmatmul.bf16.vlgmr.msra.gmra.mxu1 %v4073_v11 }
 0x162   : > { %1127 = vmatmul.bf16.vlgmr.msra.gmra.mxu2 %v4069_v33  ;;  %1141 = vmatmul.bf16.vlgmr.msra.gmra.mxu3 %v4073_v11 }
 0x1bd   : > { %v988_v7 = vpop.f32.mrf.mxu0  ;;  %v1002_v10 = vpop.f32.mrf.mxu1 }
 0x1be   : > { %v1003_v21 = vadd.f32 %v1002_v10, %v988_v7 }
 0x1c4   : > { %v1016_v13 = vpop.f32.mrf.mxu2  ;;  %v1030_v15 = vpop.f32.mrf.mxu3 }
 0x1c5   : > { %v990_v17 = vpop.f32.mrf.mxu0  ;;  %v1004_v18 = vpop.f32.mrf.mxu1  ;;  %v1031_v36 = vadd.f32 %v1030_v15, %v1016_v13 }
 0x1c6   : > { %v1005_v22 = vadd.f32 %v1004_v18, %v990_v17 }
 0x1cc   : > { %v1018_v19 = vpop.f32.mrf.mxu2  ;;  %v1032_v20 = vpop.f32.mrf.mxu3 }
 0x1cd   : > { %v1044_v23 = vpop.f32.mrf.mxu0  ;;  %v1058_v24 = vpop.f32.mrf.mxu1  ;;  %v1033_v42 = vadd.f32 %v1032_v20, %v1018_v19 }
 0x1ce   : > { %v1059_v25 = vadd.f32 %v1058_v24, %v1044_v23 }
 0x1d0   : > { %v1147_v8 = vmul.f32 %v1059_v25, %v1003_v21  ;;  %v1413_v9 = vmul.f32 %v1059_v25, %v1005_v22 }
 0x1d2   : > { %v4255_v33 = vmul.f32 0.17677669, %v1147_v8  ;;  %v4257_v11 = vmul.f32 0.17677669, %v1413_v9 }
 0x1d4   : > { %v1214_v30 = vsel %vm1213_vm7, %v4255_v33, -inf  ;;  %v1181_v31 = vsel %vm1180_vm8, %v4255_v33, -inf  ;;  %v1445_v32 = vsel %vm1180_vm8, %v4257_v11, -inf  ;;  %v1072_v12 = vpop.f32.mrf.mxu2  ;;  %v1086_v34 = vpop.f32.mrf.mxu3  ;;  %v1247_v38 = vsel %vm1246_vm9, %v4255_v33, -inf }
 0x1d5   : > { %1215 = vmax.xlane.f32.xlu0 %v1214_v30  ;;  %1182 = vmax.xlane.f32.xlu2 %v1181_v31  ;;  %v1087_v35 = vadd.f32 %v1086_v34, %v1072_v12  ;;  %v1477_v39 = vsel %vm1213_vm7, %v4257_v11, -inf  ;;  %v1156_v40 = vsel %vm1155_vm10, %v4255_v33, -inf  ;;  %v1509_v44 = vsel %vm1246_vm9, %v4257_v11, -inf  ;;  %v1060_v50 = vpop.f32.mrf.mxu1  ;;  %v1046_v51 = vpop.f32.mrf.mxu0 }
 0x1d6   : > { %1446 = vmax.xlane.f32.xlu1 %v1445_v32  ;;  %v1421_v46 = vsel %vm1155_vm10, %v4257_v11, -inf  ;;  %v1061_v53 = vadd.f32 %v1060_v50, %v1046_v51 }
 0x1d7   : > { %v1148_v37 = vmul.f32 %v1087_v35, %v1031_v36  ;;  %v1414_v43 = vmul.f32 %v1087_v35, %v1033_v42 }
 0x1d8   : > { %v1149_v54 = vmul.f32 %v1061_v53, %v1005_v22  ;;  %v1415_v59 = vmul.f32 %v1061_v53, %v1003_v21 }
 0x1d9   : > { %v4271_v41 = vmul.f32 0.17677669, %v1148_v37  ;;  %v4279_v47 = vmul.f32 0.17677669, %v1414_v43 }
 0x1da   : > { %v4293_v58 = vmul.f32 0.17677669, %v1149_v54  ;;  %v4301_v1 = vmul.f32 0.17677669, %v1415_v59 }
 0x1db   : > { %v1335_v45 = vsel %vm1213_vm7, %v4271_v41, -inf  ;;  %v1367_v48 = vsel %vm1246_vm9, %v4271_v41, -inf  ;;  %v1597_v49 = vsel %vm1213_vm7, %v4279_v47, -inf  ;;  %v1303_v52 = vsel %vm1180_vm8, %v4271_v41, -inf }
 0x1dc   : > { %v1629_v55 = vsel %vm1246_vm9, %v4279_v47, -inf  ;;  %v1279_v56 = vsel %vm1155_vm10, %v4271_v41, -inf  ;;  %v1565_v57 = vsel %vm1180_vm8, %v4279_v47, -inf  ;;  %v1541_v60 = vsel %vm1155_vm10, %v4279_v47, -inf  ;;  %v1074_v63 = vpop.f32.mrf.mxu2  ;;  %v1088_v0 = vpop.f32.mrf.mxu3 }
 0x1dd   : > { %1248 = vmax.xlane.f32.xlu2 %v1247_v38  ;;  %1478 = vmax.xlane.f32.xlu0 %v1477_v39  ;;  %v1250_v61 = vsel %vm1246_vm9, %v4293_v58, -inf  ;;  %v1217_v62 = vsel %vm1213_vm7, %v4293_v58, -inf  ;;  %v1089_v2 = vadd.f32 %v1088_v0, %v1074_v63  ;;  %v1512_v3 = vsel %vm1246_vm9, %v4301_v1, -inf }
 0x1de   : > { %1157 = vmax.xlane.f32.xlu1 %v1156_v40  ;;  %v1184_v7 = vsel %vm1180_vm8, %v4293_v58, -inf  ;;  %v1480_v13 = vsel %vm1213_vm7, %v4301_v1, -inf  ;;  %v1424_v17 = vsel %vm1155_vm10, %v4301_v1, -inf  ;;  %v1448_v18 = vsel %vm1180_vm8, %v4301_v1, -inf  ;;  %v1114_v5 = vpop.f32.mrf.mxu1  ;;  %v1100_v4 = vpop.f32.mrf.mxu0 }
 0x1df   : > { %v1150_v10 = vmul.f32 %v1089_v2, %v1033_v42  ;;  %v1416_v19 = vmul.f32 %v1089_v2, %v1031_v36  ;;  %v1159_v21 = vsel %vm1155_vm10, %v4293_v58, -inf }
 0x1e1   : > { %v4309_v15 = vmul.f32 0.17677669, %v1150_v10  ;;  %v4317_v23 = vmul.f32 0.17677669, %v1416_v19 }
 0x1e3   : > { %v1338_v20 = vsel %vm1213_vm7, %v4309_v15, -inf  ;;  %v1370_v24 = vsel %vm1246_vm9, %v4309_v15, -inf  ;;  %v1600_v22 = vsel %vm1213_vm7, %v4317_v23, -inf  ;;  %v1632_v25 = vsel %vm1246_vm9, %v4317_v23, -inf }
 0x1e4   : > { %v1306_v8 = vsel %vm1180_vm8, %v4309_v15, -inf  ;;  %v1282_v9 = vsel %vm1155_vm10, %v4309_v15, -inf  ;;  %v1568_v30 = vsel %vm1180_vm8, %v4317_v23, -inf  ;;  %v1544_v31 = vsel %vm1155_vm10, %v4317_v23, -inf }
 0x1e5   : > { %1510 = vmax.xlane.f32.xlu2 %v1509_v44  ;;  %1336 = vmax.xlane.f32.xlu0 %v1335_v45 }
 0x1e6   : > { %1422 = vmax.xlane.f32.xlu1 %v1421_v46  ;;  %v1116_v27 = vpop.f32.mrf.mxu1 }
 0x1ed   : > { %1368 = vmax.xlane.f32.xlu2 %v1367_v48  ;;  %1598 = vmax.xlane.f32.xlu0 %v1597_v49 }
 0x1ee   : > { %1304 = vmax.xlane.f32.xlu1 %v1303_v52 }
 0x1f5   : > { %1630 = vmax.xlane.f32.xlu2 %v1629_v55  ;;  %1280 = vmax.xlane.f32.xlu0 %v1279_v56 }
 0x1f6   : > { %1566 = vmax.xlane.f32.xlu1 %v1565_v57 }
 0x1fd   : > { %1542 = vmax.xlane.f32.xlu2 %v1541_v60  ;;  %1251 = vmax.xlane.f32.xlu0 %v1250_v61 }
 0x1fe   : > { %1218 = vmax.xlane.f32.xlu1 %v1217_v62 }
 0x205   : > { %1513 = vmax.xlane.f32.xlu0 %v1512_v3  ;;  %1185 = vmax.xlane.f32.xlu2 %v1184_v7 }
 0x206   : > { %1481 = vmax.xlane.f32.xlu1 %v1480_v13 }
 0x20d   : > { %1425 = vmax.xlane.f32.xlu0 %v1424_v17  ;;  %1449 = vmax.xlane.f32.xlu2 %v1448_v18 }
 0x20e   : > { %1339 = vmax.xlane.f32.xlu1 %v1338_v20 }
 0x215   : > { %1371 = vmax.xlane.f32.xlu0 %v1370_v24  ;;  %1160 = vmax.xlane.f32.xlu2 %v1159_v21 }
 0x216   : > { %1601 = vmax.xlane.f32.xlu1 %v1600_v22 }
 0x21d   : > { %1633 = vmax.xlane.f32.xlu0 %v1632_v25  ;;  %1307 = vmax.xlane.f32.xlu2 %v1306_v8 }
 0x21e   : > { %1283 = vmax.xlane.f32.xlu1 %v1282_v9 }
 0x225   : > { %1569 = vmax.xlane.f32.xlu2 %v1568_v30 }
 0x226   : > { %1545 = vmax.xlane.f32.xlu1 %v1544_v31 }
 0x248   : > { %v1216_v32 = vpop.xlane.xlu0 %1215  ;;  %v1183_v12 = vpop.xlane.xlu2 %1182 }
 0x249   : > { %v1220_v34 = vsub.f32 %v4255_v33, %v1216_v32  ;;  %v1187_v35 = vsub.f32 %v4255_v33, %v1183_v12  ;;  %v1447_v40 = vpop.xlane.xlu1 %1446 }
 0x24a   : > { %v1451_v49 = vsub.f32 %v4257_v11, %v1447_v40 }
 0x24b   : > { %v1222_v36 = vmul.f32 1.442695, %v1220_v34  ;;  %v1189_v37 = vmul.f32 1.442695, %v1187_v35 }
 0x24c   : > { %v1453_v50 = vmul.f32 1.442695, %v1451_v49 }
 0x24d   : > { %3332 = vpow2.f32 %v1222_v36 }
 0x24e   : > { %3334 = vpow2.f32 %v1189_v37 }
 0x250   : > { %v1249_v38 = vpop.xlane.xlu2 %1248  ;;  %v1479_v39 = vpop.xlane.xlu0 %1478 }
 0x251   : > { %v1253_v42 = vsub.f32 %v4255_v33, %v1249_v38  ;;  %v1483_v43 = vsub.f32 %v4257_v11, %v1479_v39  ;;  %v1158_v57 = vpop.xlane.xlu1 %1157 }
 0x252   : > { %v1162_v18 = vsub.f32 %v4255_v33, %v1158_v57 }
 0x253   : > { %v4339_v44 = vpop.eup %3332  ;;  %v1255_v45 = vmul.f32 1.442695, %v1253_v42  ;;  %v1485_v46 = vmul.f32 1.442695, %v1483_v43 }
 0x254   : > { %v4341_v48 = vpop.eup %3334  ;;  %1228 = vrot.lane.b32.xlu1 %v4339_v44, %s3498_s30  ;;  %v1164_v19 = vmul.f32 1.442695, %v1162_v18 }
 0x255   : > { %3336 = vpow2.f32 %v1255_v45  ;;  %1195 = vrot.lane.b32.xlu2 %v4341_v48, %s3499_s6 }
 0x256   : > { %3338 = vpow2.f32 %v1485_v46 }
 0x257   : > { %3340 = vpow2.f32 %v1453_v50 }
 0x258   : > { %v1511_v51 = vpop.xlane.xlu2 %1510  ;;  %v1337_v52 = vpop.xlane.xlu0 %1336 }
 0x259   : > { %v1515_v53 = vsub.f32 %v4257_v11, %v1511_v51  ;;  %v1423_v7 = vpop.xlane.xlu1 %1422  ;;  %v1341_v36 = vsub.f32 %v4271_v41, %v1337_v52 }
 0x25a   : > { %v1427_v20 = vsub.f32 %v4257_v11, %v1423_v7 }
 0x25b   : > { %v4349_v54 = vpop.eup %3336  ;;  %v1517_v55 = vmul.f32 1.442695, %v1515_v53  ;;  %v1343_v40 = vmul.f32 1.442695, %v1341_v36 }
 0x25c   : > { %v4351_v56 = vpop.eup %3338  ;;  %1261 = vrot.lane.b32.xlu0 %v4349_v54, %s3500_s7  ;;  %v1429_v21 = vmul.f32 1.442695, %v1427_v20 }
 0x25d   : > { %3342 = vpow2.f32 %v1517_v55  ;;  %1491 = vrot.lane.b32.xlu1 %v4351_v56, %s3498_s30  ;;  %v4358_v61 = vpop.eup %3340 }
 0x260   : > { %v1369_v59 = vpop.xlane.xlu2 %1368  ;;  %v1599_v62 = vpop.xlane.xlu0 %1598 }
 0x261   : > { %v1373_v60 = vsub.f32 %v4271_v41, %v1369_v59  ;;  %v1603_v2 = vsub.f32 %v4279_v47, %v1599_v62  ;;  %v1305_v17 = vpop.xlane.xlu1 %1304 }
 0x262   : > { %v1309_v12 = vsub.f32 %v4271_v41, %v1305_v17 }
 0x263   : > { %v4360_v63 = vpop.eup %3342  ;;  %v1375_v0 = vmul.f32 1.442695, %v1373_v60  ;;  %v1605_v3 = vmul.f32 1.442695, %v1603_v2 }
 0x264   : > { %1459 = vrot.lane.b32.xlu0 %v4358_v61, %s3499_s6  ;;  %1523 = vrot.lane.b32.xlu2 %v4360_v63, %s3500_s7  ;;  %v1311_v35 = vmul.f32 1.442695, %v1309_v12 }
 0x265   : > { %3344 = vpow2.f32 %v1375_v0 }
 0x266   : > { %3346 = vpow2.f32 %v1605_v3 }
 0x267   : > { %3348 = vpow2.f32 %v1164_v19 }
 0x268   : > { %3350 = vpow2.f32 %v1429_v21  ;;  %v1281_v30 = vpop.xlane.xlu0 %1280  ;;  %v1631_v31 = vpop.xlane.xlu2 %1630 }
 0x269   : > { %v1567_v24 = vpop.xlane.xlu1 %1566  ;;  %v1285_v33 = vsub.f32 %v4271_v41, %v1281_v30  ;;  %v1635_v46 = vsub.f32 %v4279_v47, %v1631_v31 }
 0x26a   : > { %v1571_v38 = vsub.f32 %v4279_v47, %v1567_v24 }
 0x26b   : > { %v4367_v10 = vpop.eup %3344  ;;  %v1287_v32 = vmul.f32 1.442695, %v1285_v33  ;;  %v1637_v51 = vmul.f32 1.442695, %v1635_v46 }
 0x26c   : > { %1381 = vrot.lane.b32.xlu0 %v4367_v10, %s3500_s7  ;;  %v4371_v13 = vpop.eup %3346  ;;  %v1573_v43 = vmul.f32 1.442695, %v1571_v38 }
 0x26d   : > { %v4377_v22 = vpop.eup %3348  ;;  %3352 = vpow2.f32 %v1287_v32 }
 0x26e   : > { %v1168_v25 = vsel %vm1155_vm10, %v4377_v22, 0.0  ;;  %v4381_v9 = vpop.eup %3350  ;;  %3354 = vpow2.f32 %v1311_v35 }
 0x26f   : > { %v1433_v11 = vsel %vm1155_vm10, %v4381_v9, 0.0  ;;  %3356 = vpow2.f32 %v1343_v40 }
 0x270   : > { %v4388_v37 = vpop.xlane.xlu2 %1542  ;;  %3358 = vpow2.f32 %v1573_v43  ;;  %v1252_v57 = vpop.xlane.xlu0 %1251 }
 0x271   : > { %v1219_v8 = vpop.xlane.xlu1 %1218  ;;  %3360 = vpow2.f32 %v1637_v51  ;;  %v1254_v19 = vsub.f32 %v4293_v58, %v1252_v57 }
 0x272   : > { %v1221_v59 = vsub.f32 %v4293_v58, %v1219_v8 }
 0x273   : > { %v4391_v39 = vpop.eup %3352  ;;  %v1257_v8 = vmul.f32 1.442695, %v1254_v19 }
 0x274   : > { %1611 = vrot.lane.b32.xlu0 %v4371_v13, %s3498_s30  ;;  %v1291_v45 = vsel %vm1155_vm10, %v4391_v39, 0.0  ;;  %v4396_v49 = vpop.eup %3354  ;;  %v1224_v3 = vmul.f32 1.442695, %v1221_v59 }
 0x275   : > { %v4402_v53 = vpop.eup %3356 }
 0x276   : > { %v4407_v62 = vpop.eup %3358 }
 0x277   : > { %v4413_v17 = vpop.eup %3360 }
 0x278   : > { %v1186_v41 = vpop.xlane.xlu2 %1185  ;;  %v1514_v21 = vpop.xlane.xlu0 %1513 }
 0x279   : > { %v1482_v34 = vpop.xlane.xlu1 %1481  ;;  %v1188_v52 = vsub.f32 %v4293_v58, %v1186_v41  ;;  %v1516_v30 = vsub.f32 %v4301_v1, %v1514_v21 }
 0x27a   : > { %v1484_v7 = vsub.f32 %v4301_v1, %v1482_v34 }
 0x27b   : > { %v1191_v0 = vmul.f32 1.442695, %v1188_v52  ;;  %v1519_v12 = vmul.f32 1.442695, %v1516_v30 }
 0x27c   : > { %v1487_v24 = vmul.f32 1.442695, %v1484_v7 }
 0x280   : > { %v1450_v31 = vpop.xlane.xlu2 %1449 }
 0x281   : > { %v1340_v42 = vpop.xlane.xlu1 %1339 }
 0x282   : > { %v1342_v50 = vsub.f32 %v4309_v15, %v1340_v42  ;;  %v1426_v42 = vpop.xlane.xlu0 %1425 }
 0x283   : > { %v1428_v51 = vsub.f32 %v4301_v1, %v1426_v42 }
 0x284   : > { %v1345_v55 = vmul.f32 1.442695, %v1342_v50 }
 0x285   : > { %v1431_v59 = vmul.f32 1.442695, %v1428_v51 }
 0x286   : > { %3362 = vpow2.f32 %v1345_v55 }
 0x287   : > { %1169 = vadd.xlane.f32.xlu1 %v1168_v25  ;;  %3364 = vpow2.f32 %v1191_v0 }
 0x288   : > { %3366 = vpow2.f32 %v1224_v3  ;;  %v1161_v41 = vpop.xlane.xlu2 %1160 }
 0x289   : > { %v1602_v60 = vpop.xlane.xlu1 %1601  ;;  %v1163_v52 = vsub.f32 %v4293_v58, %v1161_v41 }
 0x28a   : > { %v1604_v2 = vsub.f32 %v4317_v23, %v1602_v60  ;;  %v1372_v46 = vpop.xlane.xlu0 %1371 }
 0x28b   : > { %v1166_v0 = vmul.f32 1.442695, %v1163_v52 }
 0x28c   : > { %v1607_v18 = vmul.f32 1.442695, %v1604_v2  ;;  %v4418_v20 = vpop.eup %3362 }
 0x28d   : > { %1434 = vadd.xlane.f32.xlu2 %v1433_v11  ;;  %v4422_v25 = vpop.eup %3364  ;;  %v1452_v11 = vsub.f32 %v4301_v1, %v1450_v31 }
 0x28e   : > { %3368 = vpow2.f32 %v1607_v18  ;;  %v4427_v33 = vpop.eup %3366 }
 0x28f   : > { %3370 = vpow2.f32 %v1487_v24  ;;  %v1455_v35 = vmul.f32 1.442695, %v1452_v11 }
 0x290   : > { %3372 = vpow2.f32 %v1257_v8  ;;  %v1308_v60 = vpop.xlane.xlu2 %1307 }
 0x291   : > { %3374 = vpow2.f32 %v1519_v12  ;;  %v1284_v43 = vpop.xlane.xlu1 %1283  ;;  %v1310_v30 = vsub.f32 %v4309_v15, %v1308_v60  ;;  %v1374_v12 = vsub.f32 %v4309_v15, %v1372_v46 }
 0x292   : > { %3376 = vpow2.f32 %v1455_v35  ;;  %v1634_v55 = vpop.xlane.xlu0 %1633 }
 0x293   : > { %v1313_v11 = vmul.f32 1.442695, %v1310_v30  ;;  %v1636_v42 = vsub.f32 %v4317_v23, %v1634_v55 }
 0x294   : > { %v4432_v32 = vpop.eup %3368 }
 0x295   : > { %5289 = vst [vmem:[#allocation12_spill] sm:$0xff] %v4432_v32  ;;  %v4436_v34 = vpop.eup %3370 }
 0x296   : > { %v4440_v36 = vpop.eup %3372 }
 0x297   : > { %v4444_v38 = vpop.eup %3374 }
 0x298   : > { %v4448_v40 = vpop.eup %3376  ;;  %v1570_v18 = vpop.xlane.xlu2 %1569 }
 0x29e   : > { %1292 = vadd.xlane.f32.xlu0 %v1291_v45  ;;  %v1286_v45 = vsub.f32 %v4309_v15, %v1284_v43  ;;  %v1377_v43 = vmul.f32 1.442695, %v1374_v12 }
 0x2a0   : > { %1317 = vrot.lane.b32.xlu1 %v4396_v49, %s3499_s6  ;;  %v1289_v50 = vmul.f32 1.442695, %v1286_v45  ;;  %v1639_v45 = vmul.f32 1.442695, %v1636_v42 }
 0x2a2   : > { %3378 = vpow2.f32 %v1289_v50  ;;  %v1572_v50 = vsub.f32 %v4317_v23, %v1570_v18  ;;  %v1546_v18 = vpop.xlane.xlu1 %1545 }
 0x2a3   : > { %3380 = vpow2.f32 %v1431_v59 }
 0x2a4   : > { %3382 = vpow2.f32 %v1166_v0  ;;  %v1575_v52 = vmul.f32 1.442695, %v1572_v50 }
 0x2a5   : > { %1349 = vrot.lane.b32.xlu2 %v4402_v53, %s3498_s30  ;;  %3384 = vpow2.f32 %v1313_v11 }
 0x2a6   : > { %3386 = vpow2.f32 %v1377_v43 }
 0x2a7   : > { %3388 = vpow2.f32 %v1639_v45 }
 0x2a8   : > { %1579 = vrot.lane.b32.xlu1 %v4407_v62, %s3499_s6  ;;  %v4455_v57 = vpop.eup %3378  ;;  %3390 = vpow2.f32 %v1575_v52 }
 0x2a9   : > { %v1294_v2 = vsel %vm1155_vm10, %v4455_v57, 0.0  ;;  %v4459_v7 = vpop.eup %3380 }
 0x2aa   : > { %v4462_v19 = vpop.eup %3382  ;;  %v1436_v58 = vsel %vm1155_vm10, %v4459_v7, 0.0 }
 0x2ab   : > { %v1171_v24 = vsel %vm1155_vm10, %v4462_v19, 0.0  ;;  %v4472_v41 = vpop.eup %3384 }
 0x2ac   : > { %v4479_v59 = vpop.eup %3386 }
 0x2ad   : > { %1643 = vrot.lane.b32.xlu2 %v4413_v17, %s3500_s7  ;;  %v4483_v15 = vpop.eup %3388 }
 0x2ae   : > { %5290 = vst [vmem:[#allocation13_spill] sm:$0xff] %v4483_v15  ;;  %v4488_v0 = vpop.eup %3390 }
 0x2af   : > { %v1196_v8 = vpop.permute.xlu2 %1195 }
 0x2b0   : > { %1351 = vrot.lane.b32.xlu1 %v4418_v20, %s3498_s30  ;;  %v1201_v12 = vsel %vm1155_vm10, %v1196_v8, 0.0 }
 0x2b2   : > { %1197 = vrot.lane.b32.xlu0 %v4422_v25, %s3499_s6 }
 0x2b5   : > { %1230 = vrot.lane.b32.xlu2 %v4427_v33, %s3498_s30 }
 0x2b8   : > { %1613 = vrot.lane.b32.xlu1 %v4432_v32, %s3498_s30  ;;  %v4701_v32 = vadd.f32 %v1114_v5, %v1100_v4  ;;  %v3257_v4 = vld [vmem:[%s5260_s2 + $0xc4] sm:$0xf] }
 0x2ba   : > { %1493 = vrot.lane.b32.xlu0 %v4436_v34, %s3498_s30 }
 0x2bd   : > { %1263 = vrot.lane.b32.xlu2 %v4440_v36, %s3500_s7 }
 0x2be   : > { %v1524_v35 = vpop.permute.xlu2 %1523 }
 0x2c2   : > { %1525 = vrot.lane.b32.xlu0 %v4444_v38, %s3500_s7 }
 0x2c5   : > { %1461 = vrot.lane.b32.xlu2 %v4448_v40, %s3499_s6 }
 0x2c6   : > { %v1229_v30 = vpop.permute.xlu1 %1228 }
 0x2ce   : > { %v1262_v3 = vpop.permute.xlu0 %1261 }
 0x2cf   : > { %v1267_v1 = vsel %vm1155_vm10, %v1262_v3, 0.0  ;;  %v1492_v43 = vpop.permute.xlu1 %1491 }
 0x2d0   : > { %v1497_v50 = vsel %vm1155_vm10, %v1492_v43, 0.0 }
 0x2d6   : > { %v1460_v21 = vpop.permute.xlu0 %1459 }
 0x2d7   : > { %v1465_v31 = vsel %vm1155_vm10, %v1460_v21, 0.0 }
 0x2de   : > { %v1382_v60 = vpop.permute.xlu0 %1381 }
 0x2e2   : > { %1295 = vadd.xlane.f32.xlu1 %v1294_v2 }
 0x2e6   : > { %v1612_v2 = vpop.permute.xlu0 %1611 }
 0x2ea   : > { %1268 = vadd.xlane.f32.xlu1 %v1267_v1  ;;  %v1547_v1 = vsub.f32 %v4279_v47, %v4388_v37  ;;  %v1234_v37 = vsel %vm1155_vm10, %v1229_v30, 0.0 }
 0x2ec   : > { %1437 = vadd.xlane.f32.xlu0 %v1436_v58  ;;  %v1549_v21 = vmul.f32 1.442695, %v1547_v1 }
 0x2ee   : > { %1172 = vadd.xlane.f32.xlu2 %v1171_v24  ;;  %3392 = vpow2.f32 %v1549_v21 }
 0x2f2   : > { %1466 = vadd.xlane.f32.xlu1 %v1465_v31 }
 0x2f4   : > { %v4499_v42 = vpop.eup %3392 }
 0x2f5   : > { %v1553_v47 = vsel %vm1155_vm10, %v4499_v42, 0.0 }
 0x2fa   : > { %v4505_v52 = vpop.xlane.xlu1 %1169 }
 0x300   : > { %1319 = vrot.lane.b32.xlu0 %v4472_v41, %s3499_s6  ;;  %v4477_v51 = vpop.xlane.xlu2 %1434 }
 0x306   : > { %1383 = vrot.lane.b32.xlu2 %v4479_v59, %s3500_s7 }
 0x308   : > { %1645 = vrot.lane.b32.xlu0 %v4483_v15, %s3500_s7  ;;  %v1350_v46 = vpop.permute.xlu2 %1349 }
 0x309   : > { %v1355_v55 = vsel %vm1155_vm10, %v1350_v46, 0.0  ;;  %v1529_v46 = vsel %vm1155_vm10, %v1524_v35, 0.0  ;;  %v1548_v35 = vsub.f32 %v4317_v23, %v1546_v18 }
 0x30a   : > { %1356 = vadd.xlane.f32.xlu1 %v1355_v55  ;;  %v1387_v55 = vsel %vm1155_vm10, %v1382_v60, 0.0 }
 0x30b   : > { %v1551_v60 = vmul.f32 1.442695, %v1548_v35 }
 0x30d   : > { %3394 = vpow2.f32 %v1551_v60  ;;  %v4531_v60 = vld [vmem:[%s3577_s11 + $0x30] sm:$0xff] }
 0x30e   : > { %1581 = vrot.lane.b32.xlu2 %v4488_v0, %s3499_s6  ;;  %3396 = vrcp.f32 %v4505_v52 }
 0x310   : > { %v1644_v45 = vpop.permute.xlu2 %1643 }
 0x311   : > { %v4492_v3 = vpop.xlane.xlu0 %1292  ;;  %v1649_v35 = vsel %vm1155_vm10, %v1644_v45, 0.0 }
 0x312   : > { %v1318_v1 = vpop.permute.xlu1 %1317 }
 0x318   : > { %v1231_v8 = vpop.permute.xlu2 %1230 }
 0x319   : > { %v1237_v21 = vsel %vm1155_vm10, %v1231_v8, 0.0 }
 0x324   : > { %v1198_v58 = vpop.permute.xlu0 %1197 }
 0x325   : > { %v1204_v24 = vsel %vm1155_vm10, %v1198_v58, 0.0  ;;  %v1323_v58 = vsel %vm1155_vm10, %v1318_v1, 0.0  ;;  %v1617_v1 = vsel %vm1155_vm10, %v1612_v2, 0.0 }
 0x326   : > { %1205 = vadd.xlane.f32.xlu1 %v1204_v24  ;;  %v1264_v24 = vpop.permute.xlu2 %1263 }
 0x327   : > { %v1270_v30 = vsel %vm1155_vm10, %v1264_v24, 0.0 }
 0x32c   : > { %v1494_v31 = vpop.permute.xlu0 %1493 }
 0x32d   : > { %v1500_v11 = vsel %vm1155_vm10, %v1494_v31, 0.0  ;;  %v1580_v31 = vpop.permute.xlu1 %1579 }
 0x32e   : > { %1501 = vadd.xlane.f32.xlu1 %v1500_v11  ;;  %v1462_v11 = vpop.permute.xlu2 %1461 }
 0x332   : > { %1202 = vadd.xlane.f32.xlu0 %v1201_v12  ;;  %v1468_v12 = vsel %vm1155_vm10, %v1462_v11, 0.0 }
 0x335   : > { %v1352_v43 = vpop.permute.xlu1 %1351 }
 0x336   : > { %1554 = vadd.xlane.f32.xlu1 %v1553_v47  ;;  %v1358_v47 = vsel %vm1155_vm10, %v1352_v43, 0.0  ;;  %v4534_v43 = vld [vmem:[%s3577_s11 + $0x38] sm:$0xff] }
 0x337   : > { %1235 = vadd.xlane.f32.xlu2 %v1234_v37 }
 0x33a   : > { %1498 = vadd.xlane.f32.xlu0 %v1497_v50  ;;  %v1526_v50 = vpop.permute.xlu0 %1525 }
 0x33d   : > { %v1614_v45 = vpop.permute.xlu1 %1613 }
 0x33f   : > { %1530 = vadd.xlane.f32.xlu2 %v1529_v46  ;;  %v4517_v46 = vpop.eup %3394 }
 0x340   : > { %v1556_v8 = vsel %vm1155_vm10, %v4517_v46, 0.0 }
 0x342   : > { %1388 = vadd.xlane.f32.xlu0 %v1387_v55 }
 0x347   : > { %1324 = vadd.xlane.f32.xlu2 %v1323_v58 }
 0x34a   : > { %1238 = vadd.xlane.f32.xlu0 %v1237_v21 }
 0x34f   : > { %1271 = vadd.xlane.f32.xlu2 %v1270_v30 }
 0x357   : > { %1469 = vadd.xlane.f32.xlu2 %v1468_v12  ;;  %v1532_v12 = vsel %vm1155_vm10, %v1526_v50, 0.0  ;;  %v4541_v50 = vld [vmem:[%s3577_s11 + $0x20] sm:$0xff] }
 0x358   : > { %5291 = vst [vmem:[#allocation14_spill] sm:$0xff] %v4541_v50 }
 0x35f   : > { %1359 = vadd.xlane.f32.xlu2 %v1358_v47  ;;  %v4521_v23 = vpop.xlane.xlu0 %1437  ;;  %v274_v47 = vadd.f32 %v4534_v43, %v4531_v60 }
 0x361   : > { %v4515_v37 = vpop.xlane.xlu2 %1172 }
 0x367   : > { %1557 = vadd.xlane.f32.xlu2 %v1556_v8  ;;  %v1585_v8 = vsel %vm1155_vm10, %v1580_v31, 0.0  ;;  %v3248_v31 = vld [vmem:[%s5260_s2 + $0x74] sm:$0xf0] }
 0x369   : > { %v1384_v55 = vpop.permute.xlu2 %1383 }
 0x36a   : > { %v1390_v18 = vsel %vm1155_vm10, %v1384_v55, 0.0  ;;  %v1620_v55 = vsel %vm1155_vm10, %v1614_v45, 0.0  ;;  %v2921_v45 = vld [vmem:[%s5260_s2 + $0x68] sm:$0xf0] }
 0x36b   : > { %1391 = vadd.xlane.f32.xlu1 %v1390_v18  ;;  %v4544_v18 = vld [vmem:[%s3577_s11 + $0x28] sm:$0xff] }
 0x36c   : > { %5292 = vst [vmem:[#allocation15_spill] sm:$0xff] %v4544_v18 }
 0x36f   : > { %1618 = vadd.xlane.f32.xlu2 %v1617_v1  ;;  %v271_v1 = vadd.f32 %v4544_v18, %v4541_v50 }
 0x371   : > { %v1582_v58 = vpop.permute.xlu2 %1581 }
 0x372   : > { %v1320_v24 = vpop.permute.xlu0 %1319  ;;  %v1588_v21 = vsel %vm1155_vm10, %v1582_v58, 0.0  ;;  %v2927_v58 = vld [vmem:[%s5260_s2 + $0x70] sm:$0xf] }
 0x373   : > { %1589 = vadd.xlane.f32.xlu1 %v1588_v21  ;;  %v1326_v30 = vsel %vm1155_vm10, %v1320_v24, 0.0  ;;  %v3247_v24 = vld [vmem:[%s5260_s2 + $0x74] sm:$0xf]  ;;  %v2928_v21 = vor.u32 %v3248_v31, %v2927_v58  ;;  %v3244_v58 = vld [vmem:[%s5260_s2 + $0x54] sm:$0xf0] }
 0x374   : > { %1327 = vadd.xlane.f32.xlu0 %v1326_v30  ;;  %v2929_v30 = vld [vmem:[%s5260_s2 + $0x78] sm:$0xf0]  ;;  %v3243_v31 = vld [vmem:[%s5260_s2 + $0x54] sm:$0xf] }
 0x375   : > { %1875 = vmatpush.bf16.msrb.mxu0 %v2928_v21  ;;  %v2913_v21 = vld [vmem:[%s5260_s2 + $0x58] sm:$0xf0] }
 0x37a   : > { %v1646_v11 = vpop.permute.xlu0 %1645 }
 0x37b   : > { %1650 = vadd.xlane.f32.xlu1 %v1649_v35  ;;  %v1652_v2 = vsel %vm1155_vm10, %v1646_v11, 0.0  ;;  %v4560_v11 = vpop.xlane.xlu1 %1295  ;;  %v2932_v35 = vor.u32 %v3247_v24, %v2929_v30  ;;  %v2916_v30 = vor.u32 %v3243_v31, %v2913_v21  ;;  %v3239_v31 = vld [vmem:[%s5260_s2 + $0x34] sm:$0xf]  ;;  %v2897_v21 = vld [vmem:[%s5260_s2 + $0x38] sm:$0xf0] }
 0x37c   : > { %1533 = vadd.xlane.f32.xlu0 %v1532_v12  ;;  %1653 = vadd.xlane.f32.xlu2 %v1652_v2  ;;  %v2919_v12 = vld [vmem:[%s5260_s2 + $0x60] sm:$0xf]  ;;  %v3246_v2 = vld [vmem:[%s5260_s2 + $0x64] sm:$0xf0] }
 0x37d   : > { %1913 = vmatpush.bf16.msrb.mxu2 %v2932_v35 }
 0x383   : > { %275 = vadd.xlane.f32.xlu1 %v274_v47  ;;  %v3245_v47 = vld [vmem:[%s5260_s2 + $0x64] sm:$0xf]  ;;  %v4586_v35 = vpop.xlane.xlu1 %1268 }
 0x384   : > { %1586 = vadd.xlane.f32.xlu0 %v1585_v8  ;;  %v2920_v8 = vor.u32 %v3246_v2, %v2919_v12  ;;  %v2903_v12 = vld [vmem:[%s5260_s2 + $0x40] sm:$0xf]  ;;  %v3242_v2 = vld [vmem:[%s5260_s2 + $0x44] sm:$0xf0] }
 0x386   : > { %1876 = vmatpush.bf16.msrb.mxu0 %v2920_v8  ;;  %v2904_v8 = vor.u32 %v3242_v2, %v2903_v12  ;;  %v2887_v2 = vld [vmem:[%s5260_s2 + $0x20] sm:$0xf] }
 0x38c   : > { %1621 = vadd.xlane.f32.xlu0 %v1620_v55  ;;  %v2924_v55 = vor.u32 %v3245_v47, %v2921_v45  ;;  %v3241_v47 = vld [vmem:[%s5260_s2 + $0x44] sm:$0xf]  ;;  %v2905_v45 = vld [vmem:[%s5260_s2 + $0x48] sm:$0xf0] }
 0x38e   : > { %1914 = vmatpush.bf16.msrb.mxu2 %v2924_v55  ;;  %v2908_v55 = vor.u32 %v3241_v47, %v2905_v45  ;;  %v3238_v47 = vld [vmem:[%s5260_s2 + $0x24] sm:$0xf0] }
 0x38f   : > { %v2888_v45 = vor.u32 %v3238_v47, %v2887_v2  ;;  %v2881_v47 = vld [vmem:[%s5260_s2 + $0x18] sm:$0xf0] }
 0x392   : > { %1915 = vmatpush.bf16.msrb.mxu2 %v2916_v30  ;;  %v2900_v30 = vor.u32 %v3239_v31, %v2897_v21  ;;  %v3236_v21 = vld [vmem:[%s5260_s2 + $0x14] sm:$0xf0] }
 0x394   : > { %272 = vadd.xlane.f32.xlu0 %v271_v1  ;;  %v2911_v1 = vld [vmem:[%s5260_s2 + $0x50] sm:$0xf] }
 0x395   : > { %v2912_v24 = vor.u32 %v3244_v58, %v2911_v1  ;;  %v2895_v1 = vld [vmem:[%s5260_s2 + $0x30] sm:$0xf]  ;;  %v3240_v58 = vld [vmem:[%s5260_s2 + $0x34] sm:$0xf0] }
 0x396   : > { %1916 = vmatpush.bf16.msrb.mxu2 %v2908_v55  ;;  %v2889_v55 = vld [vmem:[%s5260_s2 + $0x28] sm:$0xf0] }
 0x397   : > { %1877 = vmatpush.bf16.msrb.mxu0 %v2912_v24  ;;  %v2896_v24 = vor.u32 %v3240_v58, %v2895_v1  ;;  %v4624_v1 = vpop.xlane.xlu1 %1466 }
 0x39a   : > { %1917 = vmatpush.bf16.msrb.mxu2 %v2900_v30  ;;  %v3235_v30 = vld [vmem:[%s5260_s2 + $0x14] sm:$0xf] }
 0x39b   : > { %1878 = vmatpush.bf16.msrb.mxu0 %v2904_v8  ;;  %v3237_v8 = vld [vmem:[%s5260_s2 + $0x24] sm:$0xf] }
 0x39c   : > { %v2892_v58 = vor.u32 %v3237_v8, %v2889_v55  ;;  %v2884_v8 = vor.u32 %v3235_v30, %v2881_v47  ;;  %v2871_v55 = vld [vmem:[%s5260_s2] sm:$0xf]  ;;  %v2873_v30 = vld [vmem:[%s5260_s2 + $0x8] sm:$0xf0] }
 0x39e   : > { %1918 = vmatpush.bf16.msrb.mxu2 %v2892_v58  ;;  %v3234_v58 = vld [vmem:[%s5260_s2 + $0x4] sm:$0xf0] }
 0x39f   : > { %1879 = vmatpush.bf16.msrb.mxu0 %v2896_v24  ;;  %v2879_v24 = vld [vmem:[%s5260_s2 + $0x10] sm:$0xf]  ;;  %v4652_v47 = vpop.xlane.xlu1 %1356 }
 0x3a0   : > { %v2880_v2 = vor.u32 %v3236_v21, %v2879_v24  ;;  %v3233_v24 = vld [vmem:[%s5260_s2 + $0x4] sm:$0xf]  ;;  %v2872_v21 = vor.u32 %v3234_v58, %v2871_v55  ;;  %v2991_v55 = vld [vmem:[%s5260_s2 + $0xf0] sm:$0xf]  ;;  %v3264_v58 = vld [vmem:[%s5260_s2 + $0xf4] sm:$0xf0] }
 0x3a1   : > { %v2992_v52 = vor.u32 %v3264_v58, %v2991_v55  ;;  %v3261_v55 = vld [vmem:[%s5260_s2 + $0xe4] sm:$0xf]  ;;  %v3397_v58 = vpop.eup %3396 }
 0x3a2   : > { %1919 = vmatpush.bf16.msrb.mxu2 %v2884_v8  ;;  %v1176_v15 = vmul.f32 %v3397_v58, %v4377_v22 }
 0x3a3   : > { %1880 = vmatpush.bf16.msrb.mxu0 %v2888_v45  ;;  %1894 = vmatpush.bf16.msrb.mxu1 %v2992_v52 }
 0x3a5   : > { %v1203_v12 = vpop.xlane.xlu0 %1202 }
 0x3a6   : > { %3398 = vrcp.f32 %v1203_v12  ;;  %v2993_v12 = vld [vmem:[%s5260_s2 + $0xf8] sm:$0xf0] }
 0x3a7   : > { %1881 = vmatpush.bf16.msrb.mxu0 %v2880_v2  ;;  %v2876_v2 = vor.u32 %v3233_v24, %v2873_v30  ;;  %v1206_v14 = vpop.xlane.xlu1 %1205  ;;  %v3263_v24 = vld [vmem:[%s5260_s2 + $0xf4] sm:$0xf] }
 0x3a8   : > { %v2996_v30 = vor.u32 %v3263_v24, %v2993_v12 }
 0x3a9   : > { %1920 = vmatpush.bf16.msrb.mxu2 %v2876_v2 }
 0x3aa   : > { %v1236_v31 = vpop.xlane.xlu2 %1235  ;;  %1932 = vmatpush.bf16.msrb.mxu3 %v2996_v30 }
 0x3ab   : > { %1882 = vmatpush.bf16.msrb.mxu0 %v2872_v21  ;;  %3400 = vrcp.f32 %v1236_v31  ;;  %v3262_v31 = vld [vmem:[%s5260_s2 + $0xe4] sm:$0xf0] }
 0x3ac   : > { %3402 = vrcp.f32 %v1206_v14  ;;  %v2984_v14 = vor.u32 %v3262_v31, %v2983_v29  ;;  %v3399_v24 = vpop.eup %3398  ;;  %v3260_v29 = vld [vmem:[%s5260_s2 + $0xd4] sm:$0xf0] }
 0x3ad   : > { %v4638_v45 = vpop.xlane.xlu0 %1498  ;;  %3404 = vrcp.f32 %v4515_v37  ;;  %v2985_v37 = vld [vmem:[%s5260_s2 + $0xe8] sm:$0xf0]  ;;  %v1209_v31 = vmul.f32 %v3399_v24, %v4341_v48 }
 0x3ae   : > { %v2988_v52 = vor.u32 %v3261_v55, %v2985_v37  ;;  %1895 = vmatpush.bf16.msrb.mxu1 %v2984_v14  ;;  %v2976_v55 = vor.u32 %v3260_v29, %v2975_v28  ;;  %v2977_v14 = vld [vmem:[%s5260_s2 + $0xd8] sm:$0xf0]  ;;  %v2967_v29 = vld [vmem:[%s5260_s2 + $0xc0] sm:$0xf] }
 0x3b0   : > { %1933 = vmatpush.bf16.msrb.mxu3 %v2988_v52  ;;  %v1102_v52 = vpop.f32.mrf.mxu0 }
 0x3b1   : > { %v3401_v12 = vpop.eup %3400  ;;  %v4715_v5 = vadd.f32 %v1116_v27, %v1102_v52 }
 0x3b2   : > { %v4654_v8 = vpop.xlane.xlu2 %1530  ;;  %v3403_v30 = vpop.eup %3402  ;;  %v1242_v26 = vmul.f32 %v3401_v12, %v4339_v44  ;;  %1896 = vmatpush.bf16.msrb.mxu1 %v2976_v55  ;;  %v3258_v44 = vld [vmem:[%s5260_s2 + $0xc4] sm:$0xf0]  ;;  %v1178_v12 = vmul.f32 %v1176_v15, %v4701_v32 }
 0x3b3   : > { %v3405_v37 = vpop.eup %3404  ;;  %v1210_v48 = vmul.f32 %v3403_v30, %v4422_v25  ;;  %v1211_v25 = vmul.f32 %v1209_v31, %v4701_v32  ;;  %v2959_v31 = vld [vmem:[%s5260_s2 + $0xb0] sm:$0xf] }
 0x3b4   : > { %v1177_v22 = vmul.f32 %v3405_v37, %v4462_v19  ;;  %v2961_v37 = vld [vmem:[%s5260_s2 + $0xb8] sm:$0xf0] }
 0x3b5   : > { %v4656_v16 = vpop.xlane.xlu0 %1388  ;;  %v1399_v55 = vsel %vm1155_vm10, %v1178_v12, %v1211_v25  ;;  %v3253_v25 = vld [vmem:[%s5260_s2 + $0xa4] sm:$0xf] }
 0x3b6   : > { %v1179_v15 = vmul.f32 %v1177_v22, %v4715_v5  ;;  %v3254_v22 = vld [vmem:[%s5260_s2 + $0xa4] sm:$0xf0] }
 0x3ba   : > { %v4668_v21 = vpop.xlane.xlu2 %1324 }
 0x3bd   : > { %v1239_v2 = vpop.xlane.xlu0 %1238 }
 0x3be   : > { %3406 = vrcp.f32 %v1239_v2  ;;  %v3259_v2 = vld [vmem:[%s5260_s2 + $0xd4] sm:$0xf] }
 0x3bf   : > { %3408 = vrcp.f32 %v4586_v35  ;;  %v2980_v18 = vor.u32 %v3259_v2, %v2977_v14  ;;  %v1212_v2 = vmul.f32 %v1210_v48, %v4715_v5 }
 0x3c1   : > { %1934 = vmatpush.bf16.msrb.mxu3 %v2980_v18  ;;  %v1244_v18 = vmul.f32 %v1242_v26, %v4701_v32  ;;  %v3256_v26 = vld [vmem:[%s5260_s2 + $0xb4] sm:$0xf0] }
 0x3c2   : > { %v1272_v35 = vpop.xlane.xlu2 %1271  ;;  %v2960_v14 = vor.u32 %v3256_v26, %v2959_v31  ;;  %v2945_v26 = vld [vmem:[%s5260_s2 + $0x98] sm:$0xf0] }
 0x3c3   : > { %3410 = vrcp.f32 %v1272_v35  ;;  %v1402_v52 = vsel %vm1401_vm11, %v1399_v55, %v1244_v18  ;;  %v3250_v55 = vld [vmem:[%s5260_s2 + $0x84] sm:$0xf0] }
 0x3c4   : > { %v3407_v50 = vpop.eup %3406  ;;  %3412 = vrcp.f32 %v4477_v51 }
 0x3c5   : > { %v3409_v28 = vpop.eup %3408  ;;  %v1243_v24 = vmul.f32 %v3407_v50, %v4427_v33  ;;  %v2968_v33 = vor.u32 %v3258_v44, %v2967_v29  ;;  %v2969_v50 = vld [vmem:[%s5260_s2 + $0xc8] sm:$0xf0]  ;;  %v1400_v44 = vsel %vm1155_vm10, %v1179_v15, %v1212_v2  ;;  %v2943_v2 = vld [vmem:[%s5260_s2 + $0x90] sm:$0xf]  ;;  %3414 = vrcp.f32 %v4492_v3 }
 0x3c6   : > { %v2972_v58 = vor.u32 %v3257_v4, %v2969_v50  ;;  %v1275_v30 = vmul.f32 %v3409_v28, %v4349_v54  ;;  %v3255_v54 = vld [vmem:[%s5260_s2 + $0xb4] sm:$0xf]  ;;  %v2951_v4 = vld [vmem:[%s5260_s2 + $0xa0] sm:$0xf]  ;;  %3416 = vrcp.f32 %v4668_v21 }
 0x3c7   : > { %1897 = vmatpush.bf16.msrb.mxu1 %v2968_v33  ;;  %v1245_v19 = vmul.f32 %v1243_v24, %v4715_v5  ;;  %v2964_v48 = vor.u32 %v3255_v54, %v2961_v37  ;;  %v4744_v24 = vpop.xlane.xlu1 %1501  ;;  %v2952_v18 = vor.u32 %v3254_v22, %v2951_v4  ;;  %3418 = vrcp.f32 %v4560_v11  ;;  %v1142_v4 = vpop.f32.mrf.mxu3 }
 0x3c8   : > { %1935 = vmatpush.bf16.msrb.mxu3 %v2972_v58  ;;  %v1277_v28 = vmul.f32 %v1275_v30, %v4701_v32  ;;  %v2953_v58 = vld [vmem:[%s5260_s2 + $0xa8] sm:$0xf0]  ;;  %3420 = vrcp.f32 %v4521_v23 }
 0x3c9   : > { %v3411_v27 = vpop.eup %3410  ;;  %v2956_v30 = vor.u32 %v3253_v25, %v2953_v58  ;;  %3422 = vrcp.f32 %v4624_v1 }
 0x3ca   : > { %v1276_v35 = vmul.f32 %v3411_v27, %v4440_v36  ;;  %v1403_v36 = vsel %vm1401_vm11, %v1400_v44, %v1245_v19  ;;  %v1405_v33 = vsel %vm1404_vm12, %v1402_v52, %v1277_v28  ;;  %v3252_v27 = vld [vmem:[%s5260_s2 + $0x94] sm:$0xf0]  ;;  %v3251_v19 = vld [vmem:[%s5260_s2 + $0x94] sm:$0xf]  ;;  %v1470_v15 = vpop.xlane.xlu2 %1469  ;;  %v3413_v22 = vpop.eup %3412  ;;  %3424 = vrcp.f32 %v4652_v47 }
 0x3cb   : > { %1898 = vmatpush.bf16.msrb.mxu1 %v2960_v14  ;;  %v2944_v31 = vor.u32 %v3252_v27, %v2943_v2  ;;  %v2948_v54 = vor.u32 %v3251_v19, %v2945_v26  ;;  %v3249_v14 = vld [vmem:[%s5260_s2 + $0x84] sm:$0xf]  ;;  %v3415_v25 = vpop.eup %3414  ;;  %3426 = vrcp.f32 %v4656_v16 }
 0x3cc   : > { %v1278_v29 = vmul.f32 %v1276_v35, %v4715_v5  ;;  %1936 = vmatpush.bf16.msrb.mxu3 %v2964_v48  ;;  %v2935_v35 = vld [vmem:[%s5260_s2 + $0x80] sm:$0xf]  ;;  %v2937_v48 = vld [vmem:[%s5260_s2 + $0x88] sm:$0xf0]  ;;  %v3417_v51 = vpop.eup %3416  ;;  %3428 = vrcp.f32 %v1470_v15  ;;  %v1299_v58 = vmul.f32 %v3415_v25, %v4391_v39 }
 0x3cd   : > { %v2936_v52 = vor.u32 %v3250_v55, %v2935_v35  ;;  %v2940_v28 = vor.u32 %v3249_v14, %v2937_v48  ;;  %v3419_v3 = vpop.eup %3418  ;;  %v1331_v23 = vmul.f32 %v3417_v51, %v4396_v49 }
 0x3ce   : > { %v1406_v50 = vsel %vm1404_vm12, %v1403_v36, %v1278_v29  ;;  %v1128_v36 = vpop.f32.mrf.mxu2  ;;  %v3421_v21 = vpop.eup %3420 }
 0x3cf   : > { %v1705_v12 = vpack.c.bf16 %v1406_v50, %v1405_v33  ;;  %1899 = vmatpush.bf16.msrb.mxu1 %v2952_v18  ;;  %v4784_v37 = vpop.xlane.xlu1 %1554  ;;  %v3423_v11 = vpop.eup %3422  ;;  %v4803_v16 = vadd.f32 %v1142_v4, %v1128_v36  ;;  %v1442_v36 = vmul.f32 %v3421_v21, %v4459_v7 }
 0x3d0   : > { %1937 = vmatpush.bf16.msrb.mxu3 %v2956_v30  ;;  %v3425_v50 = vpop.eup %3424  ;;  %v1144_v27 = vpop.f32.mrf.mxu3 }
 0x3d1   : > { %1883 = vmatmul.bf16.vlgmr.msrb.gmra.mxu0 %v1705_v12  ;;  %1921 = vmatmul.bf16.vlgmr.msrb.gmra.mxu2 %v1705_v12  ;;  %v3427_v47 = vpop.eup %3426  ;;  %v1333_v49 = vmul.f32 %v1331_v23, %v4803_v16  ;;  %v1363_v19 = vmul.f32 %v3425_v50, %v4402_v53  ;;  %v1301_v26 = vmul.f32 %v1299_v58, %v4803_v16 }
 0x3d2   : > { %v1360_v29 = vpop.xlane.xlu2 %1359  ;;  %v3429_v12 = vpop.eup %3428 }
 0x3d3   : > { %1900 = vmatpush.bf16.msrb.mxu1 %v2944_v31  ;;  %3430 = vrcp.f32 %v1360_v29  ;;  %v1365_v29 = vmul.f32 %v1363_v19, %v4803_v16 }
 0x3d4   : > { %1938 = vmatpush.bf16.msrb.mxu3 %v2948_v54  ;;  %v1300_v54 = vmul.f32 %v3419_v3, %v4455_v57  ;;  %v1473_v57 = vmul.f32 %v3423_v11, %v4358_v61  ;;  %v1444_v11 = vmul.f32 %v1442_v36, %v4715_v5 }
 0x3d6   : > { %v1130_v2 = vpop.f32.mrf.mxu2  ;;  %v1475_v7 = vmul.f32 %v1473_v57, %v4701_v32 }
 0x3d7   : > { %1901 = vmatpush.bf16.msrb.mxu1 %v2936_v52  ;;  %v4812_v39 = vadd.f32 %v1144_v27, %v1130_v2 }
 0x3d8   : > { %1939 = vmatpush.bf16.msrb.mxu3 %v2940_v28  ;;  %v1407_v28 = vsel %vm1155_vm10, %v1301_v26, %v1333_v49 }
 0x3d9   : > { %v3431_v30 = vpop.eup %3430  ;;  %v1409_v61 = vsel %vm1401_vm11, %v1407_v28, %v1365_v29 }
 0x3da   : > { %v4801_v18 = vpop.xlane.xlu2 %1557  ;;  %v1364_v35 = vmul.f32 %v3431_v30, %v4418_v20  ;;  %v1302_v20 = vmul.f32 %v1300_v54, %v4812_v39 }
 0x3dc   : > { %v1366_v4 = vmul.f32 %v1364_v35, %v4812_v39 }
 0x3de   : > { %v1392_v44 = vpop.xlane.xlu1 %1391 }
 0x3df   : > { %3432 = vrcp.f32 %v1392_v44 }
 0x3e0   : > { %3434 = vrcp.f32 %v4638_v45 }
 0x3e2   : > { %v1619_v25 = vpop.xlane.xlu2 %1618 }
 0x3e5   : > { %v3433_v45 = vpop.eup %3432 }
 0x3e6   : > { %v4797_v33 = vpop.xlane.xlu1 %1589  ;;  %v3435_v31 = vpop.eup %3434  ;;  %v1396_v52 = vmul.f32 %v3433_v45, %v4479_v59 }
 0x3e7   : > { %v1328_v1 = vpop.xlane.xlu0 %1327  ;;  %v1505_v59 = vmul.f32 %v3435_v31, %v4351_v56 }
 0x3e8   : > { %3436 = vrcp.f32 %v1328_v1 }
 0x3e9   : > { %3438 = vrcp.f32 %v4654_v8  ;;  %v1395_v8 = vmul.f32 %v3427_v47, %v4367_v10  ;;  %v1441_v10 = vmul.f32 %v3413_v22, %v4381_v9  ;;  %v1398_v9 = vmul.f32 %v1396_v52, %v4812_v39 }
 0x3ea   : > { %3440 = vrcp.f32 %v4744_v24  ;;  %v1474_v24 = vmul.f32 %v3429_v12, %v4448_v40  ;;  %v1507_v12 = vmul.f32 %v1505_v59, %v4701_v32 }
 0x3eb   : > { %v1397_v51 = vmul.f32 %v1395_v8, %v4803_v16 }
 0x3ec   : > { %v1476_v3 = vmul.f32 %v1474_v24, %v4715_v5 }
 0x3ed   : > { %v1411_v23 = vsel %vm1404_vm12, %v1409_v61, %v1397_v51 }
 0x3ee   : > { %v3437_v15 = vpop.eup %3436  ;;  %v1651_v55 = vpop.xlane.xlu1 %1650  ;;  %v1662_v49 = vsel %vm1155_vm10, %v1444_v11, %v1476_v3 }
 0x3ef   : > { %v3439_v14 = vpop.eup %3438  ;;  %v1332_v53 = vmul.f32 %v3437_v15, %v4472_v41  ;;  %v1534_v48 = vpop.xlane.xlu0 %1533 }
 0x3f0   : > { %3442 = vrcp.f32 %v1534_v48  ;;  %v3441_v44 = vpop.eup %3440  ;;  %v1537_v41 = vmul.f32 %v3439_v14, %v4360_v63  ;;  %v1443_v63 = vmul.f32 %v1441_v10, %v4701_v32  ;;  %v1654_v19 = vpop.xlane.xlu2 %1653 }
 0x3f1   : > { %v1334_v40 = vmul.f32 %v1332_v53, %v4812_v39  ;;  %v1506_v21 = vmul.f32 %v3441_v44, %v4436_v34  ;;  %3444 = vrcp.f32 %v4784_v37 }
 0x3f2   : > { %v1539_v30 = vmul.f32 %v1537_v41, %v4701_v32  ;;  %3446 = vrcp.f32 %v4797_v33  ;;  %v1661_v45 = vsel %vm1155_vm10, %v1443_v63, %v1475_v7  ;;  %v5293_v41 = vld [vmem:[#allocation13_spill] sm:$0xff] }
 0x3f3   : > { %v1408_v22 = vsel %vm1155_vm10, %v1302_v20, %v1334_v40  ;;  %v1508_v37 = vmul.f32 %v1506_v21, %v4715_v5  ;;  %v1663_v31 = vsel %vm1401_vm11, %v1661_v45, %v1507_v12  ;;  %v5296_v21 = vld [vmem:[#allocation15_spill] sm:$0xff] }
 0x3f4   : > { %v1410_v56 = vsel %vm1401_vm11, %v1408_v22, %v1366_v4  ;;  %v1665_v54 = vsel %vm1404_vm12, %v1663_v31, %v1539_v30 }
 0x3f5   : > { %v1412_v1 = vsel %vm1404_vm12, %v1410_v56, %v1398_v9  ;;  %v1664_v26 = vsel %vm1401_vm11, %v1662_v49, %v1508_v37 }
 0x3f6   : > { %v3443_v50 = vpop.eup %3442  ;;  %v276_v47 = vpop.xlane.xlu1 %275  ;;  %v1706_v58 = vpack.c.bf16 %v1412_v1, %v1411_v23 }
 0x3f7   : > { %v1538_v34 = vmul.f32 %v3443_v50, %v4444_v38  ;;  %v287_v2 = vmul.f32 %v3707_v6, %v276_v47  ;;  %v1587_v27 = vpop.xlane.xlu0 %1586 }
 0x3f8   : > { %3448 = vrcp.f32 %v1587_v27  ;;  %1902 = vmatmul.bf16.vlgmr.msrb.gmra.mxu1 %v1706_v58  ;;  %1940 = vmatmul.bf16.vlgmr.msrb.gmra.mxu3 %v1706_v58 }
 0x3f9   : > { %3450 = vrcp.f32 %v4801_v18  ;;  %v4852_v32 = vsub.f32 %v4531_v60, %v287_v2  ;;  %v4855_v33 = vsub.f32 %v4534_v43, %v287_v2  ;;  %v1540_v38 = vmul.f32 %v1538_v34, %v4715_v5  ;;  %v3445_v43 = vpop.eup %3444 }
 0x3fa   : > { %3452 = vrcp.f32 %v1619_v25  ;;  %v3447_v5 = vpop.eup %3446  ;;  %v1561_v28 = vmul.f32 %v3445_v43, %v4499_v42  ;;  %v5294_v25 = vld [vmem:[#allocation12_spill] sm:$0xff] }
 0x3fb   : > { %v1666_v15 = vsel %vm1404_vm12, %v1664_v26, %v1540_v38  ;;  %v302_v18 = vmul.f32 %v4852_v32, %v4852_v32  ;;  %v303_v60 = vmul.f32 %v4855_v33, %v4855_v33  ;;  %3454 = vrcp.f32 %v1651_v55 }
 0x3fc   : > { %v1707_v8 = vpack.c.bf16 %v1666_v15, %v1665_v54  ;;  %3456 = vrcp.f32 %v1654_v19  ;;  %v1594_v57 = vmul.f32 %v3447_v5, %v4488_v0  ;;  %v1563_v36 = vmul.f32 %v1561_v28, %v4803_v16 }
 0x3fd   : > { %v313_v35 = vadd.f32 %v303_v60, %v302_v18 }
 0x3fe   : > { %v3449_v14 = vpop.eup %3448  ;;  %1888 = vmatmul.bf16.gmra.mxu0 %v1707_v8  ;;  %1926 = vmatmul.bf16.gmra.mxu2 %v1707_v8 }
 0x3ff   : > { %v3451_v24 = vpop.eup %3450  ;;  %v1593_v52 = vmul.f32 %v3449_v14, %v4407_v62  ;;  %v1622_v53 = vpop.xlane.xlu0 %1621  ;;  %314 = vadd.xlane.f32.xlu0 %v313_v35  ;;  %v1596_v62 = vmul.f32 %v1594_v57, %v4812_v39  ;;  %v5297_v35 = vld [vmem:[#allocation8_spill] sm:$0xff] }
 0x400   : > { %v3453_v48 = vpop.eup %3452  ;;  %3458 = vrcp.f32 %v1622_v53  ;;  %v1562_v10 = vmul.f32 %v3451_v24, %v4517_v46  ;;  %v5298_v24 = vld [vmem:[#allocation9_spill] sm:$0xff] }
 0x401   : > { %v3455_v29 = vpop.eup %3454  ;;  %v1595_v55 = vmul.f32 %v1593_v52, %v4803_v16  ;;  %v1625_v20 = vmul.f32 %v3453_v48, %v4371_v13 }
 0x402   : > { %v3457_v44 = vpop.eup %3456  ;;  %v1657_v59 = vmul.f32 %v3455_v29, %v4413_v17  ;;  %v1564_v0 = vmul.f32 %v1562_v10, %v4812_v39  ;;  %v5295_v17 = vld [vmem:[#allocation14_spill] sm:$0xff] }
 0x403   : > { %v1658_v42 = vmul.f32 %v3457_v44, %v5293_v41  ;;  %v1667_v4 = vsel %vm1155_vm10, %v1563_v36, %v1595_v55  ;;  %v1627_v46 = vmul.f32 %v1625_v20, %v4803_v16 }
 0x404   : > { %v1668_v9 = vsel %vm1155_vm10, %v1564_v0, %v1596_v62  ;;  %v1659_v63 = vmul.f32 %v1657_v59, %v4803_v16  ;;  %v4902_v16 = vld [vmem:[%s5262_s4] sm:$0xff]  ;;  %v5299_v59 = vld [vmem:[#allocation10_spill] sm:$0xff] }
 0x405   : > { %v1669_v22 = vsel %vm1401_vm11, %v1667_v4, %v1627_v46  ;;  %v1660_v11 = vmul.f32 %v1658_v42, %v4812_v39  ;;  %v1710_v34 = vperm.slane %v4902_v16, 6  ;;  %v5300_v42 = vld [vmem:[#allocation11_spill] sm:$0xff] }
 0x406   : > { %v3459_v40 = vpop.eup %3458  ;;  %v1671_v1 = vsel %vm1404_vm12, %v1669_v22, %v1659_v63 }
 0x407   : > { %v1626_v61 = vmul.f32 %v3459_v40, %v5294_v25  ;;  %v273_v51 = vpop.xlane.xlu0 %272  ;;  %v4909_v31 = vperm.slane %v1710_v34, 2 }
 0x408   : > { %v286_v13 = vmul.f32 %v3707_v6, %v273_v51 }
 0x409   : > { %v1628_v3 = vmul.f32 %v1626_v61, %v4812_v39  ;;  %v1709_v39 = vperm.slane %v4902_v16, 2 }
 0x40a   : > { %v4885_v7 = vsub.f32 %v5295_v17, %v286_v13  ;;  %v4888_v56 = vsub.f32 %v5296_v21, %v286_v13 }
 0x40b   : > { %v1670_v23 = vsel %vm1401_vm11, %v1668_v9, %v1628_v3  ;;  %v4907_v37 = vperm.slane %v1709_v39, 2 }
 0x40c   : > { %v1672_v50 = vsel %vm1404_vm12, %v1670_v23, %v1660_v11  ;;  %v300_v47 = vmul.f32 %v4885_v7, %v4885_v7  ;;  %v301_v58 = vmul.f32 %v4888_v56, %v4888_v56 }
 0x40d   : > { %v1708_v12 = vpack.c.bf16 %v1672_v50, %v1671_v1 }
 0x40e   : > { %v310_v30 = vadd.f32 %v301_v58, %v300_v47 }
 0x40f   : > { %1907 = vmatmul.bf16.gmra.mxu1 %v1708_v12  ;;  %1945 = vmatmul.bf16.gmra.mxu3 %v1708_v12  ;;  %v5301_v12 = vld [vmem:[#allocation4_spill] sm:$0xff] }
 0x410   : > { %311 = vadd.xlane.f32.xlu2 %v310_v30 }
 0x44e   : > { %v1884_v27 = vpop.f32.mrf.mxu0 }
 0x44f   : > { %v1885_v26 = vadd.f32 %v1884_v27, %v4907_v37 }
 0x454   : > { %v1922_v45 = vpop.f32.mrf.mxu2 }
 0x455   : > { %v1923_v54 = vadd.f32 %v1922_v45, %v4909_v31 }
 0x456   : > { %v1886_v8 = vpop.f32.mrf.mxu0 }
 0x457   : > { %v1887_v28 = vadd.f32 %v1886_v8, %v4907_v37 }
 0x45c   : > { %v1924_v53 = vpop.f32.mrf.mxu2 }
 0x45d   : > { %v1925_v55 = vadd.f32 %v1924_v53, %v4909_v31 }
 0x472   : > { %v315_v2 = vpop.xlane.xlu0 %314 }
 0x473   : > { %v319_v49 = vmul.f32 %v315_v2, %v3707_v6  ;;  %v5302_v2 = vld [vmem:[#allocation5_spill] sm:$0xff] }
 0x475   : > { %v323_v38 = vadd.f32 1e-06, %v319_v49  ;;  %v1903_v19 = vpop.f32.mrf.mxu1 }
 0x476   : > { %v1904_v15 = vadd.f32 %v1903_v19, %v1885_v26 }
 0x477   : > { %3460 = vrsqrt.f32 %v323_v38  ;;  %vm360_vm13 = vweird.f32 %v323_v38 }
 0x478   : > { %v4914_v14 = vadd.f32 %v1904_v15, %v5297_v35 }
 0x47b   : > { %v1941_v18 = vpop.f32.mrf.mxu3  ;;  %v1889_v51 = vpop.f32.mrf.mxu0 }
 0x47c   : > { %v1942_v60 = vadd.f32 %v1941_v18, %v1923_v54  ;;  %v5304_v18 = vld [vmem:[#allocation7_spill] sm:$0xff]  ;;  %v1890_v8 = vadd.f32 %v1889_v51, %v4907_v37 }
 0x47d   : > { %v3461_v43 = vpop.eup %3460  ;;  %v1905_v48 = vpop.f32.mrf.mxu1 }
 0x47e   : > { %v355_v5 = vmul.f32 %v3461_v43, %v323_v38  ;;  %v4917_v52 = vadd.f32 %v1942_v60, %v5298_v24  ;;  %v1906_v44 = vadd.f32 %v1905_v48, %v1887_v28  ;;  %vm361_vm14 = vweird.f32 %v3461_v43 }
 0x47f   : > { %vm362_vm15 = vmor %vm360_vm13, %vm361_vm14 }
 0x480   : > { %v356_v57 = vmul.f32 %v3461_v43, %v355_v5  ;;  %v1959_v29 = vadd.f32 %v4917_v52, %v4914_v14  ;;  %v4925_v41 = vadd.f32 %v1906_v44, %v5299_v59 }
 0x481   : > { %v1927_v13 = vpop.f32.mrf.mxu2 }
 0x482   : > { %1960 = vadd.xlane.f32.xlu1 %v1959_v29  ;;  %v357_v10 = vmul.f32 0.5, %v356_v57  ;;  %v1928_v5 = vadd.f32 %v1927_v13, %v4909_v31 }
 0x483   : > { %v1943_v20 = vpop.f32.mrf.mxu3  ;;  %v312_v62 = vpop.xlane.xlu2 %311 }
 0x484   : > { %v1944_v36 = vadd.f32 %v1943_v20, %v1925_v55  ;;  %v318_v40 = vmul.f32 %v312_v62, %v3707_v6  ;;  %v358_v0 = vsub.f32 1.5, %v357_v10  ;;  %v1891_v1 = vpop.f32.mrf.mxu0 }
 0x485   : > { %v1892_v34 = vadd.f32 %v1891_v1, %v4907_v37 }
 0x486   : > { %v4928_v4 = vadd.f32 %v1944_v36, %v5300_v42  ;;  %v322_v25 = vadd.f32 1e-06, %v318_v40  ;;  %v359_v46 = vmul.f32 %v3461_v43, %v358_v0 }
 0x488   : > { %v1962_v61 = vadd.f32 %v4928_v4, %v4925_v41  ;;  %3462 = vrsqrt.f32 %v322_v25  ;;  %v363_v22 = vsel %vm362_vm15, %v3461_v43, %v359_v46  ;;  %vm350_vm1 = vweird.f32 %v322_v25 }
 0x489   : > { %v370_v11 = vmul.f32 %v363_v22, %v4852_v32  ;;  %v371_v23 = vmul.f32 %v363_v22, %v4855_v33  ;;  %v1929_v58 = vpop.f32.mrf.mxu2  ;;  %v5303_v33 = vld [vmem:[#allocation6_spill] sm:$0xff] }
 0x48a   : > { %1963 = vadd.xlane.f32.xlu2 %v1962_v61  ;;  %v1930_v45 = vadd.f32 %v1929_v58, %v4909_v31  ;;  %v3280_v58 = vld [vmem:[%s5261_s3 + $0x74] sm:$0xf0] }
 0x48b   : > { %v385_v30 = vmul.f32 %v5301_v12, %v370_v11  ;;  %v386_v27 = vmul.f32 %v5302_v2, %v371_v23 }
 0x48c   : > { %v1908_v3 = vpop.f32.mrf.mxu1 }
 0x48d   : > { %v399_v19 = vadd.f32 %v5303_v33, %v385_v30  ;;  %v400_v60 = vadd.f32 %v5304_v18, %v386_v27  ;;  %v1909_v28 = vadd.f32 %v1908_v3, %v1890_v8  ;;  %v3119_v30 = vld [vmem:[%s5261_s3 + $0xf0] sm:$0xf]  ;;  %v3279_v27 = vld [vmem:[%s5261_s3 + $0x74] sm:$0xf]  ;;  %v3294_v8 = vld [vmem:[%s5261_s3 + $0xe4] sm:$0xf0] }
 0x48e   : > { %v3463_v9 = vpop.eup %3462 }
 0x48f   : > { %v345_v17 = vmul.f32 %v3463_v9, %v322_v25  ;;  %vm351_vm0 = vweird.f32 %v3463_v9 }
 0x490   : > { %vm352_vm2 = vmor %vm350_vm1, %vm351_vm0 }
 0x491   : > { %v346_v21 = vmul.f32 %v3463_v9, %v345_v17 }
 0x492   : > { %v1946_v63 = vpop.f32.mrf.mxu3 }
 0x493   : > { %v347_v50 = vmul.f32 0.5, %v346_v21  ;;  %v1947_v29 = vadd.f32 %v1946_v63, %v1928_v5  ;;  %v3277_v5 = vld [vmem:[%s5261_s3 + $0x64] sm:$0xf] }
 0x494   : > { %v1910_v39 = vpop.f32.mrf.mxu1 }
 0x495   : > { %v348_v47 = vsub.f32 1.5, %v347_v50  ;;  %v1911_v32 = vadd.f32 %v1910_v39, %v1892_v34  ;;  %v3296_v34 = vld [vmem:[%s5261_s3 + $0xf4] sm:$0xf0] }
 0x497   : > { %v349_v49 = vmul.f32 %v3463_v9, %v348_v47  ;;  %v1957_v53 = vadd.f32 %v1911_v32, %v399_v19  ;;  %v3055_v47 = vld [vmem:[%s5261_s3 + $0x70] sm:$0xf]  ;;  %v3121_v19 = vld [vmem:[%s5261_s3 + $0xf8] sm:$0xf0] }
 0x498   : > { %v3056_v39 = vor.u32 %v3280_v58, %v3055_v47  ;;  %v3087_v47 = vld [vmem:[%s5261_s3 + $0xb0] sm:$0xf] }
 0x499   : > { %v353_v38 = vsel %vm352_vm2, %v3463_v9, %v349_v49  ;;  %v3057_v49 = vld [vmem:[%s5261_s3 + $0x78] sm:$0xf0] }
 0x49a   : > { %v1948_v26 = vpop.f32.mrf.mxu3  ;;  %v368_v54 = vmul.f32 %v353_v38, %v4885_v7  ;;  %v369_v15 = vmul.f32 %v353_v38, %v4888_v56  ;;  %v3060_v32 = vor.u32 %v3279_v27, %v3057_v49  ;;  %v3295_v38 = vld [vmem:[%s5261_s3 + $0xf4] sm:$0xf]  ;;  %2277 = vmatpush.bf16.msra.mxu0 %v3056_v39 }
 0x49b   : > { %v1949_v43 = vadd.f32 %v1948_v26, %v1930_v45  ;;  %v3120_v45 = vor.u32 %v3296_v34, %v3119_v30  ;;  %v3124_v26 = vor.u32 %v3295_v38, %v3121_v19  ;;  %v3288_v30 = vld [vmem:[%s5261_s3 + $0xb4] sm:$0xf0]  ;;  %v3271_v39 = vld [vmem:[%s5261_s3 + $0x34] sm:$0xf]  ;;  %v3025_v34 = vld [vmem:[%s5261_s3 + $0x38] sm:$0xf0] }
 0x49c   : > { %v383_v35 = vmul.f32 %v5301_v12, %v368_v54  ;;  %v384_v24 = vmul.f32 %v5302_v2, %v369_v15  ;;  %2315 = vmatpush.bf16.msra.mxu2 %v3060_v32  ;;  %v3047_v54 = vld [vmem:[%s5261_s3 + $0x60] sm:$0xf]  ;;  %v3278_v15 = vld [vmem:[%s5261_s3 + $0x64] sm:$0xf0]  ;;  %v3088_v27 = vor.u32 %v3288_v30, %v3087_v47  ;;  %v3028_v49 = vor.u32 %v3271_v39, %v3025_v34  ;;  %v3089_v32 = vld [vmem:[%s5261_s3 + $0xb8] sm:$0xf0] }
 0x49d   : > { %v1958_v48 = vadd.f32 %v1949_v43, %v400_v60  ;;  %2296 = vmatpush.bf16.msra.mxu1 %v3120_v45  ;;  %v3111_v60 = vld [vmem:[%s5261_s3 + $0xe0] sm:$0xf]  ;;  %2334 = vmatpush.bf16.msra.mxu3 %v3124_v26  ;;  %v3048_v43 = vor.u32 %v3278_v15, %v3047_v54  ;;  %v3287_v45 = vld [vmem:[%s5261_s3 + $0xb4] sm:$0xf]  ;;  %v3270_v26 = vld [vmem:[%s5261_s3 + $0x24] sm:$0xf0] }
 0x49e   : > { %v397_v57 = vadd.f32 %v5303_v33, %v383_v35  ;;  %v398_v7 = vadd.f32 %v5304_v18, %v384_v24  ;;  %v3049_v35 = vld [vmem:[%s5261_s3 + $0x68] sm:$0xf0]  ;;  %v3112_v24 = vor.u32 %v3294_v8, %v3111_v60  ;;  %v3092_v38 = vor.u32 %v3287_v45, %v3089_v32  ;;  %v3015_v19 = vld [vmem:[%s5261_s3 + $0x20] sm:$0xf]  ;;  %v3286_v60 = vld [vmem:[%s5261_s3 + $0xa4] sm:$0xf0] }
 0x49f   : > { %v1968_v56 = vadd.f32 %v1958_v48, %v1957_v53  ;;  %2278 = vmatpush.bf16.msra.mxu0 %v3048_v43  ;;  %v3079_v54 = vld [vmem:[%s5261_s3 + $0xa0] sm:$0xf]  ;;  %v3016_v15 = vor.u32 %v3270_v26, %v3015_v19  ;;  %v3269_v43 = vld [vmem:[%s5261_s3 + $0x24] sm:$0xf]  ;;  %v3017_v8 = vld [vmem:[%s5261_s3 + $0x28] sm:$0xf0] }
 0x4a0   : > { %v1955_v55 = vadd.f32 %v1909_v28, %v397_v57  ;;  %v1956_v44 = vadd.f32 %v1947_v29, %v398_v7  ;;  %v3113_v28 = vld [vmem:[%s5261_s3 + $0xe8] sm:$0xf0]  ;;  %v3039_v7 = vld [vmem:[%s5261_s3 + $0x50] sm:$0xf]  ;;  %v3276_v29 = vld [vmem:[%s5261_s3 + $0x54] sm:$0xf0] }
 0x4a1   : > { %1969 = vadd.xlane.f32.xlu1 %v1968_v56  ;;  %2297 = vmatpush.bf16.msra.mxu1 %v3112_v24  ;;  %v3103_v56 = vld [vmem:[%s5261_s3 + $0xd0] sm:$0xf]  ;;  %v3285_v24 = vld [vmem:[%s5261_s3 + $0xa4] sm:$0xf] }
 0x4a2   : > { %v1965_v10 = vadd.f32 %v1956_v44, %v1955_v55 }
 0x4a4   : > { %1966 = vadd.xlane.f32.xlu0 %v1965_v10  ;;  %v3275_v10 = vld [vmem:[%s5261_s3 + $0x54] sm:$0xf] }
 0x4f5   : > { %v1961_v37 = vpop.xlane.xlu1 %1960 }
 0x4f6   : > { %v1971_v31 = vmul.f32 %v1961_v37, %v3707_v6  ;;  %v3041_v37 = vld [vmem:[%s5261_s3 + $0x58] sm:$0xf0] }
 0x4f8   : > { %v4950_v20 = vsub.f32 %v4914_v14, %v1971_v31  ;;  %v4953_v36 = vsub.f32 %v4917_v52, %v1971_v31 }
 0x4fa   : > { %v1983_v62 = vmul.f32 %v4950_v20, %v4950_v20  ;;  %v1984_v40 = vmul.f32 %v4953_v36, %v4953_v36 }
 0x4fc   : > { %v1991_v59 = vadd.f32 %v1984_v40, %v1983_v62  ;;  %v3044_v62 = vor.u32 %v3275_v10, %v3041_v37  ;;  %v3291_v40 = vld [vmem:[%s5261_s3 + $0xd4] sm:$0xf]  ;;  %v3009_v37 = vld [vmem:[%s5261_s3 + $0x18] sm:$0xf0] }
 0x4fd   : > { %v1964_v42 = vpop.xlane.xlu2 %1963  ;;  %v3267_v10 = vld [vmem:[%s5261_s3 + $0x14] sm:$0xf] }
 0x4fe   : > { %v1972_v0 = vmul.f32 %v1964_v42, %v3707_v6  ;;  %1992 = vadd.xlane.f32.xlu2 %v1991_v59  ;;  %v3105_v59 = vld [vmem:[%s5261_s3 + $0xd8] sm:$0xf0] }
 0x4ff   : > { %v3108_v42 = vor.u32 %v3291_v40, %v3105_v59  ;;  %v3283_v40 = vld [vmem:[%s5261_s3 + $0x94] sm:$0xf]  ;;  %v3073_v59 = vld [vmem:[%s5261_s3 + $0x98] sm:$0xf0] }
 0x500   : > { %v4961_v25 = vsub.f32 %v4925_v41, %v1972_v0  ;;  %v4964_v14 = vsub.f32 %v4928_v4, %v1972_v0  ;;  %v3031_v0 = vld [vmem:[%s5261_s3 + $0x40] sm:$0xf] }
 0x502   : > { %v1985_v52 = vmul.f32 %v4961_v25, %v4961_v25  ;;  %v1986_v61 = vmul.f32 %v4964_v14, %v4964_v14 }
 0x504   : > { %v1994_v51 = vadd.f32 %v1986_v61, %v1985_v52  ;;  %v3274_v52 = vld [vmem:[%s5261_s3 + $0x44] sm:$0xf0]  ;;  %v3095_v61 = vld [vmem:[%s5261_s3 + $0xc0] sm:$0xf] }
 0x506   : > { %1995 = vadd.xlane.f32.xlu0 %v1994_v51  ;;  %v3032_v51 = vor.u32 %v3274_v52, %v3031_v0  ;;  %v3076_v0 = vor.u32 %v3283_v40, %v3073_v59  ;;  %v2999_v52 = vld [vmem:[%s5261_s3] sm:$0xf] }
 0x514   : > { %v1970_v46 = vpop.xlane.xlu1 %1969 }
 0x515   : > { %v1974_v13 = vmul.f32 %v1970_v46, %v3707_v6  ;;  %v3290_v46 = vld [vmem:[%s5261_s3 + $0xc4] sm:$0xf0] }
 0x517   : > { %v4971_v3 = vsub.f32 %v1957_v53, %v1974_v13  ;;  %v4973_v9 = vsub.f32 %v1958_v48, %v1974_v13  ;;  %v1967_v41 = vpop.xlane.xlu0 %1966  ;;  %v3052_v53 = vor.u32 %v3277_v5, %v3049_v35  ;;  %v3293_v48 = vld [vmem:[%s5261_s3 + $0xe4] sm:$0xf]  ;;  %v3080_v5 = vor.u32 %v3286_v60, %v3079_v54 }
 0x518   : > { %v1973_v22 = vmul.f32 %v1967_v41, %v3707_v6  ;;  %v3116_v57 = vor.u32 %v3293_v48, %v3113_v28  ;;  %v3273_v13 = vld [vmem:[%s5261_s3 + $0x44] sm:$0xf]  ;;  %v3033_v41 = vld [vmem:[%s5261_s3 + $0x48] sm:$0xf0]  ;;  %v3020_v35 = vor.u32 %v3269_v43, %v3017_v8 }
 0x519   : > { %v1989_v4 = vmul.f32 %v4971_v3, %v4971_v3  ;;  %v1990_v17 = vmul.f32 %v4973_v9, %v4973_v9  ;;  %2316 = vmatpush.bf16.msra.mxu2 %v3052_v53  ;;  %v3081_v53 = vld [vmem:[%s5261_s3 + $0xa8] sm:$0xf0] }
 0x51a   : > { %v4980_v21 = vsub.f32 %v1955_v55, %v1973_v22  ;;  %v4982_v63 = vsub.f32 %v1956_v44, %v1973_v22  ;;  %2335 = vmatpush.bf16.msra.mxu3 %v3116_v57  ;;  %v3040_v55 = vor.u32 %v3276_v29, %v3039_v7  ;;  %v3292_v44 = vld [vmem:[%s5261_s3 + $0xd4] sm:$0xf0]  ;;  %v3096_v22 = vor.u32 %v3290_v46, %v3095_v61  ;;  %v3007_v57 = vld [vmem:[%s5261_s3 + $0x10] sm:$0xf]  ;;  %v3266_v61 = vld [vmem:[%s5261_s3 + $0x4] sm:$0xf0] }
 0x51b   : > { %v2000_v11 = vadd.f32 %v1990_v17, %v1989_v4  ;;  %v3104_v31 = vor.u32 %v3292_v44, %v3103_v56  ;;  %v3036_v4 = vor.u32 %v3273_v13, %v3033_v41  ;;  %v3289_v17 = vld [vmem:[%s5261_s3 + $0xc4] sm:$0xf]  ;;  %v3084_v48 = vor.u32 %v3285_v24, %v3081_v53  ;;  %v3268_v7 = vld [vmem:[%s5261_s3 + $0x14] sm:$0xf0]  ;;  %v3071_v29 = vld [vmem:[%s5261_s3 + $0x90] sm:$0xf] }
 0x51c   : > { %v1987_v23 = vmul.f32 %v4980_v21, %v4980_v21  ;;  %v1988_v1 = vmul.f32 %v4982_v63, %v4982_v63  ;;  %2279 = vmatpush.bf16.msra.mxu0 %v3040_v55  ;;  %v3008_v55 = vor.u32 %v3268_v7, %v3007_v57  ;;  %v3284_v44 = vld [vmem:[%s5261_s3 + $0x94] sm:$0xf0]  ;;  %v3000_v46 = vor.u32 %v3266_v61, %v2999_v52  ;;  %v3282_v13 = vld [vmem:[%s5261_s3 + $0x84] sm:$0xf0]  ;;  %v3265_v41 = vld [vmem:[%s5261_s3 + $0x4] sm:$0xf] }
 0x51d   : > { %2001 = vadd.xlane.f32.xlu2 %v2000_v11  ;;  %2298 = vmatpush.bf16.msra.mxu1 %v3104_v31  ;;  %v3097_v11 = vld [vmem:[%s5261_s3 + $0xc8] sm:$0xf0]  ;;  %v3072_v31 = vor.u32 %v3284_v44, %v3071_v29 }
 0x51e   : > { %v1997_v50 = vadd.f32 %v1988_v1, %v1987_v23  ;;  %2317 = vmatpush.bf16.msra.mxu2 %v3044_v62  ;;  %2336 = vmatpush.bf16.msra.mxu3 %v3108_v42  ;;  %v3100_v23 = vor.u32 %v3289_v17, %v3097_v11  ;;  %v3023_v1 = vld [vmem:[%s5261_s3 + $0x30] sm:$0xf]  ;;  %v3012_v62 = vor.u32 %v3267_v10, %v3009_v37  ;;  %v3281_v11 = vld [vmem:[%s5261_s3 + $0x84] sm:$0xf] }
 0x520   : > { %1998 = vadd.xlane.f32.xlu1 %v1997_v50  ;;  %2280 = vmatpush.bf16.msra.mxu0 %v3032_v51  ;;  %v3272_v50 = vld [vmem:[%s5261_s3 + $0x34] sm:$0xf0]  ;;  %v3063_v51 = vld [vmem:[%s5261_s3 + $0x80] sm:$0xf] }
 0x521   : > { %2299 = vmatpush.bf16.msra.mxu1 %v3096_v22  ;;  %v3024_v58 = vor.u32 %v3272_v50, %v3023_v1  ;;  %v3001_v22 = vld [vmem:[%s5261_s3 + $0x8] sm:$0xf0] }
 0x522   : > { %2318 = vmatpush.bf16.msra.mxu2 %v3036_v4  ;;  %2337 = vmatpush.bf16.msra.mxu3 %v3100_v23  ;;  %v3064_v4 = vor.u32 %v3282_v13, %v3063_v51  ;;  %v3004_v17 = vor.u32 %v3265_v41, %v3001_v22  ;;  %v3065_v23 = vld [vmem:[%s5261_s3 + $0x88] sm:$0xf0] }
 0x523   : > { %v3068_v1 = vor.u32 %v3281_v11, %v3065_v23 }
 0x524   : > { %2281 = vmatpush.bf16.msra.mxu0 %v3024_v58 }
 0x525   : > { %2300 = vmatpush.bf16.msra.mxu1 %v3088_v27 }
 0x526   : > { %2319 = vmatpush.bf16.msra.mxu2 %v3028_v49  ;;  %2338 = vmatpush.bf16.msra.mxu3 %v3092_v38 }
 0x528   : > { %2282 = vmatpush.bf16.msra.mxu0 %v3016_v15 }
 0x529   : > { %2301 = vmatpush.bf16.msra.mxu1 %v3080_v5 }
 0x52a   : > { %2320 = vmatpush.bf16.msra.mxu2 %v3020_v35  ;;  %2339 = vmatpush.bf16.msra.mxu3 %v3084_v48 }
 0x52c   : > { %2283 = vmatpush.bf16.msra.mxu0 %v3008_v55 }
 0x52d   : > { %2302 = vmatpush.bf16.msra.mxu1 %v3072_v31 }
 0x52e   : > { %2321 = vmatpush.bf16.msra.mxu2 %v3012_v62  ;;  %2340 = vmatpush.bf16.msra.mxu3 %v3076_v0 }
 0x530   : > { %2284 = vmatpush.bf16.msra.mxu0 %v3000_v46 }
 0x531   : > { %2303 = vmatpush.bf16.msra.mxu1 %v3064_v4 }
 0x532   : > { %2322 = vmatpush.bf16.msra.mxu2 %v3004_v17  ;;  %2341 = vmatpush.bf16.msra.mxu3 %v3068_v1 }
 0x571   : > { %v1993_v28 = vpop.xlane.xlu2 %1992 }
 0x572   : > { %v2003_v56 = vmul.f32 %v1993_v28, %v3707_v6 }
 0x574   : > { %v2007_v42 = vadd.f32 1e-06, %v2003_v56 }
 0x576   : > { %3464 = vrsqrt.f32 %v2007_v42  ;;  %vm2017_vm4 = vweird.f32 %v2007_v42 }
 0x579   : > { %v1996_v50 = vpop.xlane.xlu0 %1995 }
 0x57a   : > { %v2004_v47 = vmul.f32 %v1996_v50, %v3707_v6 }
 0x57c   : > { %v3465_v58 = vpop.eup %3464  ;;  %v2008_v30 = vadd.f32 1e-06, %v2004_v47 }
 0x57d   : > { %v2012_v39 = vmul.f32 %v3465_v58, %v2007_v42  ;;  %vm2018_vm3 = vweird.f32 %v3465_v58 }
 0x57e   : > { %3466 = vrsqrt.f32 %v2008_v30  ;;  %vm2019_vm5 = vmor %vm2017_vm4, %vm2018_vm3  ;;  %vm2027_vm7 = vweird.f32 %v2008_v30 }
 0x57f   : > { %v2013_v34 = vmul.f32 %v3465_v58, %v2012_v39 }
 0x581   : > { %v2014_v27 = vmul.f32 0.5, %v2013_v34 }
 0x583   : > { %v2015_v49 = vsub.f32 1.5, %v2014_v27 }
 0x584   : > { %v3467_v45 = vpop.eup %3466 }
 0x585   : > { %v2016_v32 = vmul.f32 %v3465_v58, %v2015_v49  ;;  %v2022_v38 = vmul.f32 %v3467_v45, %v2008_v30  ;;  %vm2028_vm6 = vweird.f32 %v3467_v45 }
 0x586   : > { %vm2029_vm8 = vmor %vm2027_vm7, %vm2028_vm6 }
 0x587   : > { %v2023_v19 = vmul.f32 %v3467_v45, %v2022_v38  ;;  %v2020_v26 = vsel %vm2019_vm5, %v3465_v58, %v2016_v32 }
 0x588   : > { %v2051_v60 = vmul.f32 %v2020_v26, %v4950_v20  ;;  %v2052_v43 = vmul.f32 %v2020_v26, %v4953_v36 }
 0x589   : > { %v2024_v54 = vmul.f32 0.5, %v2023_v19 }
 0x58a   : > { %v2059_v48 = vmul.f32 %v2051_v60, %v5301_v12  ;;  %v2060_v28 = vmul.f32 %v2052_v43, %v5302_v2 }
 0x58b   : > { %v2025_v15 = vsub.f32 1.5, %v2024_v54 }
 0x58c   : > { %v2067_v56 = vadd.f32 %v2059_v48, %v5303_v33 }
 0x58d   : > { %v2026_v8 = vmul.f32 %v3467_v45, %v2025_v15 }
 0x58f   : > { %v2030_v5 = vsel %vm2029_vm8, %v3467_v45, %v2026_v8  ;;  %v2112_v45 = vperm.slane %v4902_v16, 7 }
 0x590   : > { %v2053_v35 = vmul.f32 %v2030_v5, %v4961_v25  ;;  %v2054_v24 = vmul.f32 %v2030_v5, %v4964_v14  ;;  %v2002_v53 = vpop.xlane.xlu2 %2001  ;;  %v5196_v25 = vadd.f32 %v2060_v28, %v5304_v18 }
 0x591   : > { %v2006_v57 = vmul.f32 %v2002_v53, %v3707_v6  ;;  %v2116_v38 = vperm.slane %v2112_v45, 3 }
 0x592   : > { %v2061_v7 = vmul.f32 %v2053_v35, %v5301_v12  ;;  %v2062_v20 = vmul.f32 %v2054_v24, %v5302_v2 }
 0x593   : > { %v2010_v36 = vadd.f32 1e-06, %v2006_v57  ;;  %v1999_v29 = vpop.xlane.xlu1 %1998 }
 0x594   : > { %v5193_v55 = vadd.f32 %v2061_v7, %v5303_v33  ;;  %v5199_v14 = vadd.f32 %v2062_v20, %v5304_v18  ;;  %v2005_v44 = vmul.f32 %v1999_v29, %v3707_v6 }
 0x595   : > { %3468 = vrsqrt.f32 %v2010_v36  ;;  %vm2047_vm10 = vweird.f32 %v2010_v36 }
 0x596   : > { %v2107_v10 = vpack.c.bf16 %v5193_v55, %v2067_v56  ;;  %v2108_v37 = vpack.c.bf16 %v5199_v14, %v5196_v25  ;;  %v2009_v31 = vadd.f32 1e-06, %v2005_v44 }
 0x598   : > { %2285 = vmatmul.bf16.vlgmr.msra.gmra.mxu0 %v2107_v10  ;;  %2304 = vmatmul.bf16.vlgmr.msra.gmra.mxu1 %v2108_v37  ;;  %3470 = vrsqrt.f32 %v2009_v31  ;;  %vm2037_vm13 = vweird.f32 %v2009_v31 }
 0x599   : > { %2323 = vmatmul.bf16.vlgmr.msra.gmra.mxu2 %v2107_v10  ;;  %2342 = vmatmul.bf16.vlgmr.msra.gmra.mxu3 %v2108_v37 }
 0x59b   : > { %v3469_v62 = vpop.eup %3468 }
 0x59c   : > { %v2042_v40 = vmul.f32 %v3469_v62, %v2010_v36  ;;  %vm2048_vm9 = vweird.f32 %v3469_v62 }
 0x59d   : > { %vm2049_vm11 = vmor %vm2047_vm10, %vm2048_vm9 }
 0x59e   : > { %v2043_v59 = vmul.f32 %v3469_v62, %v2042_v40  ;;  %v3471_v42 = vpop.eup %3470 }
 0x59f   : > { %v2032_v52 = vmul.f32 %v3471_v42, %v2009_v31  ;;  %vm2038_vm12 = vweird.f32 %v3471_v42 }
 0x5a0   : > { %v2044_v0 = vmul.f32 0.5, %v2043_v59  ;;  %vm2039_vm14 = vmor %vm2037_vm13, %vm2038_vm12 }
 0x5a1   : > { %v2033_v6 = vmul.f32 %v3471_v42, %v2032_v52 }
 0x5a2   : > { %v2045_v61 = vsub.f32 1.5, %v2044_v0 }
 0x5a3   : > { %v2034_v46 = vmul.f32 0.5, %v2033_v6 }
 0x5a4   : > { %v2046_v51 = vmul.f32 %v3469_v62, %v2045_v61 }
 0x5a5   : > { %v2035_v13 = vsub.f32 1.5, %v2034_v46 }
 0x5a6   : > { %v2050_v41 = vsel %vm2049_vm11, %v3469_v62, %v2046_v51 }
 0x5a7   : > { %v2057_v22 = vmul.f32 %v2050_v41, %v4971_v3  ;;  %v2058_v4 = vmul.f32 %v2050_v41, %v4973_v9  ;;  %v2036_v17 = vmul.f32 %v3471_v42, %v2035_v13 }
 0x5a9   : > { %v2040_v11 = vsel %vm2039_vm14, %v3471_v42, %v2036_v17  ;;  %v2065_v1 = vmul.f32 %v2057_v22, %v5301_v12  ;;  %v2066_v47 = vmul.f32 %v2058_v4, %v5302_v2 }
 0x5aa   : > { %v2055_v23 = vmul.f32 %v2040_v11, %v4980_v21  ;;  %v2056_v50 = vmul.f32 %v2040_v11, %v4982_v63  ;;  %v2111_v63 = vperm.slane %v4902_v16, 3 }
 0x5ab   : > { %v2073_v9 = vadd.f32 %v2065_v1, %v5303_v33  ;;  %v2074_v34 = vadd.f32 %v2066_v47, %v5304_v18 }
 0x5ac   : > { %v2063_v58 = vmul.f32 %v2055_v23, %v5301_v12  ;;  %v2064_v30 = vmul.f32 %v2056_v50, %v5302_v2  ;;  %v2115_v12 = vperm.slane %v2111_v63, 3 }
 0x5ae   : > { %v2071_v3 = vadd.f32 %v2063_v58, %v5303_v33  ;;  %v2072_v39 = vadd.f32 %v2064_v30, %v5304_v18 }
 0x5b0   : > { %v2109_v21 = vpack.c.bf16 %v2073_v9, %v2071_v3  ;;  %v2110_v27 = vpack.c.bf16 %v2074_v34, %v2072_v39 }
 0x5b2   : > { %2290 = vmatmul.bf16.gmra.mxu0 %v2109_v21  ;;  %2309 = vmatmul.bf16.gmra.mxu1 %v2110_v27 }
 0x5b3   : > { %2328 = vmatmul.bf16.gmra.mxu2 %v2109_v21  ;;  %2347 = vmatmul.bf16.gmra.mxu3 %v2110_v27 }
 0x615   : > { %v2286_v49 = vpop.f32.mrf.mxu0  ;;  %v2305_v2 = vpop.f32.mrf.mxu1 }
 0x616   : > { %v2287_v32 = vadd.f32 %v2286_v49, %v2115_v12 }
 0x618   : > { %v2306_v33 = vadd.f32 %v2305_v2, %v2287_v32 }
 0x61a   : > { %v2353_v19 = vadd.f32 %v2306_v33, %v2067_v56 }
 0x61c   : > { %2361 = vst [vmem:[%s5220_s16] sm:$0xff] %v2353_v19  ;;  %v2324_v18 = vpop.f32.mrf.mxu2  ;;  %v2343_v26 = vpop.f32.mrf.mxu3 }
 0x61d   : > { %v2325_v54 = vadd.f32 %v2324_v18, %v2116_v38  ;;  %v2288_v15 = vpop.f32.mrf.mxu0  ;;  %v2307_v8 = vpop.f32.mrf.mxu1 }
 0x61e   : > { %v2289_v60 = vadd.f32 %v2288_v15, %v2115_v12 }
 0x61f   : > { %v2344_v43 = vadd.f32 %v2343_v26, %v2325_v54 }
 0x620   : > { %v2308_v5 = vadd.f32 %v2307_v8, %v2289_v60 }
 0x621   : > { %v2354_v16 = vadd.f32 %v2344_v43, %v5196_v25 }
 0x622   : > { %v2355_v35 = vadd.f32 %v2308_v5, %v5193_v55 }
 0x623   : > { %2362 = vst [vmem:[%s5220_s16 + $0x8] sm:$0xff] %v2354_v16  ;;  %v2394_v51 = vld [vmem:[%s5220_s16] sm:$0xff] (%p3561_p5) }
 0x624   : > { %3125 = vst [vmem:[%s5220_s16 + $0x10] sm:$0xff] %v2355_v35  ;;  %v2326_v24 = vpop.f32.mrf.mxu2  ;;  %v2345_v48 = vpop.f32.mrf.mxu3 }
 0x625   : > { %v2327_v53 = vadd.f32 %v2326_v24, %v2116_v38  ;;  %2395 = vst [vmem:[%s2381_s18] sm:$0xff] (%p3561_p5), %v2394_v51 }
 0x627   : > { %v2346_v28 = vadd.f32 %v2345_v48, %v2327_v53 }
 0x629   : > { %v2356_v57 = vadd.f32 %v2346_v28, %v5199_v14 }
 0x62a   : > { %v2396_v46 = vld [vmem:[%s5220_s16 + $0x8] sm:$0xff] (%p3561_p5) }
 0x62b   : > { %3126 = vst [vmem:[%s5220_s16 + $0x18] sm:$0xff] %v2356_v57  ;;  %v2398_v13 = vld [vmem:[%s5220_s16 + $0x10] sm:$0xff] (%p3561_p5) }
 0x62c   : > { %2397 = vst [vmem:[%s2381_s18 + $0x8] sm:$0xff] (%p3561_p5), %v2396_v46 }
 0x62d   : > { %2399 = vst [vmem:[%s2381_s18 + $0x20] sm:$0xff] (%p3561_p5), %v2398_v13 }
 0x62f   : > { %v2291_v7 = vpop.f32.mrf.mxu0  ;;  %v2310_v20 = vpop.f32.mrf.mxu1 }
 0x630   : > { %v2292_v36 = vadd.f32 %v2291_v7, %v2115_v12 }
 0x632   : > { %v2311_v29 = vadd.f32 %v2310_v20, %v2292_v36  ;;  %v2400_v41 = vld [vmem:[%s5220_s16 + $0x18] sm:$0xff] (%p3561_p5) }
 0x633   : > { %2401 = vst [vmem:[%s2381_s18 + $0x28] sm:$0xff] (%p3561_p5), %v2400_v41 }
 0x634   : > { %v2357_v56 = vadd.f32 %v2311_v29, %v2071_v3 }
 0x636   : > { %3127 = vst [vmem:[%s5220_s16 + $0x20] sm:$0xff] %v2357_v56  ;;  %v2329_v25 = vpop.f32.mrf.mxu2  ;;  %v2348_v44 = vpop.f32.mrf.mxu3 }
 0x637   : > { %v2330_v55 = vadd.f32 %v2329_v25, %v2116_v38  ;;  %v2293_v10 = vpop.f32.mrf.mxu0  ;;  %v2312_v62 = vpop.f32.mrf.mxu1 }
 0x638   : > { %v2294_v37 = vadd.f32 %v2293_v10, %v2115_v12 }
 0x639   : > { %v2349_v31 = vadd.f32 %v2348_v44, %v2330_v55 }
 0x63a   : > { %v2313_v40 = vadd.f32 %v2312_v62, %v2294_v37 }
 0x63b   : > { %v2358_v59 = vadd.f32 %v2349_v31, %v2072_v39 }
 0x63c   : > { %v2359_v14 = vadd.f32 %v2313_v40, %v2073_v9 }
 0x63d   : > { %3128 = vst [vmem:[%s5220_s16 + $0x28] sm:$0xff] %v2358_v59  ;;  %v2402_v22 = vld [vmem:[%s5220_s16 + $0x20] sm:$0xff] (%p3561_p5) }
 0x63e   : > { %3129 = vst [vmem:[%s5220_s16 + $0x30] sm:$0xff] %v2359_v14  ;;  %v2331_v42 = vpop.f32.mrf.mxu2  ;;  %v2350_v52 = vpop.f32.mrf.mxu3 }
 0x63f   : > { %v2332_v0 = vadd.f32 %v2331_v42, %v2116_v38  ;;  %2403 = vst [vmem:[%s2381_s18 + $0x40] sm:$0xff] (%p3561_p5), %v2402_v22 }
 0x641   : > { %v2351_v61 = vadd.f32 %v2350_v52, %v2332_v0  ;;  %2378 = sbr.rel (!%p3561_p5) target bundleno = 1614 (0x64e), region = 67 }
 0x643   : > { %v2360_v6 = vadd.f32 %v2351_v61, %v2074_v34 }
 0x644   : > { %v2404_v4 = vld [vmem:[%s5220_s16 + $0x28] sm:$0xff] (%p3561_p5) }
 0x645   : > { %3130 = vst [vmem:[%s5220_s16 + $0x38] sm:$0xff] %v2360_v6  ;;  %v2406_v17 = vld [vmem:[%s5220_s16 + $0x30] sm:$0xff] (%p3561_p5) }
 0x646   : > { %2405 = vst [vmem:[%s2381_s18 + $0x48] sm:$0xff] %v2404_v4 }
 0x647   : > { %2407 = vst [vmem:[%s2381_s18 + $0x60] sm:$0xff] %v2406_v17 }
 0x64c   : > { %v2408_v11 = vld [vmem:[%s5220_s16 + $0x38] sm:$0xff] }
 0x64d   : > { %2409 = vst [vmem:[%s2381_s18 + $0x68] sm:$0xff] %v2408_v11 }
 0x64e PF: > { %p12_p10 = scmp.ge.s32.totalorder %s3548_s22, 4   ;;  %s5305_s18 = smov %s3491_s19 }
 0x64f   : > { %s5306_s19 = smov %s3559_s25  ;;  %s5307_s20 = smov %s3548_s22 }
 0x650   :  { %14 = sbr.rel (!%p12_p10) target bundleno = 2 (0x2), region = 127 }

</bundles_post_ra>
